<compile_context>
chip_gen: v6e
topology: v6e:2x2x1
jax: 0.10.0
libtpu: 0.0.40
codegen_flags: <defaults>
</compile_context>

<pallas_src>
import math
from functools import partial

import jax
import jax.numpy as jnp
from jax.experimental import pallas as pl
from jax.experimental.pallas import tpu as pltpu


# ----------------------------------------------------------------------------
# helpers
# ----------------------------------------------------------------------------
def _cparams(*sems):
    # modest vmem limit so tile choices stay valid on v7x (64 MiB / TC) as well
    # as v5e/v6e (128 MiB / TC).
    return pltpu.CompilerParams(dimension_semantics=tuple(sems),
                                vmem_limit_bytes=48 * 1024 * 1024)


def _row_tile(m, cap=512):
    """Row tile for (M, K) matmul-style kernels: full if small, else 512 (mult of 8)."""
    return m if m <= cap else cap


def _seq_tile(n, cap=256):
    """Sequence-batch tile for the mixer kernels: full if small, else 256 (mult of 8)."""
    return n if n <= cap else cap


def _layernorm_val(x, g, b, eps):
    """LayerNorm over the last dim of an in-register value (f32)."""
    mu = jnp.mean(x, axis=-1, keepdims=True)
    d = x - mu
    var = jnp.mean(d * d, axis=-1, keepdims=True)
    return d * jax.lax.rsqrt(var + eps) * g + b


def _gelu_exact(x):
    """Exact (erf-based) GELU built only from guaranteed-lowerable ops.

    erf via Abramowitz & Stegun 7.1.26 polynomial (|err| < 1.5e-7), so it
    matches nn.GELU() (erf form) to f32 rounding while staying on VPU/EUP ops
    (mul/add/exp/select) that Mosaic supports on every TPU generation.
    """
    z = x * 0.7071067811865475
    s = jnp.where(z < 0.0, -1.0, 1.0)
    a = z * s
    t = 1.0 / (1.0 + 0.3275911 * a)
    poly = t * (0.254829592 + t * (-0.284496736 + t * (1.421413741
                + t * (-1.453152027 + t * 1.061405429))))
    erf = s * (1.0 - poly * jnp.exp(-a * a))
    return 0.5 * x * (1.0 + erf)


# ----------------------------------------------------------------------------
# Pallas kernels
# ----------------------------------------------------------------------------
def _linear_kernel(x_ref, w_ref, b_ref, o_ref):
    """y = x @ w + b  (bf16 MXU operands, f32 accumulation)."""
    y = jnp.dot(x_ref[...].astype(jnp.bfloat16), w_ref[...].astype(jnp.bfloat16),
                preferred_element_type=jnp.float32) + b_ref[...]
    o_ref[...] = y.astype(o_ref.dtype)


def _mixer_dir_kernel(x_ref, g_ref, bln_ref, w_ref, bp_ref, o_ref, *, eps, scan_axis):
    """Fused: norm1 -> [a|u] projection -> bidirectional gated scan -> cat.

    scan_axis == 0 (vertical):   x_ref (L, TN, D),  o_ref (L, TN, 2D)
    scan_axis == 1 (horizontal): x_ref (TN, L, D),  o_ref (TN, L*2D)  (lane-dense)
    Recurrence: h_t = a_t * h_{t-1} + (1 - a_t) * u_t, a = sigmoid(xn@Wa + ba),
    u = xn@Wu + bu; output per position is concat([fwd, bwd], -1).
    """
    x = x_ref[...].astype(jnp.float32)
    xn = _layernorm_val(x, g_ref[...], bln_ref[...], eps)

    D = x.shape[-1]
    L = x.shape[0] if scan_axis == 0 else x.shape[1]
    w = w_ref[...].astype(jnp.bfloat16)       # (D, 2D) fused [Wa | Wu]
    bp = bp_ref[...]                          # (1, 2D)

    # per-step projections (kept in registers; reused by both scan directions)
    a_s, u_s = [], []
    for t in range(L):                        # static unroll: L = H or W (small)
        xt = xn[t] if scan_axis == 0 else xn[:, t, :]          # (TN, D)
        y = jnp.dot(xt.astype(jnp.bfloat16), w,
                    preferred_element_type=jnp.float32) + bp    # (TN, 2D)
        a_s.append(jax.nn.sigmoid(y[:, :D]))
        u_s.append(y[:, D:])

    # forward and backward gated scans (f32, VPU)
    hf = jnp.zeros_like(u_s[0])
    hb = jnp.zeros_like(u_s[0])
    fwd = [None] * L
    bwd = [None] * L
    for t in range(L):
        hf = a_s[t] * hf + (1.0 - a_s[t]) * u_s[t]
        fwd[t] = hf
        tb = L - 1 - t
        hb = a_s[tb] * hb + (1.0 - a_s[tb]) * u_s[tb]
        bwd[tb] = hb

    cats = [jnp.concatenate([fwd[t], bwd[t]], axis=-1) for t in range(L)]  # (TN, 2D)
    if scan_axis == 0:
        out = jnp.stack(cats, axis=0)             # (L, TN, 2D)
    else:
        out = jnp.concatenate(cats, axis=-1)      # (TN, L*2D) lane-dense
    o_ref[...] = out.astype(o_ref.dtype)          # single store per block


def _mixer_fc_kernel(v_ref, h_ref, x_ref, wv_ref, wh_ref, b_ref, o_ref):
    """out = x + [v | h] @ fc_w + fc_b, with fc_w split as (wv; wh)."""
    acc = jnp.dot(v_ref[...].astype(jnp.bfloat16), wv_ref[...].astype(jnp.bfloat16),
                  preferred_element_type=jnp.float32)
    acc = acc + jnp.dot(h_ref[...].astype(jnp.bfloat16), wh_ref[...].astype(jnp.bfloat16),
                        preferred_element_type=jnp.float32)
    acc = acc + b_ref[...]
    o_ref[...] = (x_ref[...].astype(jnp.float32) + acc).astype(o_ref.dtype)


def _mlp_block_kernel(x_ref, g_ref, bln_ref, w1_ref, b1_ref, w2_ref, b2_ref, o_ref, *, eps):
    """out = x + fc2( GELU( fc1( LayerNorm(x) ) ) )   (fully fused)."""
    x = x_ref[...].astype(jnp.float32)
    xn = _layernorm_val(x, g_ref[...], bln_ref[...], eps)
    h1 = jnp.dot(xn.astype(jnp.bfloat16), w1_ref[...].astype(jnp.bfloat16),
                 preferred_element_type=jnp.float32) + b1_ref[...]
    h1 = _gelu_exact(h1)
    h2 = jnp.dot(h1.astype(jnp.bfloat16), w2_ref[...].astype(jnp.bfloat16),
                 preferred_element_type=jnp.float32) + b2_ref[...]
    o_ref[...] = (x + h2).astype(o_ref.dtype)


def _norm_mean_head_kernel(x_ref, g_ref, b_ref, w_ref, hb_ref, o_ref, acc_ref,
                           *, eps, s_total, ts):
    """Fused final LayerNorm -> spatial mean (accumulated over S tiles) -> head."""
    si = pl.program_id(0)

    @pl.when(si == 0)
    def _():
        acc_ref[...] = jnp.zeros_like(acc_ref)

    x = x_ref[...].astype(jnp.float32)                     # (B, TS, D)
    y = _layernorm_val(x, g_ref[...], b_ref[...], eps)
    # mask rows that fall past S (last partial tile)
    pos = jax.lax.broadcasted_iota(jnp.int32, y.shape, 1) + si * ts
    y = jnp.where(pos < s_total, y, 0.0)
    acc_ref[...] += jnp.sum(y, axis=1)                     # (B, D)

    @pl.when(si == pl.num_programs(0) - 1)
    def _():
        pooled = acc_ref[...] * (1.0 / s_total)            # mean over (H, W)
        logits = jnp.dot(pooled.astype(jnp.bfloat16), w_ref[...].astype(jnp.bfloat16),
                         preferred_element_type=jnp.float32) + hb_ref[...]
        o_ref[...] = logits.astype(o_ref.dtype)


# ----------------------------------------------------------------------------
# Pallas wrappers
# ----------------------------------------------------------------------------
def linear(x, w, b):
    """x: (M, K), w: (K, N), b: (N,) -> (M, N); tiled over M, weights resident."""
    M, K = x.shape
    N = w.shape[1]
    TM = _row_tile(M)
    return pl.pallas_call(
        _linear_kernel,
        out_shape=jax.ShapeDtypeStruct((M, N), x.dtype),
        grid=(pl.cdiv(M, TM),),
        in_specs=[pl.BlockSpec((TM, K), lambda i: (i, 0)),
                  pl.BlockSpec((K, N), lambda i: (0, 0)),
                  pl.BlockSpec((1, N), lambda i: (0, 0))],
        out_specs=pl.BlockSpec((TM, N), lambda i: (i, 0)),
        compiler_params=_cparams("parallel"),
    )(x, w, b.reshape(1, N))


def _mixer_dir(x, ln_g, ln_b, w_au, b_au, *, vertical, eps=1e-6):
    """One bidirectional scan direction, fully fused; returns (B*H*W, 2D) rows
    in the same row-major (b, h, w) order as x.reshape(-1, D)."""
    B, H, W, D = x.shape
    if vertical:      # sequences run along H, batched over W columns
        TN = _seq_tile(W)
        grid = (B, pl.cdiv(W, TN))
        in_blk = (None, H, TN, D)
        io_idx = lambda bi, j: (bi, 0, j, 0)
        out_shape = jax.ShapeDtypeStruct((B, H, W, 2 * D), x.dtype)
        out_spec = pl.BlockSpec((None, H, TN, 2 * D), io_idx)
        scan_axis = 0
    else:             # sequences run along W, batched over H rows
        TN = _seq_tile(H)
        grid = (B, pl.cdiv(H, TN))
        in_blk = (None, TN, W, D)
        io_idx = lambda bi, j: (bi, j, 0, 0)
        # lane-dense output: (B, H, W*2D) so the kernel does one unmasked store
        out_shape = jax.ShapeDtypeStruct((B, H, W * 2 * D), x.dtype)
        out_spec = pl.BlockSpec((None, TN, W * 2 * D), lambda bi, j: (bi, j, 0))
        scan_axis = 1

    y = pl.pallas_call(
        partial(_mixer_dir_kernel, eps=eps, scan_axis=scan_axis),
        out_shape=out_shape,
        grid=grid,
        in_specs=[
            pl.BlockSpec(in_blk, io_idx),
            pl.BlockSpec((1, 1, D), lambda bi, j: (0, 0, 0)),
            pl.BlockSpec((1, 1, D), lambda bi, j: (0, 0, 0)),
            pl.BlockSpec((D, 2 * D), lambda bi, j: (0, 0)),
            pl.BlockSpec((1, 2 * D), lambda bi, j: (0, 0)),
        ],
        out_specs=out_spec,
        compiler_params=_cparams("parallel", "parallel"),
    )(x, ln_g.reshape(1, 1, D), ln_b.reshape(1, 1, D), w_au, b_au.reshape(1, 2 * D))
    return y.reshape(B * H * W, 2 * D)      # pure row-major metadata reshape


def mamba2d_mixer(x, p, eps=1e-6):
    """norm1 + bidirectional vertical/horizontal gated scans (union='cat',
    with_fc) + residual, as 3 fused pallas_calls."""
    B, H, W, D = x.shape
    M = B * H * W

    v2 = _mixer_dir(x, p["ln1_g"], p["ln1_b"], p["w_au_v"], p["b_au_v"],
                    vertical=True, eps=eps)
    h2 = _mixer_dir(x, p["ln1_g"], p["ln1_b"], p["w_au_h"], p["b_au_h"],
                    vertical=False, eps=eps)

    TM = _row_tile(M)
    out = pl.pallas_call(
        _mixer_fc_kernel,
        out_shape=jax.ShapeDtypeStruct((M, D), x.dtype),
        grid=(pl.cdiv(M, TM),),
        in_specs=[
            pl.BlockSpec((TM, 2 * D), lambda i: (i, 0)),
            pl.BlockSpec((TM, 2 * D), lambda i: (i, 0)),
            pl.BlockSpec((TM, D), lambda i: (i, 0)),
            pl.BlockSpec((2 * D, D), lambda i: (0, 0)),
            pl.BlockSpec((2 * D, D), lambda i: (0, 0)),
            pl.BlockSpec((1, D), lambda i: (0, 0)),
        ],
        out_specs=pl.BlockSpec((TM, D), lambda i: (i, 0)),
        compiler_params=_cparams("parallel"),
    )(v2, h2, x.reshape(M, D), p["fc_wv"], p["fc_wh"], p["fc_b"].reshape(1, D))
    return out.reshape(B, H, W, D)


def block_forward(x, p):
    """Sequencer2DBlock: x + mixer(norm1(x)); then x + mlp(norm2(x))."""
    B, H, W, D = x.shape
    x = mamba2d_mixer(x, p)                       # norm1 + mixer + residual (fused)

    M = B * H * W
    TM = _row_tile(M)
    hidden = p["mlp_w1"].shape[1]
    out = pl.pallas_call(
        partial(_mlp_block_kernel, eps=1e-6),
        out_shape=jax.ShapeDtypeStruct((M, D), x.dtype),
        grid=(pl.cdiv(M, TM),),
        in_specs=[
            pl.BlockSpec((TM, D), lambda i: (i, 0)),
            pl.BlockSpec((1, D), lambda i: (0, 0)),
            pl.BlockSpec((1, D), lambda i: (0, 0)),
            pl.BlockSpec((D, hidden), lambda i: (0, 0)),
            pl.BlockSpec((1, hidden), lambda i: (0, 0)),
            pl.BlockSpec((hidden, D), lambda i: (0, 0)),
            pl.BlockSpec((1, D), lambda i: (0, 0)),
        ],
        out_specs=pl.BlockSpec((TM, D), lambda i: (i, 0)),
        compiler_params=_cparams("parallel"),
    )(x.reshape(M, D), p["ln2_g"].reshape(1, D), p["ln2_b"].reshape(1, D),
      p["mlp_w1"], p["mlp_b1"].reshape(1, hidden),
      p["mlp_w2"], p["mlp_b2"].reshape(1, D))
    return out.reshape(B, H, W, D)


def norm_mean_head(x, g, b, w, hb, eps=1e-6):
    """x: (B, S, D); fused LayerNorm -> mean over S -> classifier -> (B, C)."""
    B, S, D = x.shape
    C = w.shape[1]
    TS = S if S <= 512 else 512
    return pl.pallas_call(
        partial(_norm_mean_head_kernel, eps=eps, s_total=S, ts=TS),
        out_shape=jax.ShapeDtypeStruct((B, C), x.dtype),
        grid=(pl.cdiv(S, TS),),
        in_specs=[
            pl.BlockSpec((B, TS, D), lambda s: (0, s, 0)),
            pl.BlockSpec((1, 1, D), lambda s: (0, 0, 0)),
            pl.BlockSpec((1, 1, D), lambda s: (0, 0, 0)),
            pl.BlockSpec((D, C), lambda s: (0, 0)),
            pl.BlockSpec((1, C), lambda s: (0, 0)),
        ],
        out_specs=pl.BlockSpec((B, C), lambda s: (0, 0)),
        scratch_shapes=[pltpu.VMEM((B, D), jnp.float32)],
        compiler_params=_cparams("arbitrary"),
    )(x, g.reshape(1, 1, D), b.reshape(1, 1, D), w, hb.reshape(1, C))


# ----------------------------------------------------------------------------
# Model glue (reshapes / parameter plumbing in plain JAX)
# ----------------------------------------------------------------------------
def patchify(x_nhwc, patch):
    """Non-overlapping patches; flatten each patch in (C, ph, pw) order to
    match PyTorch Conv2d weight.reshape(out, C*P*P)."""
    B, H, W, C = x_nhwc.shape
    Ho, Wo = H // patch, W // patch
    x = x_nhwc.reshape(B, Ho, patch, Wo, patch, C)
    x = jnp.transpose(x, (0, 1, 3, 5, 2, 4))   # (B, Ho, Wo, C, ph, pw)
    return x.reshape(B, Ho, Wo, C * patch * patch)


def forward(params, x_nchw, cfg):
    x = jnp.transpose(x_nchw, (0, 2, 3, 1))                   # NCHW -> NHWC
    # stem: PatchEmbed conv(kernel=stride=patch_sizes[0]) as patchify + matmul
    xp = patchify(x, cfg["patch_sizes"][0])
    B, Ho, Wo, K = xp.shape
    x = linear(xp.reshape(-1, K), params["stem_w"], params["stem_b"]).reshape(B, Ho, Wo, -1)

    for si, stage in enumerate(params["stages"]):
        for bp in stage["blocks"]:
            x = block_forward(x, bp)
        if "down_w" in stage:                                 # Downsample2D
            xp = patchify(x, cfg["patch_sizes"][si + 1])
            B, Ho, Wo, K = xp.shape
            x = linear(xp.reshape(-1, K), stage["down_w"], stage["down_b"]).reshape(B, Ho, Wo, -1)

    B, H, W, D = x.shape
    return norm_mean_head(x.reshape(B, H * W, D),
                          params["norm_g"], params["norm_b"],
                          params["head_w"], params["head_b"])


# ----------------------------------------------------------------------------
# Deterministic parameter init (shapes follow the module; values synthetic)
# ----------------------------------------------------------------------------
def xavier_uniform(key, shape):
    fan_in, fan_out = shape
    a = math.sqrt(6.0 / (fan_in + fan_out))
    return jax.random.uniform(key, shape, jnp.float32, -a, a)


def lecun_normal(key, shape):
    fan_in = shape[0]
    return jax.random.normal(key, shape, jnp.float32) * math.sqrt(1.0 / fan_in)


def init_params(key, cfg):
    keys = iter(jax.random.split(key, 512))
    nk = lambda: next(keys)
    params = {}
    D0 = cfg["embed_dims"][0]
    K0 = cfg["in_chans"] * cfg["patch_sizes"][0] ** 2
    params["stem_w"] = lecun_normal(nk(), (K0, D0))           # conv -> lecun_normal
    params["stem_b"] = jnp.zeros((D0,), jnp.float32)

    stages = []
    for i, D in enumerate(cfg["embed_dims"]):
        blocks = []
        for _ in range(cfg["layers"][i]):
            hidden = int(cfg["mlp_ratios"][i] * D)
            bp = dict(
                ln1_g=jnp.ones((D,), jnp.float32), ln1_b=jnp.zeros((D,), jnp.float32),
                ln2_g=jnp.ones((D,), jnp.float32), ln2_b=jnp.zeros((D,), jnp.float32),
                mlp_w1=xavier_uniform(nk(), (D, hidden)), mlp_b1=jnp.zeros((hidden,), jnp.float32),
                mlp_w2=xavier_uniform(nk(), (hidden, D)), mlp_b2=jnp.zeros((D,), jnp.float32),
            )
            for d in ("v", "h"):
                wa = xavier_uniform(nk(), (D, D))
                wu = xavier_uniform(nk(), (D, D))
                bp[f"w_au_{d}"] = jnp.concatenate([wa, wu], axis=1)     # fused [Wa | Wu]
                bp[f"b_au_{d}"] = jnp.zeros((2 * D,), jnp.float32)
            fc_w = xavier_uniform(nk(), (4 * D, D))
            bp["fc_wv"] = fc_w[: 2 * D]                                  # split for (v | h)
            bp["fc_wh"] = fc_w[2 * D:]
            bp["fc_b"] = jnp.zeros((D,), jnp.float32)
            blocks.append(bp)
        stage = {"blocks": blocks}
        if i < len(cfg["embed_dims"]) - 1:
            Dn = cfg["embed_dims"][i + 1]
            Kd = D * cfg["patch_sizes"][i + 1] ** 2
            stage["down_w"] = lecun_normal(nk(), (Kd, Dn))
            stage["down_b"] = jnp.zeros((Dn,), jnp.float32)
        stages.append(stage)
    params["stages"] = stages

    Dl = cfg["embed_dims"][-1]
    params["norm_g"] = jnp.ones((Dl,), jnp.float32)
    params["norm_b"] = jnp.zeros((Dl,), jnp.float32)
    # NOTE: reference zero-inits the head; xavier is used here so the full
    # pipeline is exercised non-trivially (init values are synthetic anyway).
    params["head_w"] = xavier_uniform(nk(), (Dl, cfg["num_classes"]))
    params["head_b"] = jnp.zeros((cfg["num_classes"],), jnp.float32)
    return params


# ----------------------------------------------------------------------------
if __name__ == "__main__":
    # Small config consistent with Sequencer2D(__init__) structure.
    cfg = dict(
        num_classes=10,
        img_size=16,
        in_chans=3,
        layers=[1, 1],
        patch_sizes=[4, 2],
        embed_dims=[16, 32],
        mlp_ratios=[2.0, 2.0],
    )
    key = jax.random.PRNGKey(0)
    kp, kx = jax.random.split(key)
    params = init_params(kp, cfg)
    x = jax.random.normal(kx, (2, cfg["in_chans"], cfg["img_size"], cfg["img_size"]),
                          jnp.float32)

    fwd = jax.jit(partial(forward, cfg=cfg))
    logits = fwd(params, x)
    jax.block_until_ready(logits)

    assert logits.shape == (2, cfg["num_classes"]), logits.shape
    assert bool(jnp.all(jnp.isfinite(logits)))
    print("KERNEL_OK")
</pallas_src>

<mosaic_0001>
module attributes {stable_mosaic.version = 11 : i64} {
  func.func @_linear_kernel(%arg0: i32, %arg1: memref<32x48xf32, #tpu.memory_space<vmem>>, %arg2: memref<48x16xf32, #tpu.memory_space<vmem>>, %arg3: memref<1x16xf32, #tpu.memory_space<vmem>>, %arg4: memref<32x16xf32, #tpu.memory_space<vmem>>) attributes {dimension_semantics = [#tpu.dimension_semantics<parallel>], iteration_bounds = array<i64: 1>, scalar_prefetch = 0 : i64, scratch_operands = 0 : i64, tpu.core_type = #tpu.core_type<tc>, window_params = [{transform_indices = @transform_0, window_bounds = array<i64: 32, 48>}, {pipeline_mode = #tpu.pipeline_mode<synchronous>, transform_indices = @transform_1, window_bounds = array<i64: 48, 16>}, {pipeline_mode = #tpu.pipeline_mode<synchronous>, transform_indices = @transform_2, window_bounds = array<i64: 1, 16>}, {transform_indices = @transform_3, window_bounds = array<i64: 32, 16>}]} {
    %c0 = arith.constant 0 : index
    %c0_0 = arith.constant 0 : index
    %0 = vector.load %arg1[%c0, %c0_0] : memref<32x48xf32, #tpu.memory_space<vmem>>, vector<32x48xf32>
    %1 = arith.truncf %0 : vector<32x48xf32> to vector<32x48xbf16>
    %c0_1 = arith.constant 0 : index
    %c0_2 = arith.constant 0 : index
    %2 = vector.load %arg2[%c0_1, %c0_2] : memref<48x16xf32, #tpu.memory_space<vmem>>, vector<48x16xf32>
    %3 = arith.truncf %2 : vector<48x16xf32> to vector<48x16xbf16>
    %cst = arith.constant dense<0.000000e+00> : vector<32x16xf32>
    %4 = tpu.matmul %1, %3, %cst {dimension_numbers = #tpu.dot_dimension_numbers<[1], [0], [0], [1], [0, 0, 1, 1], [], []>} : vector<32x48xbf16>, vector<48x16xbf16>, vector<32x16xf32> -> vector<32x16xf32>
    %c0_3 = arith.constant 0 : index
    %c0_4 = arith.constant 0 : index
    %5 = vector.load %arg3[%c0_3, %c0_4] : memref<1x16xf32, #tpu.memory_space<vmem>>, vector<1x16xf32>
    %6 = vector.broadcast %5 : vector<1x16xf32> to vector<32x16xf32>
    %7 = arith.addf %4, %6 : vector<32x16xf32>
    %c0_5 = arith.constant 0 : index
    %c0_6 = arith.constant 0 : index
    %8 = vector.load %arg4[%c0_5, %c0_6] : memref<32x16xf32, #tpu.memory_space<vmem>>, vector<32x16xf32>
    tpu.vector_store %arg4[%c0_5, %c0_6], %7 {strides = array<i32>} : memref<32x16xf32, #tpu.memory_space<vmem>>, vector<32x16xf32>,
    return
  }
  func.func @transform_0(%arg0: i32) -> (i32, i32) {
    %c0_i32 = arith.constant 0 : i32
    %c0_i32_0 = arith.constant 0 : i32
    return %arg0, %c0_i32 : i32, i32
  }
  func.func @transform_1(%arg0: i32) -> (i32, i32) {
    %c0_i32 = arith.constant 0 : i32
    %c0_i32_0 = arith.constant 0 : i32
    %c0_i32_1 = arith.constant 0 : i32
    return %c0_i32, %c0_i32_0 : i32, i32
  }
  func.func @transform_2(%arg0: i32) -> (i32, i32) {
    %c0_i32 = arith.constant 0 : i32
    %c0_i32_0 = arith.constant 0 : i32
    %c0_i32_1 = arith.constant 0 : i32
    return %c0_i32, %c0_i32_0 : i32, i32
  }
  func.func @transform_3(%arg0: i32) -> (i32, i32) {
    %c0_i32 = arith.constant 0 : i32
    %c0_i32_0 = arith.constant 0 : i32
    return %arg0, %c0_i32 : i32, i32
  }
}

module attributes {stable_mosaic.version = 11 : i64} {
  func.func @_mixer_dir_kernel(%arg0: i32, %arg1: i32, %arg2: memref<1x4x4x16xf32, #tpu.memory_space<vmem>>, %arg3: memref<1x1x16xf32, #tpu.memory_space<vmem>>, %arg4: memref<1x1x16xf32, #tpu.memory_space<vmem>>, %arg5: memref<16x32xf32, #tpu.memory_space<vmem>>, %arg6: memref<1x32xf32, #tpu.memory_space<vmem>>, %arg7: memref<1x4x128xf32, #tpu.memory_space<vmem>>) attributes {dimension_semantics = [#tpu.dimension_semantics<parallel>, #tpu.dimension_semantics<parallel>], iteration_bounds = array<i64: 2, 1>, scalar_prefetch = 0 : i64, scratch_operands = 0 : i64, tpu.core_type = #tpu.core_type<tc>, window_params = [{transform_indices = @transform_0, window_bounds = array<i64: 1, 4, 4, 16>}, {pipeline_mode = #tpu.pipeline_mode<synchronous>, transform_indices = @transform_1, window_bounds = array<i64: 1, 1, 16>}, {pipeline_mode = #tpu.pipeline_mode<synchronous>, transform_indices = @transform_2, window_bounds = array<i64: 1, 1, 16>}, {pipeline_mode = #tpu.pipeline_mode<synchronous>, transform_indices = @transform_3, window_bounds = array<i64: 16, 32>}, {pipeline_mode = #tpu.pipeline_mode<synchronous>, transform_indices = @transform_4, window_bounds = array<i64: 1, 32>}, {transform_indices = @transform_5, window_bounds = array<i64: 1, 4, 128>}]} {
    %c0 = arith.constant 0 : index
    %c0_0 = arith.constant 0 : index
    %c0_1 = arith.constant 0 : index
    %c0_2 = arith.constant 0 : index
    %0 = vector.load %arg2[%c0, %c0_0, %c0_1, %c0_2] : memref<1x4x4x16xf32, #tpu.memory_space<vmem>>, vector<1x4x4x16xf32>
    %1 = vector.shape_cast %0 : vector<1x4x4x16xf32> to vector<4x4x16xf32>
    %c0_3 = arith.constant 0 : index
    %c0_4 = arith.constant 0 : index
    %c0_5 = arith.constant 0 : index
    %2 = vector.load %arg3[%c0_3, %c0_4, %c0_5] : memref<1x1x16xf32, #tpu.memory_space<vmem>>, vector<1x1x16xf32>
    %c0_6 = arith.constant 0 : index
    %c0_7 = arith.constant 0 : index
    %c0_8 = arith.constant 0 : index
    %3 = vector.load %arg4[%c0_6, %c0_7, %c0_8] : memref<1x1x16xf32, #tpu.memory_space<vmem>>, vector<1x1x16xf32>
    %cst = arith.constant dense<0.000000e+00> : vector<4x4xf32>
    %4 = vector.multi_reduction <add>, %1, %cst [2] : vector<4x4x16xf32> to vector<4x4xf32>
    %5 = vector.shape_cast %4 : vector<4x4xf32> to vector<4x4x1xf32>
    %cst_9 = arith.constant 1.600000e+01 : f32
    %6 = vector.broadcast %cst_9 : f32 to vector<4x4x1xf32>
    %7 = arith.divf %5, %6 : vector<4x4x1xf32>
    %8 = vector.broadcast %7 : vector<4x4x1xf32> to vector<4x4x16xf32>
    %9 = arith.subf %1, %8 : vector<4x4x16xf32>
    %10 = arith.mulf %9, %9 : vector<4x4x16xf32>
    %cst_10 = arith.constant dense<0.000000e+00> : vector<4x4xf32>
    %11 = vector.multi_reduction <add>, %10, %cst_10 [2] : vector<4x4x16xf32> to vector<4x4xf32>
    %12 = vector.shape_cast %11 : vector<4x4xf32> to vector<4x4x1xf32>
    %cst_11 = arith.constant 1.600000e+01 : f32
    %13 = vector.broadcast %cst_11 : f32 to vector<4x4x1xf32>
    %14 = arith.divf %12, %13 : vector<4x4x1xf32>
    %cst_12 = arith.constant 9.99999997E-7 : f32
    %15 = vector.broadcast %cst_12 : f32 to vector<4x4x1xf32>
    %16 = arith.addf %14, %15 : vector<4x4x1xf32>
    %17 = math.rsqrt %16 : vector<4x4x1xf32>
    %18 = vector.broadcast %17 : vector<4x4x1xf32> to vector<4x4x16xf32>
    %19 = arith.mulf %9, %18 : vector<4x4x16xf32>
    %20 = vector.broadcast %2 : vector<1x1x16xf32> to vector<4x4x16xf32>
    %21 = arith.mulf %19, %20 : vector<4x4x16xf32>
    %22 = vector.broadcast %3 : vector<1x1x16xf32> to vector<4x4x16xf32>
    %23 = arith.addf %21, %22 : vector<4x4x16xf32>
    %c0_13 = arith.constant 0 : index
    %c0_14 = arith.constant 0 : index
    %24 = vector.load %arg5[%c0_13, %c0_14] : memref<16x32xf32, #tpu.memory_space<vmem>>, vector<16x32xf32>
    %25 = arith.truncf %24 : vector<16x32xf32> to vector<16x32xbf16>
    %c0_15 = arith.constant 0 : index
    %c0_16 = arith.constant 0 : index
    %26 = vector.load %arg6[%c0_15, %c0_16] : memref<1x32xf32, #tpu.memory_space<vmem>>, vector<1x32xf32>
    %27 = vector.extract_strided_slice %23 {offsets = [0, 0, 0], sizes = [4, 1, 16], strides = [1, 1, 1]} : vector<4x4x16xf32> to vector<4x1x16xf32>
    %28 = vector.shape_cast %27 : vector<4x1x16xf32> to vector<4x16xf32>
    %29 = arith.truncf %28 : vector<4x16xf32> to vector<4x16xbf16>
    %cst_17 = arith.constant dense<0.000000e+00> : vector<4x32xf32>
    %30 = tpu.matmul %29, %25, %cst_17 {dimension_numbers = #tpu.dot_dimension_numbers<[1], [0], [0], [1], [0, 0, 1, 1], [], []>} : vector<4x16xbf16>, vector<16x32xbf16>, vector<4x32xf32> -> vector<4x32xf32>
    %31 = vector.broadcast %26 : vector<1x32xf32> to vector<4x32xf32>
    %32 = arith.addf %30, %31 : vector<4x32xf32>
    %33 = vector.extract_strided_slice %32 {offsets = [0, 0], sizes = [4, 16], strides = [1, 1]} : vector<4x32xf32> to vector<4x16xf32>
    %34 = arith.negf %33 : vector<4x16xf32>
    %35 = math.exp %34 : vector<4x16xf32>
    %cst_18 = arith.constant 1.000000e+00 : f32
    %36 = vector.broadcast %cst_18 : f32 to vector<4x16xf32>
    %37 = arith.addf %36, %35 : vector<4x16xf32>
    %38 = arith.divf %36, %37 : vector<4x16xf32>
    %39 = vector.extract_strided_slice %32 {offsets = [0, 16], sizes = [4, 16], strides = [1, 1]} : vector<4x32xf32> to vector<4x16xf32>
    %40 = vector.extract_strided_slice %23 {offsets = [0, 1, 0], sizes = [4, 1, 16], strides = [1, 1, 1]} : vector<4x4x16xf32> to vector<4x1x16xf32>
    %41 = vector.shape_cast %40 : vector<4x1x16xf32> to vector<4x16xf32>
    %42 = arith.truncf %41 : vector<4x16xf32> to vector<4x16xbf16>
    %cst_19 = arith.constant dense<0.000000e+00> : vector<4x32xf32>
    %43 = tpu.matmul %42, %25, %cst_19 {dimension_numbers = #tpu.dot_dimension_numbers<[1], [0], [0], [1], [0, 0, 1, 1], [], []>} : vector<4x16xbf16>, vector<16x32xbf16>, vector<4x32xf32> -> vector<4x32xf32>
    %44 = vector.broadcast %26 : vector<1x32xf32> to vector<4x32xf32>
    %45 = arith.addf %43, %44 : vector<4x32xf32>
    %46 = vector.extract_strided_slice %45 {offsets = [0, 0], sizes = [4, 16], strides = [1, 1]} : vector<4x32xf32> to vector<4x16xf32>
    %47 = arith.negf %46 : vector<4x16xf32>
    %48 = math.exp %47 : vector<4x16xf32>
    %cst_20 = arith.constant 1.000000e+00 : f32
    %49 = vector.broadcast %cst_20 : f32 to vector<4x16xf32>
    %50 = arith.addf %49, %48 : vector<4x16xf32>
    %51 = arith.divf %49, %50 : vector<4x16xf32>
    %52 = vector.extract_strided_slice %45 {offsets = [0, 16], sizes = [4, 16], strides = [1, 1]} : vector<4x32xf32> to vector<4x16xf32>
    %53 = vector.extract_strided_slice %23 {offsets = [0, 2, 0], sizes = [4, 1, 16], strides = [1, 1, 1]} : vector<4x4x16xf32> to vector<4x1x16xf32>
    %54 = vector.shape_cast %53 : vector<4x1x16xf32> to vector<4x16xf32>
    %55 = arith.truncf %54 : vector<4x16xf32> to vector<4x16xbf16>
    %cst_21 = arith.constant dense<0.000000e+00> : vector<4x32xf32>
    %56 = tpu.matmul %55, %25, %cst_21 {dimension_numbers = #tpu.dot_dimension_numbers<[1], [0], [0], [1], [0, 0, 1, 1], [], []>} : vector<4x16xbf16>, vector<16x32xbf16>, vector<4x32xf32> -> vector<4x32xf32>
    %57 = vector.broadcast %26 : vector<1x32xf32> to vector<4x32xf32>
    %58 = arith.addf %56, %57 : vector<4x32xf32>
    %59 = vector.extract_strided_slice %58 {offsets = [0, 0], sizes = [4, 16], strides = [1, 1]} : vector<4x32xf32> to vector<4x16xf32>
    %60 = arith.negf %59 : vector<4x16xf32>
    %61 = math.exp %60 : vector<4x16xf32>
    %cst_22 = arith.constant 1.000000e+00 : f32
    %62 = vector.broadcast %cst_22 : f32 to vector<4x16xf32>
    %63 = arith.addf %62, %61 : vector<4x16xf32>
    %64 = arith.divf %62, %63 : vector<4x16xf32>
    %65 = vector.extract_strided_slice %58 {offsets = [0, 16], sizes = [4, 16], strides = [1, 1]} : vector<4x32xf32> to vector<4x16xf32>
    %66 = vector.extract_strided_slice %23 {offsets = [0, 3, 0], sizes = [4, 1, 16], strides = [1, 1, 1]} : vector<4x4x16xf32> to vector<4x1x16xf32>
    %67 = vector.shape_cast %66 : vector<4x1x16xf32> to vector<4x16xf32>
    %68 = arith.truncf %67 : vector<4x16xf32> to vector<4x16xbf16>
    %cst_23 = arith.constant dense<0.000000e+00> : vector<4x32xf32>
    %69 = tpu.matmul %68, %25, %cst_23 {dimension_numbers = #tpu.dot_dimension_numbers<[1], [0], [0], [1], [0, 0, 1, 1], [], []>} : vector<4x16xbf16>, vector<16x32xbf16>, vector<4x32xf32> -> vector<4x32xf32>
    %70 = vector.broadcast %26 : vector<1x32xf32> to vector<4x32xf32>
    %71 = arith.addf %69, %70 : vector<4x32xf32>
    %72 = vector.extract_strided_slice %71 {offsets = [0, 0], sizes = [4, 16], strides = [1, 1]} : vector<4x32xf32> to vector<4x16xf32>
    %73 = arith.negf %72 : vector<4x16xf32>
    %74 = math.exp %73 : vector<4x16xf32>
    %cst_24 = arith.constant 1.000000e+00 : f32
    %75 = vector.broadcast %cst_24 : f32 to vector<4x16xf32>
    %76 = arith.addf %75, %74 : vector<4x16xf32>
    %77 = arith.divf %75, %76 : vector<4x16xf32>
    %78 = vector.extract_strided_slice %71 {offsets = [0, 16], sizes = [4, 16], strides = [1, 1]} : vector<4x32xf32> to vector<4x16xf32>
    %cst_25 = arith.constant 0.000000e+00 : f32
    %79 = vector.broadcast %cst_25 : f32 to vector<4x16xf32>
    %cst_26 = arith.constant 0.000000e+00 : f32
    %80 = vector.broadcast %cst_26 : f32 to vector<4x16xf32>
    %81 = arith.mulf %38, %79 : vector<4x16xf32>
    %cst_27 = arith.constant 1.000000e+00 : f32
    %82 = vector.broadcast %cst_27 : f32 to vector<4x16xf32>
    %83 = arith.subf %82, %38 : vector<4x16xf32>
    %84 = arith.mulf %83, %39 : vector<4x16xf32>
    %85 = arith.addf %81, %84 : vector<4x16xf32>
    %86 = arith.mulf %77, %80 : vector<4x16xf32>
    %cst_28 = arith.constant 1.000000e+00 : f32
    %87 = vector.broadcast %cst_28 : f32 to vector<4x16xf32>
    %88 = arith.subf %87, %77 : vector<4x16xf32>
    %89 = arith.mulf %88, %78 : vector<4x16xf32>
    %90 = arith.addf %86, %89 : vector<4x16xf32>
    %91 = arith.mulf %51, %85 : vector<4x16xf32>
    %cst_29 = arith.constant 1.000000e+00 : f32
    %92 = vector.broadcast %cst_29 : f32 to vector<4x16xf32>
    %93 = arith.subf %92, %51 : vector<4x16xf32>
    %94 = arith.mulf %93, %52 : vector<4x16xf32>
    %95 = arith.addf %91, %94 : vector<4x16xf32>
    %96 = arith.mulf %64, %90 : vector<4x16xf32>
    %cst_30 = arith.constant 1.000000e+00 : f32
    %97 = vector.broadcast %cst_30 : f32 to vector<4x16xf32>
    %98 = arith.subf %97, %64 : vector<4x16xf32>
    %99 = arith.mulf %98, %65 : vector<4x16xf32>
    %100 = arith.addf %96, %99 : vector<4x16xf32>
    %101 = arith.mulf %64, %95 : vector<4x16xf32>
    %cst_31 = arith.constant 1.000000e+00 : f32
    %102 = vector.broadcast %cst_31 : f32 to vector<4x16xf32>
    %103 = arith.subf %102, %64 : vector<4x16xf32>
    %104 = arith.mulf %103, %65 : vector<4x16xf32>
    %105 = arith.addf %101, %104 : vector<4x16xf32>
    %106 = arith.mulf %51, %100 : vector<4x16xf32>
    %cst_32 = arith.constant 1.000000e+00 : f32
    %107 = vector.broadcast %cst_32 : f32 to vector<4x16xf32>
    %108 = arith.subf %107, %51 : vector<4x16xf32>
    %109 = arith.mulf %108, %52 : vector<4x16xf32>
    %110 = arith.addf %106, %109 : vector<4x16xf32>
    %111 = arith.mulf %77, %105 : vector<4x16xf32>
    %cst_33 = arith.constant 1.000000e+00 : f32
    %112 = vector.broadcast %cst_33 : f32 to vector<4x16xf32>
    %113 = arith.subf %112, %77 : vector<4x16xf32>
    %114 = arith.mulf %113, %78 : vector<4x16xf32>
    %115 = arith.addf %111, %114 : vector<4x16xf32>
    %116 = arith.mulf %38, %110 : vector<4x16xf32>
    %cst_34 = arith.constant 1.000000e+00 : f32
    %117 = vector.broadcast %cst_34 : f32 to vector<4x16xf32>
    %118 = arith.subf %117, %38 : vector<4x16xf32>
    %119 = arith.mulf %118, %39 : vector<4x16xf32>
    %120 = arith.addf %116, %119 : vector<4x16xf32>
    %121 = tpu.concatenate %85, %120 in 1 : vector<4x16xf32>, vector<4x16xf32> -> vector<4x32xf32>
    %122 = tpu.concatenate %95, %110 in 1 : vector<4x16xf32>, vector<4x16xf32> -> vector<4x32xf32>
    %123 = tpu.concatenate %105, %100 in 1 : vector<4x16xf32>, vector<4x16xf32> -> vector<4x32xf32>
    %124 = tpu.concatenate %115, %90 in 1 : vector<4x16xf32>, vector<4x16xf32> -> vector<4x32xf32>
    %125 = tpu.concatenate %121, %122, %123, %124 in 1 : vector<4x32xf32>, vector<4x32xf32>, vector<4x32xf32>, vector<4x32xf32> -> vector<4x128xf32>
    %c0_35 = arith.constant 0 : index
    %c0_36 = arith.constant 0 : index
    %c0_37 = arith.constant 0 : index
    %126 = vector.load %arg7[%c0_35, %c0_36, %c0_37] : memref<1x4x128xf32, #tpu.memory_space<vmem>>, vector<1x4x128xf32>
    %127 = vector.shape_cast %126 : vector<1x4x128xf32> to vector<4x128xf32>
    %128 = vector.shape_cast %125 : vector<4x128xf32> to vector<1x4x128xf32>
    tpu.vector_store %arg7[%c0_35, %c0_36, %c0_37], %128 {strides = array<i32>} : memref<1x4x128xf32, #tpu.memory_space<vmem>>, vector<1x4x128xf32>,
    return
  }
  func.func @transform_0(%arg0: i32, %arg1: i32) -> (i32, i32, i32, i32) {
    %c0_i32 = arith.constant 0 : i32
    %c0_i32_0 = arith.constant 0 : i32
    %c0_i32_1 = arith.constant 0 : i32
    return %arg0, %arg1, %c0_i32, %c0_i32_0 : i32, i32, i32, i32
  }
  func.func @transform_1(%arg0: i32, %arg1: i32) -> (i32, i32, i32) {
    %c0_i32 = arith.constant 0 : i32
    %c0_i32_0 = arith.constant 0 : i32
    %c0_i32_1 = arith.constant 0 : i32
    %c0_i32_2 = arith.constant 0 : i32
    return %c0_i32, %c0_i32_0, %c0_i32_1 : i32, i32, i32
  }
  func.func @transform_2(%arg0: i32, %arg1: i32) -> (i32, i32, i32) {
    %c0_i32 = arith.constant 0 : i32
    %c0_i32_0 = arith.constant 0 : i32
    %c0_i32_1 = arith.constant 0 : i32
    %c0_i32_2 = arith.constant 0 : i32
    return %c0_i32, %c0_i32_0, %c0_i32_1 : i32, i32, i32
  }
  func.func @transform_3(%arg0: i32, %arg1: i32) -> (i32, i32) {
    %c0_i32 = arith.constant 0 : i32
    %c0_i32_0 = arith.constant 0 : i32
    %c0_i32_1 = arith.constant 0 : i32
    return %c0_i32, %c0_i32_0 : i32, i32
  }
  func.func @transform_4(%arg0: i32, %arg1: i32) -> (i32, i32) {
    %c0_i32 = arith.constant 0 : i32
    %c0_i32_0 = arith.constant 0 : i32
    %c0_i32_1 = arith.constant 0 : i32
    return %c0_i32, %c0_i32_0 : i32, i32
  }
  func.func @transform_5(%arg0: i32, %arg1: i32) -> (i32, i32, i32) {
    %c0_i32 = arith.constant 0 : i32
    %c0_i32_0 = arith.constant 0 : i32
    return %arg0, %arg1, %c0_i32 : i32, i32, i32
  }
}

module attributes {stable_mosaic.version = 11 : i64} {
  func.func @_mixer_fc_kernel(%arg0: i32, %arg1: memref<32x32xf32, #tpu.memory_space<vmem>>, %arg2: memref<32x32xf32, #tpu.memory_space<vmem>>, %arg3: memref<32x16xf32, #tpu.memory_space<vmem>>, %arg4: memref<32x16xf32, #tpu.memory_space<vmem>>, %arg5: memref<32x16xf32, #tpu.memory_space<vmem>>, %arg6: memref<1x16xf32, #tpu.memory_space<vmem>>, %arg7: memref<32x16xf32, #tpu.memory_space<vmem>>) attributes {dimension_semantics = [#tpu.dimension_semantics<parallel>], iteration_bounds = array<i64: 1>, scalar_prefetch = 0 : i64, scratch_operands = 0 : i64, tpu.core_type = #tpu.core_type<tc>, window_params = [{transform_indices = @transform_0, window_bounds = array<i64: 32, 32>}, {transform_indices = @transform_1, window_bounds = array<i64: 32, 32>}, {transform_indices = @transform_2, window_bounds = array<i64: 32, 16>}, {pipeline_mode = #tpu.pipeline_mode<synchronous>, transform_indices = @transform_3, window_bounds = array<i64: 32, 16>}, {pipeline_mode = #tpu.pipeline_mode<synchronous>, transform_indices = @transform_4, window_bounds = array<i64: 32, 16>}, {pipeline_mode = #tpu.pipeline_mode<synchronous>, transform_indices = @transform_5, window_bounds = array<i64: 1, 16>}, {transform_indices = @transform_6, window_bounds = array<i64: 32, 16>}]} {
    %c0 = arith.constant 0 : index
    %c0_0 = arith.constant 0 : index
    %0 = vector.load %arg1[%c0, %c0_0] : memref<32x32xf32, #tpu.memory_space<vmem>>, vector<32x32xf32>
    %1 = arith.truncf %0 : vector<32x32xf32> to vector<32x32xbf16>
    %c0_1 = arith.constant 0 : index
    %c0_2 = arith.constant 0 : index
    %2 = vector.load %arg4[%c0_1, %c0_2] : memref<32x16xf32, #tpu.memory_space<vmem>>, vector<32x16xf32>
    %3 = arith.truncf %2 : vector<32x16xf32> to vector<32x16xbf16>
    %cst = arith.constant dense<0.000000e+00> : vector<32x16xf32>
    %4 = tpu.matmul %1, %3, %cst {dimension_numbers = #tpu.dot_dimension_numbers<[1], [0], [0], [1], [0, 0, 1, 1], [], []>} : vector<32x32xbf16>, vector<32x16xbf16>, vector<32x16xf32> -> vector<32x16xf32>
    %c0_3 = arith.constant 0 : index
    %c0_4 = arith.constant 0 : index
    %5 = vector.load %arg2[%c0_3, %c0_4] : memref<32x32xf32, #tpu.memory_space<vmem>>, vector<32x32xf32>
    %6 = arith.truncf %5 : vector<32x32xf32> to vector<32x32xbf16>
    %c0_5 = arith.constant 0 : index
    %c0_6 = arith.constant 0 : index
    %7 = vector.load %arg5[%c0_5, %c0_6] : memref<32x16xf32, #tpu.memory_space<vmem>>, vector<32x16xf32>
    %8 = arith.truncf %7 : vector<32x16xf32> to vector<32x16xbf16>
    %cst_7 = arith.constant dense<0.000000e+00> : vector<32x16xf32>
    %9 = tpu.matmul %6, %8, %cst_7 {dimension_numbers = #tpu.dot_dimension_numbers<[1], [0], [0], [1], [0, 0, 1, 1], [], []>} : vector<32x32xbf16>, vector<32x16xbf16>, vector<32x16xf32> -> vector<32x16xf32>
    %10 = arith.addf %4, %9 : vector<32x16xf32>
    %c0_8 = arith.constant 0 : index
    %c0_9 = arith.constant 0 : index
    %11 = vector.load %arg6[%c0_8, %c0_9] : memref<1x16xf32, #tpu.memory_space<vmem>>, vector<1x16xf32>
    %12 = vector.broadcast %11 : vector<1x16xf32> to vector<32x16xf32>
    %13 = arith.addf %10, %12 : vector<32x16xf32>
    %c0_10 = arith.constant 0 : index
    %c0_11 = arith.constant 0 : index
    %14 = vector.load %arg3[%c0_10, %c0_11] : memref<32x16xf32, #tpu.memory_space<vmem>>, vector<32x16xf32>
    %15 = arith.addf %14, %13 : vector<32x16xf32>
    %c0_12 = arith.constant 0 : index
    %c0_13 = arith.constant 0 : index
    %16 = vector.load %arg7[%c0_12, %c0_13] : memref<32x16xf32, #tpu.memory_space<vmem>>, vector<32x16xf32>
    tpu.vector_store %arg7[%c0_12, %c0_13], %15 {strides = array<i32>} : memref<32x16xf32, #tpu.memory_space<vmem>>, vector<32x16xf32>,
    return
  }
  func.func @transform_0(%arg0: i32) -> (i32, i32) {
    %c0_i32 = arith.constant 0 : i32
    %c0_i32_0 = arith.constant 0 : i32
    return %arg0, %c0_i32 : i32, i32
  }
  func.func @transform_1(%arg0: i32) -> (i32, i32) {
    %c0_i32 = arith.constant 0 : i32
    %c0_i32_0 = arith.constant 0 : i32
    return %arg0, %c0_i32 : i32, i32
  }
  func.func @transform_2(%arg0: i32) -> (i32, i32) {
    %c0_i32 = arith.constant 0 : i32
    %c0_i32_0 = arith.constant 0 : i32
    return %arg0, %c0_i32 : i32, i32
  }
  func.func @transform_3(%arg0: i32) -> (i32, i32) {
    %c0_i32 = arith.constant 0 : i32
    %c0_i32_0 = arith.constant 0 : i32
    %c0_i32_1 = arith.constant 0 : i32
    return %c0_i32, %c0_i32_0 : i32, i32
  }
  func.func @transform_4(%arg0: i32) -> (i32, i32) {
    %c0_i32 = arith.constant 0 : i32
    %c0_i32_0 = arith.constant 0 : i32
    %c0_i32_1 = arith.constant 0 : i32
    return %c0_i32, %c0_i32_0 : i32, i32
  }
  func.func @transform_5(%arg0: i32) -> (i32, i32) {
    %c0_i32 = arith.constant 0 : i32
    %c0_i32_0 = arith.constant 0 : i32
    %c0_i32_1 = arith.constant 0 : i32
    return %c0_i32, %c0_i32_0 : i32, i32
  }
  func.func @transform_6(%arg0: i32) -> (i32, i32) {
    %c0_i32 = arith.constant 0 : i32
    %c0_i32_0 = arith.constant 0 : i32
    return %arg0, %c0_i32 : i32, i32
  }
}

module attributes {stable_mosaic.version = 11 : i64} {
  func.func @_mixer_dir_kernel(%arg0: i32, %arg1: i32, %arg2: memref<1x4x4x16xf32, #tpu.memory_space<vmem>>, %arg3: memref<1x1x16xf32, #tpu.memory_space<vmem>>, %arg4: memref<1x1x16xf32, #tpu.memory_space<vmem>>, %arg5: memref<16x32xf32, #tpu.memory_space<vmem>>, %arg6: memref<1x32xf32, #tpu.memory_space<vmem>>, %arg7: memref<1x4x4x32xf32, #tpu.memory_space<vmem>>) attributes {dimension_semantics = [#tpu.dimension_semantics<parallel>, #tpu.dimension_semantics<parallel>], iteration_bounds = array<i64: 2, 1>, scalar_prefetch = 0 : i64, scratch_operands = 0 : i64, tpu.core_type = #tpu.core_type<tc>, window_params = [{transform_indices = @transform_0, window_bounds = array<i64: 1, 4, 4, 16>}, {pipeline_mode = #tpu.pipeline_mode<synchronous>, transform_indices = @transform_1, window_bounds = array<i64: 1, 1, 16>}, {pipeline_mode = #tpu.pipeline_mode<synchronous>, transform_indices = @transform_2, window_bounds = array<i64: 1, 1, 16>}, {pipeline_mode = #tpu.pipeline_mode<synchronous>, transform_indices = @transform_3, window_bounds = array<i64: 16, 32>}, {pipeline_mode = #tpu.pipeline_mode<synchronous>, transform_indices = @transform_4, window_bounds = array<i64: 1, 32>}, {transform_indices = @transform_5, window_bounds = array<i64: 1, 4, 4, 32>}]} {
    %c0 = arith.constant 0 : index
    %c0_0 = arith.constant 0 : index
    %c0_1 = arith.constant 0 : index
    %c0_2 = arith.constant 0 : index
    %0 = vector.load %arg2[%c0, %c0_0, %c0_1, %c0_2] : memref<1x4x4x16xf32, #tpu.memory_space<vmem>>, vector<1x4x4x16xf32>
    %1 = vector.shape_cast %0 : vector<1x4x4x16xf32> to vector<4x4x16xf32>
    %c0_3 = arith.constant 0 : index
    %c0_4 = arith.constant 0 : index
    %c0_5 = arith.constant 0 : index
    %2 = vector.load %arg3[%c0_3, %c0_4, %c0_5] : memref<1x1x16xf32, #tpu.memory_space<vmem>>, vector<1x1x16xf32>
    %c0_6 = arith.constant 0 : index
    %c0_7 = arith.constant 0 : index
    %c0_8 = arith.constant 0 : index
    %3 = vector.load %arg4[%c0_6, %c0_7, %c0_8] : memref<1x1x16xf32, #tpu.memory_space<vmem>>, vector<1x1x16xf32>
    %cst = arith.constant dense<0.000000e+00> : vector<4x4xf32>
    %4 = vector.multi_reduction <add>, %1, %cst [2] : vector<4x4x16xf32> to vector<4x4xf32>
    %5 = vector.shape_cast %4 : vector<4x4xf32> to vector<4x4x1xf32>
    %cst_9 = arith.constant 1.600000e+01 : f32
    %6 = vector.broadcast %cst_9 : f32 to vector<4x4x1xf32>
    %7 = arith.divf %5, %6 : vector<4x4x1xf32>
    %8 = vector.broadcast %7 : vector<4x4x1xf32> to vector<4x4x16xf32>
    %9 = arith.subf %1, %8 : vector<4x4x16xf32>
    %10 = arith.mulf %9, %9 : vector<4x4x16xf32>
    %cst_10 = arith.constant dense<0.000000e+00> : vector<4x4xf32>
    %11 = vector.multi_reduction <add>, %10, %cst_10 [2] : vector<4x4x16xf32> to vector<4x4xf32>
    %12 = vector.shape_cast %11 : vector<4x4xf32> to vector<4x4x1xf32>
    %cst_11 = arith.constant 1.600000e+01 : f32
    %13 = vector.broadcast %cst_11 : f32 to vector<4x4x1xf32>
    %14 = arith.divf %12, %13 : vector<4x4x1xf32>
    %cst_12 = arith.constant 9.99999997E-7 : f32
    %15 = vector.broadcast %cst_12 : f32 to vector<4x4x1xf32>
    %16 = arith.addf %14, %15 : vector<4x4x1xf32>
    %17 = math.rsqrt %16 : vector<4x4x1xf32>
    %18 = vector.broadcast %17 : vector<4x4x1xf32> to vector<4x4x16xf32>
    %19 = arith.mulf %9, %18 : vector<4x4x16xf32>
    %20 = vector.broadcast %2 : vector<1x1x16xf32> to vector<4x4x16xf32>
    %21 = arith.mulf %19, %20 : vector<4x4x16xf32>
    %22 = vector.broadcast %3 : vector<1x1x16xf32> to vector<4x4x16xf32>
    %23 = arith.addf %21, %22 : vector<4x4x16xf32>
    %c0_13 = arith.constant 0 : index
    %c0_14 = arith.constant 0 : index
    %24 = vector.load %arg5[%c0_13, %c0_14] : memref<16x32xf32, #tpu.memory_space<vmem>>, vector<16x32xf32>
    %25 = arith.truncf %24 : vector<16x32xf32> to vector<16x32xbf16>
    %c0_15 = arith.constant 0 : index
    %c0_16 = arith.constant 0 : index
    %26 = vector.load %arg6[%c0_15, %c0_16] : memref<1x32xf32, #tpu.memory_space<vmem>>, vector<1x32xf32>
    %27 = vector.extract_strided_slice %23 {offsets = [0, 0, 0], sizes = [1, 4, 16], strides = [1, 1, 1]} : vector<4x4x16xf32> to vector<1x4x16xf32>
    %28 = vector.shape_cast %27 : vector<1x4x16xf32> to vector<4x16xf32>
    %29 = arith.truncf %28 : vector<4x16xf32> to vector<4x16xbf16>
    %cst_17 = arith.constant dense<0.000000e+00> : vector<4x32xf32>
    %30 = tpu.matmul %29, %25, %cst_17 {dimension_numbers = #tpu.dot_dimension_numbers<[1], [0], [0], [1], [0, 0, 1, 1], [], []>} : vector<4x16xbf16>, vector<16x32xbf16>, vector<4x32xf32> -> vector<4x32xf32>
    %31 = vector.broadcast %26 : vector<1x32xf32> to vector<4x32xf32>
    %32 = arith.addf %30, %31 : vector<4x32xf32>
    %33 = vector.extract_strided_slice %32 {offsets = [0, 0], sizes = [4, 16], strides = [1, 1]} : vector<4x32xf32> to vector<4x16xf32>
    %34 = arith.negf %33 : vector<4x16xf32>
    %35 = math.exp %34 : vector<4x16xf32>
    %cst_18 = arith.constant 1.000000e+00 : f32
    %36 = vector.broadcast %cst_18 : f32 to vector<4x16xf32>
    %37 = arith.addf %36, %35 : vector<4x16xf32>
    %38 = arith.divf %36, %37 : vector<4x16xf32>
    %39 = vector.extract_strided_slice %32 {offsets = [0, 16], sizes = [4, 16], strides = [1, 1]} : vector<4x32xf32> to vector<4x16xf32>
    %40 = vector.extract_strided_slice %23 {offsets = [1, 0, 0], sizes = [1, 4, 16], strides = [1, 1, 1]} : vector<4x4x16xf32> to vector<1x4x16xf32>
    %41 = vector.shape_cast %40 : vector<1x4x16xf32> to vector<4x16xf32>
    %42 = arith.truncf %41 : vector<4x16xf32> to vector<4x16xbf16>
    %cst_19 = arith.constant dense<0.000000e+00> : vector<4x32xf32>
    %43 = tpu.matmul %42, %25, %cst_19 {dimension_numbers = #tpu.dot_dimension_numbers<[1], [0], [0], [1], [0, 0, 1, 1], [], []>} : vector<4x16xbf16>, vector<16x32xbf16>, vector<4x32xf32> -> vector<4x32xf32>
    %44 = vector.broadcast %26 : vector<1x32xf32> to vector<4x32xf32>
    %45 = arith.addf %43, %44 : vector<4x32xf32>
    %46 = vector.extract_strided_slice %45 {offsets = [0, 0], sizes = [4, 16], strides = [1, 1]} : vector<4x32xf32> to vector<4x16xf32>
    %47 = arith.negf %46 : vector<4x16xf32>
    %48 = math.exp %47 : vector<4x16xf32>
    %cst_20 = arith.constant 1.000000e+00 : f32
    %49 = vector.broadcast %cst_20 : f32 to vector<4x16xf32>
    %50 = arith.addf %49, %48 : vector<4x16xf32>
    %51 = arith.divf %49, %50 : vector<4x16xf32>
    %52 = vector.extract_strided_slice %45 {offsets = [0, 16], sizes = [4, 16], strides = [1, 1]} : vector<4x32xf32> to vector<4x16xf32>
    %53 = vector.extract_strided_slice %23 {offsets = [2, 0, 0], sizes = [1, 4, 16], strides = [1, 1, 1]} : vector<4x4x16xf32> to vector<1x4x16xf32>
    %54 = vector.shape_cast %53 : vector<1x4x16xf32> to vector<4x16xf32>
    %55 = arith.truncf %54 : vector<4x16xf32> to vector<4x16xbf16>
    %cst_21 = arith.constant dense<0.000000e+00> : vector<4x32xf32>
    %56 = tpu.matmul %55, %25, %cst_21 {dimension_numbers = #tpu.dot_dimension_numbers<[1], [0], [0], [1], [0, 0, 1, 1], [], []>} : vector<4x16xbf16>, vector<16x32xbf16>, vector<4x32xf32> -> vector<4x32xf32>
    %57 = vector.broadcast %26 : vector<1x32xf32> to vector<4x32xf32>
    %58 = arith.addf %56, %57 : vector<4x32xf32>
    %59 = vector.extract_strided_slice %58 {offsets = [0, 0], sizes = [4, 16], strides = [1, 1]} : vector<4x32xf32> to vector<4x16xf32>
    %60 = arith.negf %59 : vector<4x16xf32>
    %61 = math.exp %60 : vector<4x16xf32>
    %cst_22 = arith.constant 1.000000e+00 : f32
    %62 = vector.broadcast %cst_22 : f32 to vector<4x16xf32>
    %63 = arith.addf %62, %61 : vector<4x16xf32>
    %64 = arith.divf %62, %63 : vector<4x16xf32>
    %65 = vector.extract_strided_slice %58 {offsets = [0, 16], sizes = [4, 16], strides = [1, 1]} : vector<4x32xf32> to vector<4x16xf32>
    %66 = vector.extract_strided_slice %23 {offsets = [3, 0, 0], sizes = [1, 4, 16], strides = [1, 1, 1]} : vector<4x4x16xf32> to vector<1x4x16xf32>
    %67 = vector.shape_cast %66 : vector<1x4x16xf32> to vector<4x16xf32>
    %68 = arith.truncf %67 : vector<4x16xf32> to vector<4x16xbf16>
    %cst_23 = arith.constant dense<0.000000e+00> : vector<4x32xf32>
    %69 = tpu.matmul %68, %25, %cst_23 {dimension_numbers = #tpu.dot_dimension_numbers<[1], [0], [0], [1], [0, 0, 1, 1], [], []>} : vector<4x16xbf16>, vector<16x32xbf16>, vector<4x32xf32> -> vector<4x32xf32>
    %70 = vector.broadcast %26 : vector<1x32xf32> to vector<4x32xf32>
    %71 = arith.addf %69, %70 : vector<4x32xf32>
    %72 = vector.extract_strided_slice %71 {offsets = [0, 0], sizes = [4, 16], strides = [1, 1]} : vector<4x32xf32> to vector<4x16xf32>
    %73 = arith.negf %72 : vector<4x16xf32>
    %74 = math.exp %73 : vector<4x16xf32>
    %cst_24 = arith.constant 1.000000e+00 : f32
    %75 = vector.broadcast %cst_24 : f32 to vector<4x16xf32>
    %76 = arith.addf %75, %74 : vector<4x16xf32>
    %77 = arith.divf %75, %76 : vector<4x16xf32>
    %78 = vector.extract_strided_slice %71 {offsets = [0, 16], sizes = [4, 16], strides = [1, 1]} : vector<4x32xf32> to vector<4x16xf32>
    %cst_25 = arith.constant 0.000000e+00 : f32
    %79 = vector.broadcast %cst_25 : f32 to vector<4x16xf32>
    %cst_26 = arith.constant 0.000000e+00 : f32
    %80 = vector.broadcast %cst_26 : f32 to vector<4x16xf32>
    %81 = arith.mulf %38, %79 : vector<4x16xf32>
    %cst_27 = arith.constant 1.000000e+00 : f32
    %82 = vector.broadcast %cst_27 : f32 to vector<4x16xf32>
    %83 = arith.subf %82, %38 : vector<4x16xf32>
    %84 = arith.mulf %83, %39 : vector<4x16xf32>
    %85 = arith.addf %81, %84 : vector<4x16xf32>
    %86 = arith.mulf %77, %80 : vector<4x16xf32>
    %cst_28 = arith.constant 1.000000e+00 : f32
    %87 = vector.broadcast %cst_28 : f32 to vector<4x16xf32>
    %88 = arith.subf %87, %77 : vector<4x16xf32>
    %89 = arith.mulf %88, %78 : vector<4x16xf32>
    %90 = arith.addf %86, %89 : vector<4x16xf32>
    %91 = arith.mulf %51, %85 : vector<4x16xf32>
    %cst_29 = arith.constant 1.000000e+00 : f32
    %92 = vector.broadcast %cst_29 : f32 to vector<4x16xf32>
    %93 = arith.subf %92, %51 : vector<4x16xf32>
    %94 = arith.mulf %93, %52 : vector<4x16xf32>
    %95 = arith.addf %91, %94 : vector<4x16xf32>
    %96 = arith.mulf %64, %90 : vector<4x16xf32>
    %cst_30 = arith.constant 1.000000e+00 : f32
    %97 = vector.broadcast %cst_30 : f32 to vector<4x16xf32>
    %98 = arith.subf %97, %64 : vector<4x16xf32>
    %99 = arith.mulf %98, %65 : vector<4x16xf32>
    %100 = arith.addf %96, %99 : vector<4x16xf32>
    %101 = arith.mulf %64, %95 : vector<4x16xf32>
    %cst_31 = arith.constant 1.000000e+00 : f32
    %102 = vector.broadcast %cst_31 : f32 to vector<4x16xf32>
    %103 = arith.subf %102, %64 : vector<4x16xf32>
    %104 = arith.mulf %103, %65 : vector<4x16xf32>
    %105 = arith.addf %101, %104 : vector<4x16xf32>
    %106 = arith.mulf %51, %100 : vector<4x16xf32>
    %cst_32 = arith.constant 1.000000e+00 : f32
    %107 = vector.broadcast %cst_32 : f32 to vector<4x16xf32>
    %108 = arith.subf %107, %51 : vector<4x16xf32>
    %109 = arith.mulf %108, %52 : vector<4x16xf32>
    %110 = arith.addf %106, %109 : vector<4x16xf32>
    %111 = arith.mulf %77, %105 : vector<4x16xf32>
    %cst_33 = arith.constant 1.000000e+00 : f32
    %112 = vector.broadcast %cst_33 : f32 to vector<4x16xf32>
    %113 = arith.subf %112, %77 : vector<4x16xf32>
    %114 = arith.mulf %113, %78 : vector<4x16xf32>
    %115 = arith.addf %111, %114 : vector<4x16xf32>
    %116 = arith.mulf %38, %110 : vector<4x16xf32>
    %cst_34 = arith.constant 1.000000e+00 : f32
    %117 = vector.broadcast %cst_34 : f32 to vector<4x16xf32>
    %118 = arith.subf %117, %38 : vector<4x16xf32>
    %119 = arith.mulf %118, %39 : vector<4x16xf32>
    %120 = arith.addf %116, %119 : vector<4x16xf32>
    %121 = tpu.concatenate %85, %120 in 1 : vector<4x16xf32>, vector<4x16xf32> -> vector<4x32xf32>
    %122 = tpu.concatenate %95, %110 in 1 : vector<4x16xf32>, vector<4x16xf32> -> vector<4x32xf32>
    %123 = tpu.concatenate %105, %100 in 1 : vector<4x16xf32>, vector<4x16xf32> -> vector<4x32xf32>
    %124 = tpu.concatenate %115, %90 in 1 : vector<4x16xf32>, vector<4x16xf32> -> vector<4x32xf32>
    %125 = vector.shape_cast %121 : vector<4x32xf32> to vector<1x4x32xf32>
    %126 = vector.shape_cast %122 : vector<4x32xf32> to vector<1x4x32xf32>
    %127 = vector.shape_cast %123 : vector<4x32xf32> to vector<1x4x32xf32>
    %128 = vector.shape_cast %124 : vector<4x32xf32> to vector<1x4x32xf32>
    %129 = tpu.concatenate %125, %126, %127, %128 in 0 : vector<1x4x32xf32>, vector<1x4x32xf32>, vector<1x4x32xf32>, vector<1x4x32xf32> -> vector<4x4x32xf32>
    %c0_35 = arith.constant 0 : index
    %c0_36 = arith.constant 0 : index
    %c0_37 = arith.constant 0 : index
    %c0_38 = arith.constant 0 : index
    %130 = vector.load %arg7[%c0_35, %c0_36, %c0_37, %c0_38] : memref<1x4x4x32xf32, #tpu.memory_space<vmem>>, vector<1x4x4x32xf32>
    %131 = vector.shape_cast %130 : vector<1x4x4x32xf32> to vector<4x4x32xf32>
    %132 = vector.shape_cast %129 : vector<4x4x32xf32> to vector<1x4x4x32xf32>
    tpu.vector_store %arg7[%c0_35, %c0_36, %c0_37, %c0_38], %132 {strides = array<i32>} : memref<1x4x4x32xf32, #tpu.memory_space<vmem>>, vector<1x4x4x32xf32>,
    return
  }
  func.func @transform_0(%arg0: i32, %arg1: i32) -> (i32, i32, i32, i32) {
    %c0_i32 = arith.constant 0 : i32
    %c0_i32_0 = arith.constant 0 : i32
    %c0_i32_1 = arith.constant 0 : i32
    return %arg0, %c0_i32, %arg1, %c0_i32_0 : i32, i32, i32, i32
  }
  func.func @transform_1(%arg0: i32, %arg1: i32) -> (i32, i32, i32) {
    %c0_i32 = arith.constant 0 : i32
    %c0_i32_0 = arith.constant 0 : i32
    %c0_i32_1 = arith.constant 0 : i32
    %c0_i32_2 = arith.constant 0 : i32
    return %c0_i32, %c0_i32_0, %c0_i32_1 : i32, i32, i32
  }
  func.func @transform_2(%arg0: i32, %arg1: i32) -> (i32, i32, i32) {
    %c0_i32 = arith.constant 0 : i32
    %c0_i32_0 = arith.constant 0 : i32
    %c0_i32_1 = arith.constant 0 : i32
    %c0_i32_2 = arith.constant 0 : i32
    return %c0_i32, %c0_i32_0, %c0_i32_1 : i32, i32, i32
  }
  func.func @transform_3(%arg0: i32, %arg1: i32) -> (i32, i32) {
    %c0_i32 = arith.constant 0 : i32
    %c0_i32_0 = arith.constant 0 : i32
    %c0_i32_1 = arith.constant 0 : i32
    return %c0_i32, %c0_i32_0 : i32, i32
  }
  func.func @transform_4(%arg0: i32, %arg1: i32) -> (i32, i32) {
    %c0_i32 = arith.constant 0 : i32
    %c0_i32_0 = arith.constant 0 : i32
    %c0_i32_1 = arith.constant 0 : i32
    return %c0_i32, %c0_i32_0 : i32, i32
  }
  func.func @transform_5(%arg0: i32, %arg1: i32) -> (i32, i32, i32, i32) {
    %c0_i32 = arith.constant 0 : i32
    %c0_i32_0 = arith.constant 0 : i32
    %c0_i32_1 = arith.constant 0 : i32
    return %arg0, %c0_i32, %arg1, %c0_i32_0 : i32, i32, i32, i32
  }
}

module attributes {stable_mosaic.version = 11 : i64} {
  func.func @_mlp_block_kernel(%arg0: i32, %arg1: memref<32x16xf32, #tpu.memory_space<vmem>>, %arg2: memref<1x16xf32, #tpu.memory_space<vmem>>, %arg3: memref<1x16xf32, #tpu.memory_space<vmem>>, %arg4: memref<16x32xf32, #tpu.memory_space<vmem>>, %arg5: memref<1x32xf32, #tpu.memory_space<vmem>>, %arg6: memref<32x16xf32, #tpu.memory_space<vmem>>, %arg7: memref<1x16xf32, #tpu.memory_space<vmem>>, %arg8: memref<32x16xf32, #tpu.memory_space<vmem>>) attributes {dimension_semantics = [#tpu.dimension_semantics<parallel>], iteration_bounds = array<i64: 1>, scalar_prefetch = 0 : i64, scratch_operands = 0 : i64, tpu.core_type = #tpu.core_type<tc>, window_params = [{transform_indices = @transform_0, window_bounds = array<i64: 32, 16>}, {pipeline_mode = #tpu.pipeline_mode<synchronous>, transform_indices = @transform_1, window_bounds = array<i64: 1, 16>}, {pipeline_mode = #tpu.pipeline_mode<synchronous>, transform_indices = @transform_2, window_bounds = array<i64: 1, 16>}, {pipeline_mode = #tpu.pipeline_mode<synchronous>, transform_indices = @transform_3, window_bounds = array<i64: 16, 32>}, {pipeline_mode = #tpu.pipeline_mode<synchronous>, transform_indices = @transform_4, window_bounds = array<i64: 1, 32>}, {pipeline_mode = #tpu.pipeline_mode<synchronous>, transform_indices = @transform_5, window_bounds = array<i64: 32, 16>}, {pipeline_mode = #tpu.pipeline_mode<synchronous>, transform_indices = @transform_6, window_bounds = array<i64: 1, 16>}, {transform_indices = @transform_7, window_bounds = array<i64: 32, 16>}]} {
    %c0 = arith.constant 0 : index
    %c0_0 = arith.constant 0 : index
    %0 = vector.load %arg1[%c0, %c0_0] : memref<32x16xf32, #tpu.memory_space<vmem>>, vector<32x16xf32>
    %c0_1 = arith.constant 0 : index
    %c0_2 = arith.constant 0 : index
    %1 = vector.load %arg2[%c0_1, %c0_2] : memref<1x16xf32, #tpu.memory_space<vmem>>, vector<1x16xf32>
    %c0_3 = arith.constant 0 : index
    %c0_4 = arith.constant 0 : index
    %2 = vector.load %arg3[%c0_3, %c0_4] : memref<1x16xf32, #tpu.memory_space<vmem>>, vector<1x16xf32>
    %cst = arith.constant dense<0.000000e+00> : vector<32xf32>
    %3 = vector.multi_reduction <add>, %0, %cst [1] : vector<32x16xf32> to vector<32xf32>
    %4 = vector.shape_cast %3 : vector<32xf32> to vector<32x1xf32>
    %cst_5 = arith.constant 1.600000e+01 : f32
    %5 = vector.broadcast %cst_5 : f32 to vector<32x1xf32>
    %6 = arith.divf %4, %5 : vector<32x1xf32>
    %7 = vector.broadcast %6 : vector<32x1xf32> to vector<32x16xf32>
    %8 = arith.subf %0, %7 : vector<32x16xf32>
    %9 = arith.mulf %8, %8 : vector<32x16xf32>
    %cst_6 = arith.constant dense<0.000000e+00> : vector<32xf32>
    %10 = vector.multi_reduction <add>, %9, %cst_6 [1] : vector<32x16xf32> to vector<32xf32>
    %11 = vector.shape_cast %10 : vector<32xf32> to vector<32x1xf32>
    %cst_7 = arith.constant 1.600000e+01 : f32
    %12 = vector.broadcast %cst_7 : f32 to vector<32x1xf32>
    %13 = arith.divf %11, %12 : vector<32x1xf32>
    %cst_8 = arith.constant 9.99999997E-7 : f32
    %14 = vector.broadcast %cst_8 : f32 to vector<32x1xf32>
    %15 = arith.addf %13, %14 : vector<32x1xf32>
    %16 = math.rsqrt %15 : vector<32x1xf32>
    %17 = vector.broadcast %16 : vector<32x1xf32> to vector<32x16xf32>
    %18 = arith.mulf %8, %17 : vector<32x16xf32>
    %19 = vector.broadcast %1 : vector<1x16xf32> to vector<32x16xf32>
    %20 = arith.mulf %18, %19 : vector<32x16xf32>
    %21 = vector.broadcast %2 : vector<1x16xf32> to vector<32x16xf32>
    %22 = arith.addf %20, %21 : vector<32x16xf32>
    %23 = arith.truncf %22 : vector<32x16xf32> to vector<32x16xbf16>
    %c0_9 = arith.constant 0 : index
    %c0_10 = arith.constant 0 : index
    %24 = vector.load %arg4[%c0_9, %c0_10] : memref<16x32xf32, #tpu.memory_space<vmem>>, vector<16x32xf32>
    %25 = arith.truncf %24 : vector<16x32xf32> to vector<16x32xbf16>
    %cst_11 = arith.constant dense<0.000000e+00> : vector<32x32xf32>
    %26 = tpu.matmul %23, %25, %cst_11 {dimension_numbers = #tpu.dot_dimension_numbers<[1], [0], [0], [1], [0, 0, 1, 1], [], []>} : vector<32x16xbf16>, vector<16x32xbf16>, vector<32x32xf32> -> vector<32x32xf32>
    %c0_12 = arith.constant 0 : index
    %c0_13 = arith.constant 0 : index
    %27 = vector.load %arg5[%c0_12, %c0_13] : memref<1x32xf32, #tpu.memory_space<vmem>>, vector<1x32xf32>
    %28 = vector.broadcast %27 : vector<1x32xf32> to vector<32x32xf32>
    %29 = arith.addf %26, %28 : vector<32x32xf32>
    %cst_14 = arith.constant 0.707106769 : f32
    %30 = vector.broadcast %cst_14 : f32 to vector<32x32xf32>
    %31 = arith.mulf %29, %30 : vector<32x32xf32>
    %cst_15 = arith.constant 0.000000e+00 : f32
    %32 = vector.broadcast %cst_15 : f32 to vector<32x32xf32>
    %33 = arith.cmpf olt, %31, %32 : vector<32x32xf32>
    %cst_16 = arith.constant -1.000000e+00 : f32
    %cst_17 = arith.constant 1.000000e+00 : f32
    %34 = vector.broadcast %cst_16 : f32 to vector<32x32xf32>
    %35 = vector.broadcast %cst_17 : f32 to vector<32x32xf32>
    %36 = arith.select %33, %34, %35 : vector<32x32xi1>, vector<32x32xf32>
    %37 = arith.mulf %31, %36 : vector<32x32xf32>
    %cst_18 = arith.constant 0.327591091 : f32
    %38 = vector.broadcast %cst_18 : f32 to vector<32x32xf32>
    %39 = arith.mulf %38, %37 : vector<32x32xf32>
    %cst_19 = arith.constant 1.000000e+00 : f32
    %40 = vector.broadcast %cst_19 : f32 to vector<32x32xf32>
    %41 = arith.addf %40, %39 : vector<32x32xf32>
    %cst_20 = arith.constant 1.000000e+00 : f32
    %42 = vector.broadcast %cst_20 : f32 to vector<32x32xf32>
    %43 = arith.divf %42, %41 : vector<32x32xf32>
    %cst_21 = arith.constant 1.06140542 : f32
    %44 = vector.broadcast %cst_21 : f32 to vector<32x32xf32>
    %45 = arith.mulf %43, %44 : vector<32x32xf32>
    %cst_22 = arith.constant -1.45315206 : f32
    %46 = vector.broadcast %cst_22 : f32 to vector<32x32xf32>
    %47 = arith.addf %46, %45 : vector<32x32xf32>
    %48 = arith.mulf %43, %47 : vector<32x32xf32>
    %cst_23 = arith.constant 1.42141378 : f32
    %49 = vector.broadcast %cst_23 : f32 to vector<32x32xf32>
    %50 = arith.addf %49, %48 : vector<32x32xf32>
    %51 = arith.mulf %43, %50 : vector<32x32xf32>
    %cst_24 = arith.constant -0.284496725 : f32
    %52 = vector.broadcast %cst_24 : f32 to vector<32x32xf32>
    %53 = arith.addf %52, %51 : vector<32x32xf32>
    %54 = arith.mulf %43, %53 : vector<32x32xf32>
    %cst_25 = arith.constant 0.254829586 : f32
    %55 = vector.broadcast %cst_25 : f32 to vector<32x32xf32>
    %56 = arith.addf %55, %54 : vector<32x32xf32>
    %57 = arith.mulf %43, %56 : vector<32x32xf32>
    %cst_26 = arith.constant 0.000000e+00 : f32
    %58 = vector.broadcast %cst_26 : f32 to vector<32x32xf32>
    %59 = arith.subf %58, %37 : vector<32x32xf32>
    %60 = arith.mulf %59, %37 : vector<32x32xf32>
    %61 = math.exp %60 : vector<32x32xf32>
    %62 = arith.mulf %57, %61 : vector<32x32xf32>
    %cst_27 = arith.constant 1.000000e+00 : f32
    %63 = vector.broadcast %cst_27 : f32 to vector<32x32xf32>
    %64 = arith.subf %63, %62 : vector<32x32xf32>
    %65 = arith.mulf %36, %64 : vector<32x32xf32>
    %cst_28 = arith.constant 5.000000e-01 : f32
    %66 = vector.broadcast %cst_28 : f32 to vector<32x32xf32>
    %67 = arith.mulf %66, %29 : vector<32x32xf32>
    %cst_29 = arith.constant 1.000000e+00 : f32
    %68 = vector.broadcast %cst_29 : f32 to vector<32x32xf32>
    %69 = arith.addf %68, %65 : vector<32x32xf32>
    %70 = arith.mulf %67, %69 : vector<32x32xf32>
    %71 = arith.truncf %70 : vector<32x32xf32> to vector<32x32xbf16>
    %c0_30 = arith.constant 0 : index
    %c0_31 = arith.constant 0 : index
    %72 = vector.load %arg6[%c0_30, %c0_31] : memref<32x16xf32, #tpu.memory_space<vmem>>, vector<32x16xf32>
    %73 = arith.truncf %72 : vector<32x16xf32> to vector<32x16xbf16>
    %cst_32 = arith.constant dense<0.000000e+00> : vector<32x16xf32>
    %74 = tpu.matmul %71, %73, %cst_32 {dimension_numbers = #tpu.dot_dimension_numbers<[1], [0], [0], [1], [0, 0, 1, 1], [], []>} : vector<32x32xbf16>, vector<32x16xbf16>, vector<32x16xf32> -> vector<32x16xf32>
    %c0_33 = arith.constant 0 : index
    %c0_34 = arith.constant 0 : index
    %75 = vector.load %arg7[%c0_33, %c0_34] : memref<1x16xf32, #tpu.memory_space<vmem>>, vector<1x16xf32>
    %76 = vector.broadcast %75 : vector<1x16xf32> to vector<32x16xf32>
    %77 = arith.addf %74, %76 : vector<32x16xf32>
    %78 = arith.addf %0, %77 : vector<32x16xf32>
    %c0_35 = arith.constant 0 : index
    %c0_36 = arith.constant 0 : index
    %79 = vector.load %arg8[%c0_35, %c0_36] : memref<32x16xf32, #tpu.memory_space<vmem>>, vector<32x16xf32>
    tpu.vector_store %arg8[%c0_35, %c0_36], %78 {strides = array<i32>} : memref<32x16xf32, #tpu.memory_space<vmem>>, vector<32x16xf32>,
    return
  }
  func.func @transform_0(%arg0: i32) -> (i32, i32) {
    %c0_i32 = arith.constant 0 : i32
    %c0_i32_0 = arith.constant 0 : i32
    return %arg0, %c0_i32 : i32, i32
  }
  func.func @transform_1(%arg0: i32) -> (i32, i32) {
    %c0_i32 = arith.constant 0 : i32
    %c0_i32_0 = arith.constant 0 : i32
    %c0_i32_1 = arith.constant 0 : i32
    return %c0_i32, %c0_i32_0 : i32, i32
  }
  func.func @transform_2(%arg0: i32) -> (i32, i32) {
    %c0_i32 = arith.constant 0 : i32
    %c0_i32_0 = arith.constant 0 : i32
    %c0_i32_1 = arith.constant 0 : i32
    return %c0_i32, %c0_i32_0 : i32, i32
  }
  func.func @transform_3(%arg0: i32) -> (i32, i32) {
    %c0_i32 = arith.constant 0 : i32
    %c0_i32_0 = arith.constant 0 : i32
    %c0_i32_1 = arith.constant 0 : i32
    return %c0_i32, %c0_i32_0 : i32, i32
  }
  func.func @transform_4(%arg0: i32) -> (i32, i32) {
    %c0_i32 = arith.constant 0 : i32
    %c0_i32_0 = arith.constant 0 : i32
    %c0_i32_1 = arith.constant 0 : i32
    return %c0_i32, %c0_i32_0 : i32, i32
  }
  func.func @transform_5(%arg0: i32) -> (i32, i32) {
    %c0_i32 = arith.constant 0 : i32
    %c0_i32_0 = arith.constant 0 : i32
    %c0_i32_1 = arith.constant 0 : i32
    return %c0_i32, %c0_i32_0 : i32, i32
  }
  func.func @transform_6(%arg0: i32) -> (i32, i32) {
    %c0_i32 = arith.constant 0 : i32
    %c0_i32_0 = arith.constant 0 : i32
    %c0_i32_1 = arith.constant 0 : i32
    return %c0_i32, %c0_i32_0 : i32, i32
  }
  func.func @transform_7(%arg0: i32) -> (i32, i32) {
    %c0_i32 = arith.constant 0 : i32
    %c0_i32_0 = arith.constant 0 : i32
    return %arg0, %c0_i32 : i32, i32
  }
}

module attributes {stable_mosaic.version = 11 : i64} {
  func.func @_linear_kernel(%arg0: i32, %arg1: memref<8x64xf32, #tpu.memory_space<vmem>>, %arg2: memref<64x32xf32, #tpu.memory_space<vmem>>, %arg3: memref<1x32xf32, #tpu.memory_space<vmem>>, %arg4: memref<8x32xf32, #tpu.memory_space<vmem>>) attributes {dimension_semantics = [#tpu.dimension_semantics<parallel>], iteration_bounds = array<i64: 1>, scalar_prefetch = 0 : i64, scratch_operands = 0 : i64, tpu.core_type = #tpu.core_type<tc>, window_params = [{transform_indices = @transform_0, window_bounds = array<i64: 8, 64>}, {pipeline_mode = #tpu.pipeline_mode<synchronous>, transform_indices = @transform_1, window_bounds = array<i64: 64, 32>}, {pipeline_mode = #tpu.pipeline_mode<synchronous>, transform_indices = @transform_2, window_bounds = array<i64: 1, 32>}, {transform_indices = @transform_3, window_bounds = array<i64: 8, 32>}]} {
    %c0 = arith.constant 0 : index
    %c0_0 = arith.constant 0 : index
    %0 = vector.load %arg1[%c0, %c0_0] : memref<8x64xf32, #tpu.memory_space<vmem>>, vector<8x64xf32>
    %1 = arith.truncf %0 : vector<8x64xf32> to vector<8x64xbf16>
    %c0_1 = arith.constant 0 : index
    %c0_2 = arith.constant 0 : index
    %2 = vector.load %arg2[%c0_1, %c0_2] : memref<64x32xf32, #tpu.memory_space<vmem>>, vector<64x32xf32>
    %3 = arith.truncf %2 : vector<64x32xf32> to vector<64x32xbf16>
    %cst = arith.constant dense<0.000000e+00> : vector<8x32xf32>
    %4 = tpu.matmul %1, %3, %cst {dimension_numbers = #tpu.dot_dimension_numbers<[1], [0], [0], [1], [0, 0, 1, 1], [], []>} : vector<8x64xbf16>, vector<64x32xbf16>, vector<8x32xf32> -> vector<8x32xf32>
    %c0_3 = arith.constant 0 : index
    %c0_4 = arith.constant 0 : index
    %5 = vector.load %arg3[%c0_3, %c0_4] : memref<1x32xf32, #tpu.memory_space<vmem>>, vector<1x32xf32>
    %6 = vector.broadcast %5 : vector<1x32xf32> to vector<8x32xf32>
    %7 = arith.addf %4, %6 : vector<8x32xf32>
    %c0_5 = arith.constant 0 : index
    %c0_6 = arith.constant 0 : index
    %8 = vector.load %arg4[%c0_5, %c0_6] : memref<8x32xf32, #tpu.memory_space<vmem>>, vector<8x32xf32>
    tpu.vector_store %arg4[%c0_5, %c0_6], %7 {strides = array<i32>} : memref<8x32xf32, #tpu.memory_space<vmem>>, vector<8x32xf32>,
    return
  }
  func.func @transform_0(%arg0: i32) -> (i32, i32) {
    %c0_i32 = arith.constant 0 : i32
    %c0_i32_0 = arith.constant 0 : i32
    return %arg0, %c0_i32 : i32, i32
  }
  func.func @transform_1(%arg0: i32) -> (i32, i32) {
    %c0_i32 = arith.constant 0 : i32
    %c0_i32_0 = arith.constant 0 : i32
    %c0_i32_1 = arith.constant 0 : i32
    return %c0_i32, %c0_i32_0 : i32, i32
  }
  func.func @transform_2(%arg0: i32) -> (i32, i32) {
    %c0_i32 = arith.constant 0 : i32
    %c0_i32_0 = arith.constant 0 : i32
    %c0_i32_1 = arith.constant 0 : i32
    return %c0_i32, %c0_i32_0 : i32, i32
  }
  func.func @transform_3(%arg0: i32) -> (i32, i32) {
    %c0_i32 = arith.constant 0 : i32
    %c0_i32_0 = arith.constant 0 : i32
    return %arg0, %c0_i32 : i32, i32
  }
}

module attributes {stable_mosaic.version = 11 : i64} {
  func.func @_mixer_dir_kernel(%arg0: i32, %arg1: i32, %arg2: memref<1x2x2x32xf32, #tpu.memory_space<vmem>>, %arg3: memref<1x1x32xf32, #tpu.memory_space<vmem>>, %arg4: memref<1x1x32xf32, #tpu.memory_space<vmem>>, %arg5: memref<32x64xf32, #tpu.memory_space<vmem>>, %arg6: memref<1x64xf32, #tpu.memory_space<vmem>>, %arg7: memref<1x2x128xf32, #tpu.memory_space<vmem>>) attributes {dimension_semantics = [#tpu.dimension_semantics<parallel>, #tpu.dimension_semantics<parallel>], iteration_bounds = array<i64: 2, 1>, scalar_prefetch = 0 : i64, scratch_operands = 0 : i64, tpu.core_type = #tpu.core_type<tc>, window_params = [{transform_indices = @transform_0, window_bounds = array<i64: 1, 2, 2, 32>}, {pipeline_mode = #tpu.pipeline_mode<synchronous>, transform_indices = @transform_1, window_bounds = array<i64: 1, 1, 32>}, {pipeline_mode = #tpu.pipeline_mode<synchronous>, transform_indices = @transform_2, window_bounds = array<i64: 1, 1, 32>}, {pipeline_mode = #tpu.pipeline_mode<synchronous>, transform_indices = @transform_3, window_bounds = array<i64: 32, 64>}, {pipeline_mode = #tpu.pipeline_mode<synchronous>, transform_indices = @transform_4, window_bounds = array<i64: 1, 64>}, {transform_indices = @transform_5, window_bounds = array<i64: 1, 2, 128>}]} {
    %c0 = arith.constant 0 : index
    %c0_0 = arith.constant 0 : index
    %c0_1 = arith.constant 0 : index
    %c0_2 = arith.constant 0 : index
    %0 = vector.load %arg2[%c0, %c0_0, %c0_1, %c0_2] : memref<1x2x2x32xf32, #tpu.memory_space<vmem>>, vector<1x2x2x32xf32>
    %1 = vector.shape_cast %0 : vector<1x2x2x32xf32> to vector<2x2x32xf32>
    %c0_3 = arith.constant 0 : index
    %c0_4 = arith.constant 0 : index
    %c0_5 = arith.constant 0 : index
    %2 = vector.load %arg3[%c0_3, %c0_4, %c0_5] : memref<1x1x32xf32, #tpu.memory_space<vmem>>, vector<1x1x32xf32>
    %c0_6 = arith.constant 0 : index
    %c0_7 = arith.constant 0 : index
    %c0_8 = arith.constant 0 : index
    %3 = vector.load %arg4[%c0_6, %c0_7, %c0_8] : memref<1x1x32xf32, #tpu.memory_space<vmem>>, vector<1x1x32xf32>
    %cst = arith.constant dense<0.000000e+00> : vector<2x2xf32>
    %4 = vector.multi_reduction <add>, %1, %cst [2] : vector<2x2x32xf32> to vector<2x2xf32>
    %5 = vector.shape_cast %4 : vector<2x2xf32> to vector<2x2x1xf32>
    %cst_9 = arith.constant 3.200000e+01 : f32
    %6 = vector.broadcast %cst_9 : f32 to vector<2x2x1xf32>
    %7 = arith.divf %5, %6 : vector<2x2x1xf32>
    %8 = vector.broadcast %7 : vector<2x2x1xf32> to vector<2x2x32xf32>
    %9 = arith.subf %1, %8 : vector<2x2x32xf32>
    %10 = arith.mulf %9, %9 : vector<2x2x32xf32>
    %cst_10 = arith.constant dense<0.000000e+00> : vector<2x2xf32>
    %11 = vector.multi_reduction <add>, %10, %cst_10 [2] : vector<2x2x32xf32> to vector<2x2xf32>
    %12 = vector.shape_cast %11 : vector<2x2xf32> to vector<2x2x1xf32>
    %cst_11 = arith.constant 3.200000e+01 : f32
    %13 = vector.broadcast %cst_11 : f32 to vector<2x2x1xf32>
    %14 = arith.divf %12, %13 : vector<2x2x1xf32>
    %cst_12 = arith.constant 9.99999997E-7 : f32
    %15 = vector.broadcast %cst_12 : f32 to vector<2x2x1xf32>
    %16 = arith.addf %14, %15 : vector<2x2x1xf32>
    %17 = math.rsqrt %16 : vector<2x2x1xf32>
    %18 = vector.broadcast %17 : vector<2x2x1xf32> to vector<2x2x32xf32>
    %19 = arith.mulf %9, %18 : vector<2x2x32xf32>
    %20 = vector.broadcast %2 : vector<1x1x32xf32> to vector<2x2x32xf32>
    %21 = arith.mulf %19, %20 : vector<2x2x32xf32>
    %22 = vector.broadcast %3 : vector<1x1x32xf32> to vector<2x2x32xf32>
    %23 = arith.addf %21, %22 : vector<2x2x32xf32>
    %c0_13 = arith.constant 0 : index
    %c0_14 = arith.constant 0 : index
    %24 = vector.load %arg5[%c0_13, %c0_14] : memref<32x64xf32, #tpu.memory_space<vmem>>, vector<32x64xf32>
    %25 = arith.truncf %24 : vector<32x64xf32> to vector<32x64xbf16>
    %c0_15 = arith.constant 0 : index
    %c0_16 = arith.constant 0 : index
    %26 = vector.load %arg6[%c0_15, %c0_16] : memref<1x64xf32, #tpu.memory_space<vmem>>, vector<1x64xf32>
    %27 = vector.extract_strided_slice %23 {offsets = [0, 0, 0], sizes = [2, 1, 32], strides = [1, 1, 1]} : vector<2x2x32xf32> to vector<2x1x32xf32>
    %28 = vector.shape_cast %27 : vector<2x1x32xf32> to vector<2x32xf32>
    %29 = arith.truncf %28 : vector<2x32xf32> to vector<2x32xbf16>
    %cst_17 = arith.constant dense<0.000000e+00> : vector<2x64xf32>
    %30 = tpu.matmul %29, %25, %cst_17 {dimension_numbers = #tpu.dot_dimension_numbers<[1], [0], [0], [1], [0, 0, 1, 1], [], []>} : vector<2x32xbf16>, vector<32x64xbf16>, vector<2x64xf32> -> vector<2x64xf32>
    %31 = vector.broadcast %26 : vector<1x64xf32> to vector<2x64xf32>
    %32 = arith.addf %30, %31 : vector<2x64xf32>
    %33 = vector.extract_strided_slice %32 {offsets = [0, 0], sizes = [2, 32], strides = [1, 1]} : vector<2x64xf32> to vector<2x32xf32>
    %34 = arith.negf %33 : vector<2x32xf32>
    %35 = math.exp %34 : vector<2x32xf32>
    %cst_18 = arith.constant 1.000000e+00 : f32
    %36 = vector.broadcast %cst_18 : f32 to vector<2x32xf32>
    %37 = arith.addf %36, %35 : vector<2x32xf32>
    %38 = arith.divf %36, %37 : vector<2x32xf32>
    %39 = vector.extract_strided_slice %32 {offsets = [0, 32], sizes = [2, 32], strides = [1, 1]} : vector<2x64xf32> to vector<2x32xf32>
    %40 = vector.extract_strided_slice %23 {offsets = [0, 1, 0], sizes = [2, 1, 32], strides = [1, 1, 1]} : vector<2x2x32xf32> to vector<2x1x32xf32>
    %41 = vector.shape_cast %40 : vector<2x1x32xf32> to vector<2x32xf32>
    %42 = arith.truncf %41 : vector<2x32xf32> to vector<2x32xbf16>
    %cst_19 = arith.constant dense<0.000000e+00> : vector<2x64xf32>
    %43 = tpu.matmul %42, %25, %cst_19 {dimension_numbers = #tpu.dot_dimension_numbers<[1], [0], [0], [1], [0, 0, 1, 1], [], []>} : vector<2x32xbf16>, vector<32x64xbf16>, vector<2x64xf32> -> vector<2x64xf32>
    %44 = vector.broadcast %26 : vector<1x64xf32> to vector<2x64xf32>
    %45 = arith.addf %43, %44 : vector<2x64xf32>
    %46 = vector.extract_strided_slice %45 {offsets = [0, 0], sizes = [2, 32], strides = [1, 1]} : vector<2x64xf32> to vector<2x32xf32>
    %47 = arith.negf %46 : vector<2x32xf32>
    %48 = math.exp %47 : vector<2x32xf32>
    %cst_20 = arith.constant 1.000000e+00 : f32
    %49 = vector.broadcast %cst_20 : f32 to vector<2x32xf32>
    %50 = arith.addf %49, %48 : vector<2x32xf32>
    %51 = arith.divf %49, %50 : vector<2x32xf32>
    %52 = vector.extract_strided_slice %45 {offsets = [0, 32], sizes = [2, 32], strides = [1, 1]} : vector<2x64xf32> to vector<2x32xf32>
    %cst_21 = arith.constant 0.000000e+00 : f32
    %53 = vector.broadcast %cst_21 : f32 to vector<2x32xf32>
    %cst_22 = arith.constant 0.000000e+00 : f32
    %54 = vector.broadcast %cst_22 : f32 to vector<2x32xf32>
    %55 = arith.mulf %38, %53 : vector<2x32xf32>
    %cst_23 = arith.constant 1.000000e+00 : f32
    %56 = vector.broadcast %cst_23 : f32 to vector<2x32xf32>
    %57 = arith.subf %56, %38 : vector<2x32xf32>
    %58 = arith.mulf %57, %39 : vector<2x32xf32>
    %59 = arith.addf %55, %58 : vector<2x32xf32>
    %60 = arith.mulf %51, %54 : vector<2x32xf32>
    %cst_24 = arith.constant 1.000000e+00 : f32
    %61 = vector.broadcast %cst_24 : f32 to vector<2x32xf32>
    %62 = arith.subf %61, %51 : vector<2x32xf32>
    %63 = arith.mulf %62, %52 : vector<2x32xf32>
    %64 = arith.addf %60, %63 : vector<2x32xf32>
    %65 = arith.mulf %51, %59 : vector<2x32xf32>
    %cst_25 = arith.constant 1.000000e+00 : f32
    %66 = vector.broadcast %cst_25 : f32 to vector<2x32xf32>
    %67 = arith.subf %66, %51 : vector<2x32xf32>
    %68 = arith.mulf %67, %52 : vector<2x32xf32>
    %69 = arith.addf %65, %68 : vector<2x32xf32>
    %70 = arith.mulf %38, %64 : vector<2x32xf32>
    %cst_26 = arith.constant 1.000000e+00 : f32
    %71 = vector.broadcast %cst_26 : f32 to vector<2x32xf32>
    %72 = arith.subf %71, %38 : vector<2x32xf32>
    %73 = arith.mulf %72, %39 : vector<2x32xf32>
    %74 = arith.addf %70, %73 : vector<2x32xf32>
    %75 = tpu.concatenate %59, %74 in 1 : vector<2x32xf32>, vector<2x32xf32> -> vector<2x64xf32>
    %76 = tpu.concatenate %69, %64 in 1 : vector<2x32xf32>, vector<2x32xf32> -> vector<2x64xf32>
    %77 = tpu.concatenate %75, %76 in 1 : vector<2x64xf32>, vector<2x64xf32> -> vector<2x128xf32>
    %c0_27 = arith.constant 0 : index
    %c0_28 = arith.constant 0 : index
    %c0_29 = arith.constant 0 : index
    %78 = vector.load %arg7[%c0_27, %c0_28, %c0_29] : memref<1x2x128xf32, #tpu.memory_space<vmem>>, vector<1x2x128xf32>
    %79 = vector.shape_cast %78 : vector<1x2x128xf32> to vector<2x128xf32>
    %80 = vector.shape_cast %77 : vector<2x128xf32> to vector<1x2x128xf32>
    tpu.vector_store %arg7[%c0_27, %c0_28, %c0_29], %80 {strides = array<i32>} : memref<1x2x128xf32, #tpu.memory_space<vmem>>, vector<1x2x128xf32>,
    return
  }
  func.func @transform_0(%arg0: i32, %arg1: i32) -> (i32, i32, i32, i32) {
    %c0_i32 = arith.constant 0 : i32
    %c0_i32_0 = arith.constant 0 : i32
    %c0_i32_1 = arith.constant 0 : i32
    return %arg0, %arg1, %c0_i32, %c0_i32_0 : i32, i32, i32, i32
  }
  func.func @transform_1(%arg0: i32, %arg1: i32) -> (i32, i32, i32) {
    %c0_i32 = arith.constant 0 : i32
    %c0_i32_0 = arith.constant 0 : i32
    %c0_i32_1 = arith.constant 0 : i32
    %c0_i32_2 = arith.constant 0 : i32
    return %c0_i32, %c0_i32_0, %c0_i32_1 : i32, i32, i32
  }
  func.func @transform_2(%arg0: i32, %arg1: i32) -> (i32, i32, i32) {
    %c0_i32 = arith.constant 0 : i32
    %c0_i32_0 = arith.constant 0 : i32
    %c0_i32_1 = arith.constant 0 : i32
    %c0_i32_2 = arith.constant 0 : i32
    return %c0_i32, %c0_i32_0, %c0_i32_1 : i32, i32, i32
  }
  func.func @transform_3(%arg0: i32, %arg1: i32) -> (i32, i32) {
    %c0_i32 = arith.constant 0 : i32
    %c0_i32_0 = arith.constant 0 : i32
    %c0_i32_1 = arith.constant 0 : i32
    return %c0_i32, %c0_i32_0 : i32, i32
  }
  func.func @transform_4(%arg0: i32, %arg1: i32) -> (i32, i32) {
    %c0_i32 = arith.constant 0 : i32
    %c0_i32_0 = arith.constant 0 : i32
    %c0_i32_1 = arith.constant 0 : i32
    return %c0_i32, %c0_i32_0 : i32, i32
  }
  func.func @transform_5(%arg0: i32, %arg1: i32) -> (i32, i32, i32) {
    %c0_i32 = arith.constant 0 : i32
    %c0_i32_0 = arith.constant 0 : i32
    return %arg0, %arg1, %c0_i32 : i32, i32, i32
  }
}

module attributes {stable_mosaic.version = 11 : i64} {
  func.func @_mixer_fc_kernel(%arg0: i32, %arg1: memref<8x64xf32, #tpu.memory_space<vmem>>, %arg2: memref<8x64xf32, #tpu.memory_space<vmem>>, %arg3: memref<8x32xf32, #tpu.memory_space<vmem>>, %arg4: memref<64x32xf32, #tpu.memory_space<vmem>>, %arg5: memref<64x32xf32, #tpu.memory_space<vmem>>, %arg6: memref<1x32xf32, #tpu.memory_space<vmem>>, %arg7: memref<8x32xf32, #tpu.memory_space<vmem>>) attributes {dimension_semantics = [#tpu.dimension_semantics<parallel>], iteration_bounds = array<i64: 1>, scalar_prefetch = 0 : i64, scratch_operands = 0 : i64, tpu.core_type = #tpu.core_type<tc>, window_params = [{transform_indices = @transform_0, window_bounds = array<i64: 8, 64>}, {transform_indices = @transform_1, window_bounds = array<i64: 8, 64>}, {transform_indices = @transform_2, window_bounds = array<i64: 8, 32>}, {pipeline_mode = #tpu.pipeline_mode<synchronous>, transform_indices = @transform_3, window_bounds = array<i64: 64, 32>}, {pipeline_mode = #tpu.pipeline_mode<synchronous>, transform_indices = @transform_4, window_bounds = array<i64: 64, 32>}, {pipeline_mode = #tpu.pipeline_mode<synchronous>, transform_indices = @transform_5, window_bounds = array<i64: 1, 32>}, {transform_indices = @transform_6, window_bounds = array<i64: 8, 32>}]} {
    %c0 = arith.constant 0 : index
    %c0_0 = arith.constant 0 : index
    %0 = vector.load %arg1[%c0, %c0_0] : memref<8x64xf32, #tpu.memory_space<vmem>>, vector<8x64xf32>
    %1 = arith.truncf %0 : vector<8x64xf32> to vector<8x64xbf16>
    %c0_1 = arith.constant 0 : index
    %c0_2 = arith.constant 0 : index
    %2 = vector.load %arg4[%c0_1, %c0_2] : memref<64x32xf32, #tpu.memory_space<vmem>>, vector<64x32xf32>
    %3 = arith.truncf %2 : vector<64x32xf32> to vector<64x32xbf16>
    %cst = arith.constant dense<0.000000e+00> : vector<8x32xf32>
    %4 = tpu.matmul %1, %3, %cst {dimension_numbers = #tpu.dot_dimension_numbers<[1], [0], [0], [1], [0, 0, 1, 1], [], []>} : vector<8x64xbf16>, vector<64x32xbf16>, vector<8x32xf32> -> vector<8x32xf32>
    %c0_3 = arith.constant 0 : index
    %c0_4 = arith.constant 0 : index
    %5 = vector.load %arg2[%c0_3, %c0_4] : memref<8x64xf32, #tpu.memory_space<vmem>>, vector<8x64xf32>
    %6 = arith.truncf %5 : vector<8x64xf32> to vector<8x64xbf16>
    %c0_5 = arith.constant 0 : index
    %c0_6 = arith.constant 0 : index
    %7 = vector.load %arg5[%c0_5, %c0_6] : memref<64x32xf32, #tpu.memory_space<vmem>>, vector<64x32xf32>
    %8 = arith.truncf %7 : vector<64x32xf32> to vector<64x32xbf16>
    %cst_7 = arith.constant dense<0.000000e+00> : vector<8x32xf32>
    %9 = tpu.matmul %6, %8, %cst_7 {dimension_numbers = #tpu.dot_dimension_numbers<[1], [0], [0], [1], [0, 0, 1, 1], [], []>} : vector<8x64xbf16>, vector<64x32xbf16>, vector<8x32xf32> -> vector<8x32xf32>
    %10 = arith.addf %4, %9 : vector<8x32xf32>
    %c0_8 = arith.constant 0 : index
    %c0_9 = arith.constant 0 : index
    %11 = vector.load %arg6[%c0_8, %c0_9] : memref<1x32xf32, #tpu.memory_space<vmem>>, vector<1x32xf32>
    %12 = vector.broadcast %11 : vector<1x32xf32> to vector<8x32xf32>
    %13 = arith.addf %10, %12 : vector<8x32xf32>
    %c0_10 = arith.constant 0 : index
    %c0_11 = arith.constant 0 : index
    %14 = vector.load %arg3[%c0_10, %c0_11] : memref<8x32xf32, #tpu.memory_space<vmem>>, vector<8x32xf32>
    %15 = arith.addf %14, %13 : vector<8x32xf32>
    %c0_12 = arith.constant 0 : index
    %c0_13 = arith.constant 0 : index
    %16 = vector.load %arg7[%c0_12, %c0_13] : memref<8x32xf32, #tpu.memory_space<vmem>>, vector<8x32xf32>
    tpu.vector_store %arg7[%c0_12, %c0_13], %15 {strides = array<i32>} : memref<8x32xf32, #tpu.memory_space<vmem>>, vector<8x32xf32>,
    return
  }
  func.func @transform_0(%arg0: i32) -> (i32, i32) {
    %c0_i32 = arith.constant 0 : i32
    %c0_i32_0 = arith.constant 0 : i32
    return %arg0, %c0_i32 : i32, i32
  }
  func.func @transform_1(%arg0: i32) -> (i32, i32) {
    %c0_i32 = arith.constant 0 : i32
    %c0_i32_0 = arith.constant 0 : i32
    return %arg0, %c0_i32 : i32, i32
  }
  func.func @transform_2(%arg0: i32) -> (i32, i32) {
    %c0_i32 = arith.constant 0 : i32
    %c0_i32_0 = arith.constant 0 : i32
    return %arg0, %c0_i32 : i32, i32
  }
  func.func @transform_3(%arg0: i32) -> (i32, i32) {
    %c0_i32 = arith.constant 0 : i32
    %c0_i32_0 = arith.constant 0 : i32
    %c0_i32_1 = arith.constant 0 : i32
    return %c0_i32, %c0_i32_0 : i32, i32
  }
  func.func @transform_4(%arg0: i32) -> (i32, i32) {
    %c0_i32 = arith.constant 0 : i32
    %c0_i32_0 = arith.constant 0 : i32
    %c0_i32_1 = arith.constant 0 : i32
    return %c0_i32, %c0_i32_0 : i32, i32
  }
  func.func @transform_5(%arg0: i32) -> (i32, i32) {
    %c0_i32 = arith.constant 0 : i32
    %c0_i32_0 = arith.constant 0 : i32
    %c0_i32_1 = arith.constant 0 : i32
    return %c0_i32, %c0_i32_0 : i32, i32
  }
  func.func @transform_6(%arg0: i32) -> (i32, i32) {
    %c0_i32 = arith.constant 0 : i32
    %c0_i32_0 = arith.constant 0 : i32
    return %arg0, %c0_i32 : i32, i32
  }
}

module attributes {stable_mosaic.version = 11 : i64} {
  func.func @_mixer_dir_kernel(%arg0: i32, %arg1: i32, %arg2: memref<1x2x2x32xf32, #tpu.memory_space<vmem>>, %arg3: memref<1x1x32xf32, #tpu.memory_space<vmem>>, %arg4: memref<1x1x32xf32, #tpu.memory_space<vmem>>, %arg5: memref<32x64xf32, #tpu.memory_space<vmem>>, %arg6: memref<1x64xf32, #tpu.memory_space<vmem>>, %arg7: memref<1x2x2x64xf32, #tpu.memory_space<vmem>>) attributes {dimension_semantics = [#tpu.dimension_semantics<parallel>, #tpu.dimension_semantics<parallel>], iteration_bounds = array<i64: 2, 1>, scalar_prefetch = 0 : i64, scratch_operands = 0 : i64, tpu.core_type = #tpu.core_type<tc>, window_params = [{transform_indices = @transform_0, window_bounds = array<i64: 1, 2, 2, 32>}, {pipeline_mode = #tpu.pipeline_mode<synchronous>, transform_indices = @transform_1, window_bounds = array<i64: 1, 1, 32>}, {pipeline_mode = #tpu.pipeline_mode<synchronous>, transform_indices = @transform_2, window_bounds = array<i64: 1, 1, 32>}, {pipeline_mode = #tpu.pipeline_mode<synchronous>, transform_indices = @transform_3, window_bounds = array<i64: 32, 64>}, {pipeline_mode = #tpu.pipeline_mode<synchronous>, transform_indices = @transform_4, window_bounds = array<i64: 1, 64>}, {transform_indices = @transform_5, window_bounds = array<i64: 1, 2, 2, 64>}]} {
    %c0 = arith.constant 0 : index
    %c0_0 = arith.constant 0 : index
    %c0_1 = arith.constant 0 : index
    %c0_2 = arith.constant 0 : index
    %0 = vector.load %arg2[%c0, %c0_0, %c0_1, %c0_2] : memref<1x2x2x32xf32, #tpu.memory_space<vmem>>, vector<1x2x2x32xf32>
    %1 = vector.shape_cast %0 : vector<1x2x2x32xf32> to vector<2x2x32xf32>
    %c0_3 = arith.constant 0 : index
    %c0_4 = arith.constant 0 : index
    %c0_5 = arith.constant 0 : index
    %2 = vector.load %arg3[%c0_3, %c0_4, %c0_5] : memref<1x1x32xf32, #tpu.memory_space<vmem>>, vector<1x1x32xf32>
    %c0_6 = arith.constant 0 : index
    %c0_7 = arith.constant 0 : index
    %c0_8 = arith.constant 0 : index
    %3 = vector.load %arg4[%c0_6, %c0_7, %c0_8] : memref<1x1x32xf32, #tpu.memory_space<vmem>>, vector<1x1x32xf32>
    %cst = arith.constant dense<0.000000e+00> : vector<2x2xf32>
    %4 = vector.multi_reduction <add>, %1, %cst [2] : vector<2x2x32xf32> to vector<2x2xf32>
    %5 = vector.shape_cast %4 : vector<2x2xf32> to vector<2x2x1xf32>
    %cst_9 = arith.constant 3.200000e+01 : f32
    %6 = vector.broadcast %cst_9 : f32 to vector<2x2x1xf32>
    %7 = arith.divf %5, %6 : vector<2x2x1xf32>
    %8 = vector.broadcast %7 : vector<2x2x1xf32> to vector<2x2x32xf32>
    %9 = arith.subf %1, %8 : vector<2x2x32xf32>
    %10 = arith.mulf %9, %9 : vector<2x2x32xf32>
    %cst_10 = arith.constant dense<0.000000e+00> : vector<2x2xf32>
    %11 = vector.multi_reduction <add>, %10, %cst_10 [2] : vector<2x2x32xf32> to vector<2x2xf32>
    %12 = vector.shape_cast %11 : vector<2x2xf32> to vector<2x2x1xf32>
    %cst_11 = arith.constant 3.200000e+01 : f32
    %13 = vector.broadcast %cst_11 : f32 to vector<2x2x1xf32>
    %14 = arith.divf %12, %13 : vector<2x2x1xf32>
    %cst_12 = arith.constant 9.99999997E-7 : f32
    %15 = vector.broadcast %cst_12 : f32 to vector<2x2x1xf32>
    %16 = arith.addf %14, %15 : vector<2x2x1xf32>
    %17 = math.rsqrt %16 : vector<2x2x1xf32>
    %18 = vector.broadcast %17 : vector<2x2x1xf32> to vector<2x2x32xf32>
    %19 = arith.mulf %9, %18 : vector<2x2x32xf32>
    %20 = vector.broadcast %2 : vector<1x1x32xf32> to vector<2x2x32xf32>
    %21 = arith.mulf %19, %20 : vector<2x2x32xf32>
    %22 = vector.broadcast %3 : vector<1x1x32xf32> to vector<2x2x32xf32>
    %23 = arith.addf %21, %22 : vector<2x2x32xf32>
    %c0_13 = arith.constant 0 : index
    %c0_14 = arith.constant 0 : index
    %24 = vector.load %arg5[%c0_13, %c0_14] : memref<32x64xf32, #tpu.memory_space<vmem>>, vector<32x64xf32>
    %25 = arith.truncf %24 : vector<32x64xf32> to vector<32x64xbf16>
    %c0_15 = arith.constant 0 : index
    %c0_16 = arith.constant 0 : index
    %26 = vector.load %arg6[%c0_15, %c0_16] : memref<1x64xf32, #tpu.memory_space<vmem>>, vector<1x64xf32>
    %27 = vector.extract_strided_slice %23 {offsets = [0, 0, 0], sizes = [1, 2, 32], strides = [1, 1, 1]} : vector<2x2x32xf32> to vector<1x2x32xf32>
    %28 = vector.shape_cast %27 : vector<1x2x32xf32> to vector<2x32xf32>
    %29 = arith.truncf %28 : vector<2x32xf32> to vector<2x32xbf16>
    %cst_17 = arith.constant dense<0.000000e+00> : vector<2x64xf32>
    %30 = tpu.matmul %29, %25, %cst_17 {dimension_numbers = #tpu.dot_dimension_numbers<[1], [0], [0], [1], [0, 0, 1, 1], [], []>} : vector<2x32xbf16>, vector<32x64xbf16>, vector<2x64xf32> -> vector<2x64xf32>
    %31 = vector.broadcast %26 : vector<1x64xf32> to vector<2x64xf32>
    %32 = arith.addf %30, %31 : vector<2x64xf32>
    %33 = vector.extract_strided_slice %32 {offsets = [0, 0], sizes = [2, 32], strides = [1, 1]} : vector<2x64xf32> to vector<2x32xf32>
    %34 = arith.negf %33 : vector<2x32xf32>
    %35 = math.exp %34 : vector<2x32xf32>
    %cst_18 = arith.constant 1.000000e+00 : f32
    %36 = vector.broadcast %cst_18 : f32 to vector<2x32xf32>
    %37 = arith.addf %36, %35 : vector<2x32xf32>
    %38 = arith.divf %36, %37 : vector<2x32xf32>
    %39 = vector.extract_strided_slice %32 {offsets = [0, 32], sizes = [2, 32], strides = [1, 1]} : vector<2x64xf32> to vector<2x32xf32>
    %40 = vector.extract_strided_slice %23 {offsets = [1, 0, 0], sizes = [1, 2, 32], strides = [1, 1, 1]} : vector<2x2x32xf32> to vector<1x2x32xf32>
    %41 = vector.shape_cast %40 : vector<1x2x32xf32> to vector<2x32xf32>
    %42 = arith.truncf %41 : vector<2x32xf32> to vector<2x32xbf16>
    %cst_19 = arith.constant dense<0.000000e+00> : vector<2x64xf32>
    %43 = tpu.matmul %42, %25, %cst_19 {dimension_numbers = #tpu.dot_dimension_numbers<[1], [0], [0], [1], [0, 0, 1, 1], [], []>} : vector<2x32xbf16>, vector<32x64xbf16>, vector<2x64xf32> -> vector<2x64xf32>
    %44 = vector.broadcast %26 : vector<1x64xf32> to vector<2x64xf32>
    %45 = arith.addf %43, %44 : vector<2x64xf32>
    %46 = vector.extract_strided_slice %45 {offsets = [0, 0], sizes = [2, 32], strides = [1, 1]} : vector<2x64xf32> to vector<2x32xf32>
    %47 = arith.negf %46 : vector<2x32xf32>
    %48 = math.exp %47 : vector<2x32xf32>
    %cst_20 = arith.constant 1.000000e+00 : f32
    %49 = vector.broadcast %cst_20 : f32 to vector<2x32xf32>
    %50 = arith.addf %49, %48 : vector<2x32xf32>
    %51 = arith.divf %49, %50 : vector<2x32xf32>
    %52 = vector.extract_strided_slice %45 {offsets = [0, 32], sizes = [2, 32], strides = [1, 1]} : vector<2x64xf32> to vector<2x32xf32>
    %cst_21 = arith.constant 0.000000e+00 : f32
    %53 = vector.broadcast %cst_21 : f32 to vector<2x32xf32>
    %cst_22 = arith.constant 0.000000e+00 : f32
    %54 = vector.broadcast %cst_22 : f32 to vector<2x32xf32>
    %55 = arith.mulf %38, %53 : vector<2x32xf32>
    %cst_23 = arith.constant 1.000000e+00 : f32
    %56 = vector.broadcast %cst_23 : f32 to vector<2x32xf32>
    %57 = arith.subf %56, %38 : vector<2x32xf32>
    %58 = arith.mulf %57, %39 : vector<2x32xf32>
    %59 = arith.addf %55, %58 : vector<2x32xf32>
    %60 = arith.mulf %51, %54 : vector<2x32xf32>
    %cst_24 = arith.constant 1.000000e+00 : f32
    %61 = vector.broadcast %cst_24 : f32 to vector<2x32xf32>
    %62 = arith.subf %61, %51 : vector<2x32xf32>
    %63 = arith.mulf %62, %52 : vector<2x32xf32>
    %64 = arith.addf %60, %63 : vector<2x32xf32>
    %65 = arith.mulf %51, %59 : vector<2x32xf32>
    %cst_25 = arith.constant 1.000000e+00 : f32
    %66 = vector.broadcast %cst_25 : f32 to vector<2x32xf32>
    %67 = arith.subf %66, %51 : vector<2x32xf32>
    %68 = arith.mulf %67, %52 : vector<2x32xf32>
    %69 = arith.addf %65, %68 : vector<2x32xf32>
    %70 = arith.mulf %38, %64 : vector<2x32xf32>
    %cst_26 = arith.constant 1.000000e+00 : f32
    %71 = vector.broadcast %cst_26 : f32 to vector<2x32xf32>
    %72 = arith.subf %71, %38 : vector<2x32xf32>
    %73 = arith.mulf %72, %39 : vector<2x32xf32>
    %74 = arith.addf %70, %73 : vector<2x32xf32>
    %75 = tpu.concatenate %59, %74 in 1 : vector<2x32xf32>, vector<2x32xf32> -> vector<2x64xf32>
    %76 = tpu.concatenate %69, %64 in 1 : vector<2x32xf32>, vector<2x32xf32> -> vector<2x64xf32>
    %77 = vector.shape_cast %75 : vector<2x64xf32> to vector<1x2x64xf32>
    %78 = vector.shape_cast %76 : vector<2x64xf32> to vector<1x2x64xf32>
    %79 = tpu.concatenate %77, %78 in 0 : vector<1x2x64xf32>, vector<1x2x64xf32> -> vector<2x2x64xf32>
    %c0_27 = arith.constant 0 : index
    %c0_28 = arith.constant 0 : index
    %c0_29 = arith.constant 0 : index
    %c0_30 = arith.constant 0 : index
    %80 = vector.load %arg7[%c0_27, %c0_28, %c0_29, %c0_30] : memref<1x2x2x64xf32, #tpu.memory_space<vmem>>, vector<1x2x2x64xf32>
    %81 = vector.shape_cast %80 : vector<1x2x2x64xf32> to vector<2x2x64xf32>
    %82 = vector.shape_cast %79 : vector<2x2x64xf32> to vector<1x2x2x64xf32>
    tpu.vector_store %arg7[%c0_27, %c0_28, %c0_29, %c0_30], %82 {strides = array<i32>} : memref<1x2x2x64xf32, #tpu.memory_space<vmem>>, vector<1x2x2x64xf32>,
    return
  }
  func.func @transform_0(%arg0: i32, %arg1: i32) -> (i32, i32, i32, i32) {
    %c0_i32 = arith.constant 0 : i32
    %c0_i32_0 = arith.constant 0 : i32
    %c0_i32_1 = arith.constant 0 : i32
    return %arg0, %c0_i32, %arg1, %c0_i32_0 : i32, i32, i32, i32
  }
  func.func @transform_1(%arg0: i32, %arg1: i32) -> (i32, i32, i32) {
    %c0_i32 = arith.constant 0 : i32
    %c0_i32_0 = arith.constant 0 : i32
    %c0_i32_1 = arith.constant 0 : i32
    %c0_i32_2 = arith.constant 0 : i32
    return %c0_i32, %c0_i32_0, %c0_i32_1 : i32, i32, i32
  }
  func.func @transform_2(%arg0: i32, %arg1: i32) -> (i32, i32, i32) {
    %c0_i32 = arith.constant 0 : i32
    %c0_i32_0 = arith.constant 0 : i32
    %c0_i32_1 = arith.constant 0 : i32
    %c0_i32_2 = arith.constant 0 : i32
    return %c0_i32, %c0_i32_0, %c0_i32_1 : i32, i32, i32
  }
  func.func @transform_3(%arg0: i32, %arg1: i32) -> (i32, i32) {
    %c0_i32 = arith.constant 0 : i32
    %c0_i32_0 = arith.constant 0 : i32
    %c0_i32_1 = arith.constant 0 : i32
    return %c0_i32, %c0_i32_0 : i32, i32
  }
  func.func @transform_4(%arg0: i32, %arg1: i32) -> (i32, i32) {
    %c0_i32 = arith.constant 0 : i32
    %c0_i32_0 = arith.constant 0 : i32
    %c0_i32_1 = arith.constant 0 : i32
    return %c0_i32, %c0_i32_0 : i32, i32
  }
  func.func @transform_5(%arg0: i32, %arg1: i32) -> (i32, i32, i32, i32) {
    %c0_i32 = arith.constant 0 : i32
    %c0_i32_0 = arith.constant 0 : i32
    %c0_i32_1 = arith.constant 0 : i32
    return %arg0, %c0_i32, %arg1, %c0_i32_0 : i32, i32, i32, i32
  }
}

module attributes {stable_mosaic.version = 11 : i64} {
  func.func @_mlp_block_kernel(%arg0: i32, %arg1: memref<8x32xf32, #tpu.memory_space<vmem>>, %arg2: memref<1x32xf32, #tpu.memory_space<vmem>>, %arg3: memref<1x32xf32, #tpu.memory_space<vmem>>, %arg4: memref<32x64xf32, #tpu.memory_space<vmem>>, %arg5: memref<1x64xf32, #tpu.memory_space<vmem>>, %arg6: memref<64x32xf32, #tpu.memory_space<vmem>>, %arg7: memref<1x32xf32, #tpu.memory_space<vmem>>, %arg8: memref<8x32xf32, #tpu.memory_space<vmem>>) attributes {dimension_semantics = [#tpu.dimension_semantics<parallel>], iteration_bounds = array<i64: 1>, scalar_prefetch = 0 : i64, scratch_operands = 0 : i64, tpu.core_type = #tpu.core_type<tc>, window_params = [{transform_indices = @transform_0, window_bounds = array<i64: 8, 32>}, {pipeline_mode = #tpu.pipeline_mode<synchronous>, transform_indices = @transform_1, window_bounds = array<i64: 1, 32>}, {pipeline_mode = #tpu.pipeline_mode<synchronous>, transform_indices = @transform_2, window_bounds = array<i64: 1, 32>}, {pipeline_mode = #tpu.pipeline_mode<synchronous>, transform_indices = @transform_3, window_bounds = array<i64: 32, 64>}, {pipeline_mode = #tpu.pipeline_mode<synchronous>, transform_indices = @transform_4, window_bounds = array<i64: 1, 64>}, {pipeline_mode = #tpu.pipeline_mode<synchronous>, transform_indices = @transform_5, window_bounds = array<i64: 64, 32>}, {pipeline_mode = #tpu.pipeline_mode<synchronous>, transform_indices = @transform_6, window_bounds = array<i64: 1, 32>}, {transform_indices = @transform_7, window_bounds = array<i64: 8, 32>}]} {
    %c0 = arith.constant 0 : index
    %c0_0 = arith.constant 0 : index
    %0 = vector.load %arg1[%c0, %c0_0] : memref<8x32xf32, #tpu.memory_space<vmem>>, vector<8x32xf32>
    %c0_1 = arith.constant 0 : index
    %c0_2 = arith.constant 0 : index
    %1 = vector.load %arg2[%c0_1, %c0_2] : memref<1x32xf32, #tpu.memory_space<vmem>>, vector<1x32xf32>
    %c0_3 = arith.constant 0 : index
    %c0_4 = arith.constant 0 : index
    %2 = vector.load %arg3[%c0_3, %c0_4] : memref<1x32xf32, #tpu.memory_space<vmem>>, vector<1x32xf32>
    %cst = arith.constant dense<0.000000e+00> : vector<8xf32>
    %3 = vector.multi_reduction <add>, %0, %cst [1] : vector<8x32xf32> to vector<8xf32>
    %4 = vector.shape_cast %3 : vector<8xf32> to vector<8x1xf32>
    %cst_5 = arith.constant 3.200000e+01 : f32
    %5 = vector.broadcast %cst_5 : f32 to vector<8x1xf32>
    %6 = arith.divf %4, %5 : vector<8x1xf32>
    %7 = vector.broadcast %6 : vector<8x1xf32> to vector<8x32xf32>
    %8 = arith.subf %0, %7 : vector<8x32xf32>
    %9 = arith.mulf %8, %8 : vector<8x32xf32>
    %cst_6 = arith.constant dense<0.000000e+00> : vector<8xf32>
    %10 = vector.multi_reduction <add>, %9, %cst_6 [1] : vector<8x32xf32> to vector<8xf32>
    %11 = vector.shape_cast %10 : vector<8xf32> to vector<8x1xf32>
    %cst_7 = arith.constant 3.200000e+01 : f32
    %12 = vector.broadcast %cst_7 : f32 to vector<8x1xf32>
    %13 = arith.divf %11, %12 : vector<8x1xf32>
    %cst_8 = arith.constant 9.99999997E-7 : f32
    %14 = vector.broadcast %cst_8 : f32 to vector<8x1xf32>
    %15 = arith.addf %13, %14 : vector<8x1xf32>
    %16 = math.rsqrt %15 : vector<8x1xf32>
    %17 = vector.broadcast %16 : vector<8x1xf32> to vector<8x32xf32>
    %18 = arith.mulf %8, %17 : vector<8x32xf32>
    %19 = vector.broadcast %1 : vector<1x32xf32> to vector<8x32xf32>
    %20 = arith.mulf %18, %19 : vector<8x32xf32>
    %21 = vector.broadcast %2 : vector<1x32xf32> to vector<8x32xf32>
    %22 = arith.addf %20, %21 : vector<8x32xf32>
    %23 = arith.truncf %22 : vector<8x32xf32> to vector<8x32xbf16>
    %c0_9 = arith.constant 0 : index
    %c0_10 = arith.constant 0 : index
    %24 = vector.load %arg4[%c0_9, %c0_10] : memref<32x64xf32, #tpu.memory_space<vmem>>, vector<32x64xf32>
    %25 = arith.truncf %24 : vector<32x64xf32> to vector<32x64xbf16>
    %cst_11 = arith.constant dense<0.000000e+00> : vector<8x64xf32>
    %26 = tpu.matmul %23, %25, %cst_11 {dimension_numbers = #tpu.dot_dimension_numbers<[1], [0], [0], [1], [0, 0, 1, 1], [], []>} : vector<8x32xbf16>, vector<32x64xbf16>, vector<8x64xf32> -> vector<8x64xf32>
    %c0_12 = arith.constant 0 : index
    %c0_13 = arith.constant 0 : index
    %27 = vector.load %arg5[%c0_12, %c0_13] : memref<1x64xf32, #tpu.memory_space<vmem>>, vector<1x64xf32>
    %28 = vector.broadcast %27 : vector<1x64xf32> to vector<8x64xf32>
    %29 = arith.addf %26, %28 : vector<8x64xf32>
    %cst_14 = arith.constant 0.707106769 : f32
    %30 = vector.broadcast %cst_14 : f32 to vector<8x64xf32>
    %31 = arith.mulf %29, %30 : vector<8x64xf32>
    %cst_15 = arith.constant 0.000000e+00 : f32
    %32 = vector.broadcast %cst_15 : f32 to vector<8x64xf32>
    %33 = arith.cmpf olt, %31, %32 : vector<8x64xf32>
    %cst_16 = arith.constant -1.000000e+00 : f32
    %cst_17 = arith.constant 1.000000e+00 : f32
    %34 = vector.broadcast %cst_16 : f32 to vector<8x64xf32>
    %35 = vector.broadcast %cst_17 : f32 to vector<8x64xf32>
    %36 = arith.select %33, %34, %35 : vector<8x64xi1>, vector<8x64xf32>
    %37 = arith.mulf %31, %36 : vector<8x64xf32>
    %cst_18 = arith.constant 0.327591091 : f32
    %38 = vector.broadcast %cst_18 : f32 to vector<8x64xf32>
    %39 = arith.mulf %38, %37 : vector<8x64xf32>
    %cst_19 = arith.constant 1.000000e+00 : f32
    %40 = vector.broadcast %cst_19 : f32 to vector<8x64xf32>
    %41 = arith.addf %40, %39 : vector<8x64xf32>
    %cst_20 = arith.constant 1.000000e+00 : f32
    %42 = vector.broadcast %cst_20 : f32 to vector<8x64xf32>
    %43 = arith.divf %42, %41 : vector<8x64xf32>
    %cst_21 = arith.constant 1.06140542 : f32
    %44 = vector.broadcast %cst_21 : f32 to vector<8x64xf32>
    %45 = arith.mulf %43, %44 : vector<8x64xf32>
    %cst_22 = arith.constant -1.45315206 : f32
    %46 = vector.broadcast %cst_22 : f32 to vector<8x64xf32>
    %47 = arith.addf %46, %45 : vector<8x64xf32>
    %48 = arith.mulf %43, %47 : vector<8x64xf32>
    %cst_23 = arith.constant 1.42141378 : f32
    %49 = vector.broadcast %cst_23 : f32 to vector<8x64xf32>
    %50 = arith.addf %49, %48 : vector<8x64xf32>
    %51 = arith.mulf %43, %50 : vector<8x64xf32>
    %cst_24 = arith.constant -0.284496725 : f32
    %52 = vector.broadcast %cst_24 : f32 to vector<8x64xf32>
    %53 = arith.addf %52, %51 : vector<8x64xf32>
    %54 = arith.mulf %43, %53 : vector<8x64xf32>
    %cst_25 = arith.constant 0.254829586 : f32
    %55 = vector.broadcast %cst_25 : f32 to vector<8x64xf32>
    %56 = arith.addf %55, %54 : vector<8x64xf32>
    %57 = arith.mulf %43, %56 : vector<8x64xf32>
    %cst_26 = arith.constant 0.000000e+00 : f32
    %58 = vector.broadcast %cst_26 : f32 to vector<8x64xf32>
    %59 = arith.subf %58, %37 : vector<8x64xf32>
    %60 = arith.mulf %59, %37 : vector<8x64xf32>
    %61 = math.exp %60 : vector<8x64xf32>
    %62 = arith.mulf %57, %61 : vector<8x64xf32>
    %cst_27 = arith.constant 1.000000e+00 : f32
    %63 = vector.broadcast %cst_27 : f32 to vector<8x64xf32>
    %64 = arith.subf %63, %62 : vector<8x64xf32>
    %65 = arith.mulf %36, %64 : vector<8x64xf32>
    %cst_28 = arith.constant 5.000000e-01 : f32
    %66 = vector.broadcast %cst_28 : f32 to vector<8x64xf32>
    %67 = arith.mulf %66, %29 : vector<8x64xf32>
    %cst_29 = arith.constant 1.000000e+00 : f32
    %68 = vector.broadcast %cst_29 : f32 to vector<8x64xf32>
    %69 = arith.addf %68, %65 : vector<8x64xf32>
    %70 = arith.mulf %67, %69 : vector<8x64xf32>
    %71 = arith.truncf %70 : vector<8x64xf32> to vector<8x64xbf16>
    %c0_30 = arith.constant 0 : index
    %c0_31 = arith.constant 0 : index
    %72 = vector.load %arg6[%c0_30, %c0_31] : memref<64x32xf32, #tpu.memory_space<vmem>>, vector<64x32xf32>
    %73 = arith.truncf %72 : vector<64x32xf32> to vector<64x32xbf16>
    %cst_32 = arith.constant dense<0.000000e+00> : vector<8x32xf32>
    %74 = tpu.matmul %71, %73, %cst_32 {dimension_numbers = #tpu.dot_dimension_numbers<[1], [0], [0], [1], [0, 0, 1, 1], [], []>} : vector<8x64xbf16>, vector<64x32xbf16>, vector<8x32xf32> -> vector<8x32xf32>
    %c0_33 = arith.constant 0 : index
    %c0_34 = arith.constant 0 : index
    %75 = vector.load %arg7[%c0_33, %c0_34] : memref<1x32xf32, #tpu.memory_space<vmem>>, vector<1x32xf32>
    %76 = vector.broadcast %75 : vector<1x32xf32> to vector<8x32xf32>
    %77 = arith.addf %74, %76 : vector<8x32xf32>
    %78 = arith.addf %0, %77 : vector<8x32xf32>
    %c0_35 = arith.constant 0 : index
    %c0_36 = arith.constant 0 : index
    %79 = vector.load %arg8[%c0_35, %c0_36] : memref<8x32xf32, #tpu.memory_space<vmem>>, vector<8x32xf32>
    tpu.vector_store %arg8[%c0_35, %c0_36], %78 {strides = array<i32>} : memref<8x32xf32, #tpu.memory_space<vmem>>, vector<8x32xf32>,
    return
  }
  func.func @transform_0(%arg0: i32) -> (i32, i32) {
    %c0_i32 = arith.constant 0 : i32
    %c0_i32_0 = arith.constant 0 : i32
    return %arg0, %c0_i32 : i32, i32
  }
  func.func @transform_1(%arg0: i32) -> (i32, i32) {
    %c0_i32 = arith.constant 0 : i32
    %c0_i32_0 = arith.constant 0 : i32
    %c0_i32_1 = arith.constant 0 : i32
    return %c0_i32, %c0_i32_0 : i32, i32
  }
  func.func @transform_2(%arg0: i32) -> (i32, i32) {
    %c0_i32 = arith.constant 0 : i32
    %c0_i32_0 = arith.constant 0 : i32
    %c0_i32_1 = arith.constant 0 : i32
    return %c0_i32, %c0_i32_0 : i32, i32
  }
  func.func @transform_3(%arg0: i32) -> (i32, i32) {
    %c0_i32 = arith.constant 0 : i32
    %c0_i32_0 = arith.constant 0 : i32
    %c0_i32_1 = arith.constant 0 : i32
    return %c0_i32, %c0_i32_0 : i32, i32
  }
  func.func @transform_4(%arg0: i32) -> (i32, i32) {
    %c0_i32 = arith.constant 0 : i32
    %c0_i32_0 = arith.constant 0 : i32
    %c0_i32_1 = arith.constant 0 : i32
    return %c0_i32, %c0_i32_0 : i32, i32
  }
  func.func @transform_5(%arg0: i32) -> (i32, i32) {
    %c0_i32 = arith.constant 0 : i32
    %c0_i32_0 = arith.constant 0 : i32
    %c0_i32_1 = arith.constant 0 : i32
    return %c0_i32, %c0_i32_0 : i32, i32
  }
  func.func @transform_6(%arg0: i32) -> (i32, i32) {
    %c0_i32 = arith.constant 0 : i32
    %c0_i32_0 = arith.constant 0 : i32
    %c0_i32_1 = arith.constant 0 : i32
    return %c0_i32, %c0_i32_0 : i32, i32
  }
  func.func @transform_7(%arg0: i32) -> (i32, i32) {
    %c0_i32 = arith.constant 0 : i32
    %c0_i32_0 = arith.constant 0 : i32
    return %arg0, %c0_i32 : i32, i32
  }
}

module attributes {stable_mosaic.version = 11 : i64} {
  func.func @_norm_mean_head_kernel(%arg0: i32, %arg1: memref<2x4x32xf32, #tpu.memory_space<vmem>>, %arg2: memref<1x1x32xf32, #tpu.memory_space<vmem>>, %arg3: memref<1x1x32xf32, #tpu.memory_space<vmem>>, %arg4: memref<32x10xf32, #tpu.memory_space<vmem>>, %arg5: memref<1x10xf32, #tpu.memory_space<vmem>>, %arg6: memref<2x10xf32, #tpu.memory_space<vmem>>, %arg7: memref<2x32xf32, #tpu.memory_space<vmem>>) attributes {dimension_semantics = [#tpu.dimension_semantics<arbitrary>], iteration_bounds = array<i64: 1>, scalar_prefetch = 0 : i64, scratch_operands = 1 : i64, tpu.core_type = #tpu.core_type<tc>, window_params = [{transform_indices = @transform_0, window_bounds = array<i64: 2, 4, 32>}, {pipeline_mode = #tpu.pipeline_mode<synchronous>, transform_indices = @transform_1, window_bounds = array<i64: 1, 1, 32>}, {pipeline_mode = #tpu.pipeline_mode<synchronous>, transform_indices = @transform_2, window_bounds = array<i64: 1, 1, 32>}, {pipeline_mode = #tpu.pipeline_mode<synchronous>, transform_indices = @transform_3, window_bounds = array<i64: 32, 10>}, {pipeline_mode = #tpu.pipeline_mode<synchronous>, transform_indices = @transform_4, window_bounds = array<i64: 1, 10>}, {pipeline_mode = #tpu.pipeline_mode<synchronous>, transform_indices = @transform_5, window_bounds = array<i64: 2, 10>}]} {
    %c0_i32 = arith.constant 0 : i32
    %0 = arith.cmpi eq, %arg0, %c0_i32 : i32
    %1 = arith.extui %0 : i1 to i32
    %c0_i32_0 = arith.constant 0 : i32
    %2 = arith.cmpi ne, %1, %c0_i32_0 : i32
    scf.if %2 {
      %cst_22 = arith.constant 0.000000e+00 : f32
      %41 = vector.broadcast %cst_22 : f32 to vector<2x32xf32>
      %c0_23 = arith.constant 0 : index
      %c0_24 = arith.constant 0 : index
      %42 = vector.load %arg7[%c0_23, %c0_24] : memref<2x32xf32, #tpu.memory_space<vmem>>, vector<2x32xf32>
      tpu.vector_store %arg7[%c0_23, %c0_24], %41 {strides = array<i32>} : memref<2x32xf32, #tpu.memory_space<vmem>>, vector<2x32xf32>,
    } else {
    }
    %c0 = arith.constant 0 : index
    %c0_1 = arith.constant 0 : index
    %c0_2 = arith.constant 0 : index
    %3 = vector.load %arg1[%c0, %c0_1, %c0_2] : memref<2x4x32xf32, #tpu.memory_space<vmem>>, vector<2x4x32xf32>
    %c0_3 = arith.constant 0 : index
    %c0_4 = arith.constant 0 : index
    %c0_5 = arith.constant 0 : index
    %4 = vector.load %arg2[%c0_3, %c0_4, %c0_5] : memref<1x1x32xf32, #tpu.memory_space<vmem>>, vector<1x1x32xf32>
    %c0_6 = arith.constant 0 : index
    %c0_7 = arith.constant 0 : index
    %c0_8 = arith.constant 0 : index
    %5 = vector.load %arg3[%c0_6, %c0_7, %c0_8] : memref<1x1x32xf32, #tpu.memory_space<vmem>>, vector<1x1x32xf32>
    %cst = arith.constant dense<0.000000e+00> : vector<2x4xf32>
    %6 = vector.multi_reduction <add>, %3, %cst [2] : vector<2x4x32xf32> to vector<2x4xf32>
    %7 = vector.shape_cast %6 : vector<2x4xf32> to vector<2x4x1xf32>
    %cst_9 = arith.constant 3.200000e+01 : f32
    %8 = vector.broadcast %cst_9 : f32 to vector<2x4x1xf32>
    %9 = arith.divf %7, %8 : vector<2x4x1xf32>
    %10 = vector.broadcast %9 : vector<2x4x1xf32> to vector<2x4x32xf32>
    %11 = arith.subf %3, %10 : vector<2x4x32xf32>
    %12 = arith.mulf %11, %11 : vector<2x4x32xf32>
    %cst_10 = arith.constant dense<0.000000e+00> : vector<2x4xf32>
    %13 = vector.multi_reduction <add>, %12, %cst_10 [2] : vector<2x4x32xf32> to vector<2x4xf32>
    %14 = vector.shape_cast %13 : vector<2x4xf32> to vector<2x4x1xf32>
    %cst_11 = arith.constant 3.200000e+01 : f32
    %15 = vector.broadcast %cst_11 : f32 to vector<2x4x1xf32>
    %16 = arith.divf %14, %15 : vector<2x4x1xf32>
    %cst_12 = arith.constant 9.99999997E-7 : f32
    %17 = vector.broadcast %cst_12 : f32 to vector<2x4x1xf32>
    %18 = arith.addf %16, %17 : vector<2x4x1xf32>
    %19 = math.rsqrt %18 : vector<2x4x1xf32>
    %20 = vector.broadcast %19 : vector<2x4x1xf32> to vector<2x4x32xf32>
    %21 = arith.mulf %11, %20 : vector<2x4x32xf32>
    %22 = vector.broadcast %4 : vector<1x1x32xf32> to vector<2x4x32xf32>
    %23 = arith.mulf %21, %22 : vector<2x4x32xf32>
    %24 = vector.broadcast %5 : vector<1x1x32xf32> to vector<2x4x32xf32>
    %25 = arith.addf %23, %24 : vector<2x4x32xf32>
    %26 = tpu.iota {dimensions = array<i32: 1>} : vector<2x4x32xi32>
    %c4_i32 = arith.constant 4 : i32
    %27 = arith.muli %arg0, %c4_i32 : i32
    %28 = vector.broadcast %27 : i32 to vector<2x4x32xi32>
    %29 = arith.addi %26, %28 : vector<2x4x32xi32>
    %c4_i32_13 = arith.constant 4 : i32
    %30 = vector.broadcast %c4_i32_13 : i32 to vector<2x4x32xi32>
    %31 = arith.cmpi slt, %29, %30 : vector<2x4x32xi32>
    %cst_14 = arith.constant 0.000000e+00 : f32
    %32 = vector.broadcast %cst_14 : f32 to vector<2x4x32xf32>
    %33 = arith.select %31, %25, %32 : vector<2x4x32xi1>, vector<2x4x32xf32>
    %c0_15 = arith.constant 0 : index
    %c0_16 = arith.constant 0 : index
    %34 = vector.load %arg7[%c0_15, %c0_16] : memref<2x32xf32, #tpu.memory_space<vmem>>, vector<2x32xf32>
    %cst_17 = arith.constant dense<0.000000e+00> : vector<2x32xf32>
    %35 = vector.multi_reduction <add>, %33, %cst_17 [1] : vector<2x4x32xf32> to vector<2x32xf32>
    %36 = arith.addf %34, %35 : vector<2x32xf32>
    %c0_18 = arith.constant 0 : index
    %c0_19 = arith.constant 0 : index
    %37 = vector.load %arg7[%c0_18, %c0_19] : memref<2x32xf32, #tpu.memory_space<vmem>>, vector<2x32xf32>
    tpu.vector_store %arg7[%c0_18, %c0_19], %36 {strides = array<i32>} : memref<2x32xf32, #tpu.memory_space<vmem>>, vector<2x32xf32>,
    %c0_i32_20 = arith.constant 0 : i32
    %38 = arith.cmpi eq, %arg0, %c0_i32_20 : i32
    %39 = arith.extui %38 : i1 to i32
    %c0_i32_21 = arith.constant 0 : i32
    %40 = arith.cmpi ne, %39, %c0_i32_21 : i32
    scf.if %40 {
      %c0_22 = arith.constant 0 : index
      %c0_23 = arith.constant 0 : index
      %41 = vector.load %arg7[%c0_22, %c0_23] : memref<2x32xf32, #tpu.memory_space<vmem>>, vector<2x32xf32>
      %cst_24 = arith.constant 2.500000e-01 : f32
      %42 = vector.broadcast %cst_24 : f32 to vector<2x32xf32>
      %43 = arith.mulf %41, %42 : vector<2x32xf32>
      %44 = arith.truncf %43 : vector<2x32xf32> to vector<2x32xbf16>
      %c0_25 = arith.constant 0 : index
      %c0_26 = arith.constant 0 : index
      %45 = vector.load %arg4[%c0_25, %c0_26] : memref<32x10xf32, #tpu.memory_space<vmem>>, vector<32x10xf32>
      %46 = arith.truncf %45 : vector<32x10xf32> to vector<32x10xbf16>
      %cst_27 = arith.constant dense<0.000000e+00> : vector<2x10xf32>
      %47 = tpu.matmul %44, %46, %cst_27 {dimension_numbers = #tpu.dot_dimension_numbers<[1], [0], [0], [1], [0, 0, 1, 1], [], []>} : vector<2x32xbf16>, vector<32x10xbf16>, vector<2x10xf32> -> vector<2x10xf32>
      %c0_28 = arith.constant 0 : index
      %c0_29 = arith.constant 0 : index
      %48 = vector.load %arg5[%c0_28, %c0_29] : memref<1x10xf32, #tpu.memory_space<vmem>>, vector<1x10xf32>
      %49 = vector.broadcast %48 : vector<1x10xf32> to vector<2x10xf32>
      %50 = arith.addf %47, %49 : vector<2x10xf32>
      %c0_30 = arith.constant 0 : index
      %c0_31 = arith.constant 0 : index
      %51 = vector.load %arg6[%c0_30, %c0_31] : memref<2x10xf32, #tpu.memory_space<vmem>>, vector<2x10xf32>
      tpu.vector_store %arg6[%c0_30, %c0_31], %50 {strides = array<i32>} : memref<2x10xf32, #tpu.memory_space<vmem>>, vector<2x10xf32>,
    } else {
    }
    return
  }
  func.func @transform_0(%arg0: i32) -> (i32, i32, i32) {
    %c0_i32 = arith.constant 0 : i32
    %c0_i32_0 = arith.constant 0 : i32
    %c0_i32_1 = arith.constant 0 : i32
    return %c0_i32, %arg0, %c0_i32_0 : i32, i32, i32
  }
  func.func @transform_1(%arg0: i32) -> (i32, i32, i32) {
    %c0_i32 = arith.constant 0 : i32
    %c0_i32_0 = arith.constant 0 : i32
    %c0_i32_1 = arith.constant 0 : i32
    %c0_i32_2 = arith.constant 0 : i32
    return %c0_i32, %c0_i32_0, %c0_i32_1 : i32, i32, i32
  }
  func.func @transform_2(%arg0: i32) -> (i32, i32, i32) {
    %c0_i32 = arith.constant 0 : i32
    %c0_i32_0 = arith.constant 0 : i32
    %c0_i32_1 = arith.constant 0 : i32
    %c0_i32_2 = arith.constant 0 : i32
    return %c0_i32, %c0_i32_0, %c0_i32_1 : i32, i32, i32
  }
  func.func @transform_3(%arg0: i32) -> (i32, i32) {
    %c0_i32 = arith.constant 0 : i32
    %c0_i32_0 = arith.constant 0 : i32
    %c0_i32_1 = arith.constant 0 : i32
    return %c0_i32, %c0_i32_0 : i32, i32
  }
  func.func @transform_4(%arg0: i32) -> (i32, i32) {
    %c0_i32 = arith.constant 0 : i32
    %c0_i32_0 = arith.constant 0 : i32
    %c0_i32_1 = arith.constant 0 : i32
    return %c0_i32, %c0_i32_0 : i32, i32
  }
  func.func @transform_5(%arg0: i32) -> (i32, i32) {
    %c0_i32 = arith.constant 0 : i32
    %c0_i32_0 = arith.constant 0 : i32
    %c0_i32_1 = arith.constant 0 : i32
    return %c0_i32, %c0_i32_0 : i32, i32
  }
}

</mosaic_0001>

<bundles_post_ra>
// kernel: forward.14
= control target key start
LH: loop header
LB: loop body
LE: loop exit
PB: predicated region body
PF: predicated region fallthrough
CT: control target
= control target key end

     0   :  { %vm48_vm0 = vcmask 261120   ;;  %vm178_vm1 = vcmask 130048   ;;  %s334_s4 = inlined_call_operand.vmem [shape: f32[32,16], index: 4, kind: input, shape index: {}]   ;;  %s335_s3 = inlined_call_operand.vmem [shape: f32[32,16], index: 3, kind: input, shape index: {}]   ;;  %s336_s1 = inlined_call_operand.vmem [shape: f32[32,32], index: 1, kind: input, shape index: {}]   ;;  %s337_s0 = inlined_call_operand.vmem [shape: f32[32,32], index: 0, kind: input, shape index: {}]   ;;  %s338_s5 = inlined_call_operand.vmem [shape: f32[1,16], index: 5, kind: input, shape index: {}]   ;;  %s339_s2 = inlined_call_operand.vmem [shape: f32[32,16], index: 2, kind: input, shape index: {}]   ;;  %s340_s6 = inlined_call_operand.vmem [shape: f32[32,16], index: 6, kind: output, shape index: {}]  }
   0x1   :  { %v44_v0 = vld [vmem:[%s334_s4 + $0x10] sm:$0xff]  ;;  %v45_v1 = vld [vmem:[%s334_s4 + $0x18] sm:$0xff]  ;;  %v42_v5 = vld [vmem:[%s334_s4] sm:$0xff] }
   0x2   :  { %v32_v2 = vld [vmem:[%s335_s3 + $0x10] sm:$0xff]  ;;  %v47_v3 = vpack.c.bf16 %v45_v1, %v44_v0  ;;  %v33_v4 = vld [vmem:[%s335_s3 + $0x18] sm:$0xff]  ;;  %v43_v6 = vld [vmem:[%s334_s4 + $0x8] sm:$0xff] }
   0x3   :  { %v35_v7 = vpack.c.bf16 %v33_v4, %v32_v2  ;;  %v46_v8 = vpack.c.bf16 %v43_v6, %v42_v5  ;;  %v30_v9 = vld [vmem:[%s335_s3] sm:$0xff]  ;;  %v31_v10 = vld [vmem:[%s335_s3 + $0x8] sm:$0xff]  ;;  %v38_v18 = vld [vmem:[%s336_s1 + $0x10] sm:$0xff] }
   0x4   :  { %v36_v11 = vld [vmem:[%s336_s1] sm:$0xff]  ;;  %200 = vmatprep.subr.bf16.mxu0 %v47_v3  ;;  %v34_v12 = vpack.c.bf16 %v31_v10, %v30_v9  ;;  %v37_v13 = vld [vmem:[%s336_s1 + $0x8] sm:$0xff]  ;;  %v39_v19 = vld [vmem:[%s336_s1 + $0x18] sm:$0xff] }
   0x5   :  { %v24_v14 = vld [vmem:[%s337_s0] sm:$0xff]  ;;  %v25_v15 = vld [vmem:[%s337_s0 + $0x8] sm:$0xff]  ;;  %208 = vmatprep.subr.bf16.mxu1 %v35_v7  ;;  %201 = vmatpush3.bf16.msra.mxu0 %v47_v3  ;;  %v40_v16 = vpack.c.bf16 %v37_v13, %v36_v11  ;;  %v26_v20 = vld [vmem:[%s337_s0 + $0x10] sm:$0xff]  ;;  %v41_v22 = vpack.c.bf16 %v39_v19, %v38_v18 }
   0x6   :  { %v28_v17 = vpack.c.bf16 %v25_v15, %v24_v14  ;;  %209 = vmatpush3.bf16.msra.mxu1 %v35_v7  ;;  %202 = vmatprep.subr.bf16.mxu0 %v46_v8  ;;  %v27_v21 = vld [vmem:[%s337_s0 + $0x18] sm:$0xff]  ;;  %v191_v26 = vld [vmem:[%s338_s5] ss:$0 sm:$0xff]  ;;  %v172_v29 = vld [vmem:[%s339_s2 + $0x10] sm:$0xff] }
   0x7   :  { %210 = vmatprep.subr.bf16.mxu1 %v34_v12  ;;  %204 = vmatprep.mubr.msk.bf16.mxu0 %vm48_vm0, %v40_v16  ;;  %v29_v23 = vpack.c.bf16 %v27_v21, %v26_v20  ;;  %v170_v34 = vld [vmem:[%s339_s2] sm:$0xff]  ;;  %v173_v40 = vld [vmem:[%s339_s2 + $0x18] sm:$0xff]  ;;  %v171_v45 = vld [vmem:[%s339_s2 + $0x8] sm:$0xff] }
   0x8   :  { %212 = vmatprep.mubr.msk.bf16.mxu1 %vm48_vm0, %v28_v17 }
   0x9   :  { %203 = vmatpush3.bf16.msra.mxu0 %v46_v8 }
   0xa   :  { %211 = vmatpush3.bf16.msra.mxu1 %v34_v12 }
   0xc   :  { %205 = vmatmul.mubr.msk.bf16.vlgmr.msra.gmra.mxu0 %vm48_vm0, %v41_v22 }
   0xd   :  { %213 = vmatmul.mubr.msk.bf16.vlgmr.msra.gmra.mxu1 %vm48_vm0, %v29_v23 }
  0xcc   :  { %v206_v24 = vpop.f32.mrf.mxu0 }
  0xcd   :  { %v214_v25 = vpop.f32.mrf.mxu1 }
  0xce   :  { %v153_v27 = vadd.f32 %v214_v25, %v206_v24  ;;  %v89_v28 = vpop.f32.mrf.mxu0 }
  0xcf   :  { %v144_v30 = vpop.f32.mrf.mxu1 }
  0xd0   :  { %v168_v31 = vadd.f32 %v191_v26, %v153_v27  ;;  %v145_v32 = vadd.f32 %v144_v30, %v89_v28  ;;  %v207_v33 = vpop.f32.mrf.mxu0 }
  0xd1   :  { %v215_v35 = vpop.f32.mrf.mxu1 }
  0xd2   :  { %v176_v36 = vadd.f32 %v172_v29, %v168_v31  ;;  %v166_v37 = vadd.f32 %v191_v26, %v145_v32  ;;  %v156_v38 = vadd.f32 %v215_v35, %v207_v33  ;;  %v92_v39 = vpop.f32.mrf.mxu0 }
  0xd3   :  { %v147_v41 = vpop.f32.mrf.mxu1 }
  0xd4   :  { %181 = vst.msk [vmem:[%s340_s6 + $0x10] sm:$0xff] %vm178_vm1, %v176_v36  ;;  %v174_v42 = vadd.f32 %v170_v34, %v166_v37  ;;  %v169_v43 = vadd.f32 %v191_v26, %v156_v38  ;;  %v148_v44 = vadd.f32 %v147_v41, %v92_v39 }
  0xd6   :  { %179 = vst.msk [vmem:[%s340_s6] sm:$0xff] %vm178_vm1, %v174_v42  ;;  %v177_v46 = vadd.f32 %v173_v40, %v169_v43  ;;  %v167_v47 = vadd.f32 %v191_v26, %v148_v44 }
  0xd8   :  { %182 = vst.msk [vmem:[%s340_s6 + $0x18] sm:$0xff] %vm178_vm1, %v177_v46  ;;  %v175_v48 = vadd.f32 %v171_v45, %v167_v47 }
  0xda   :  { %180 = vst.msk [vmem:[%s340_s6 + $0x8] sm:$0xff] %vm178_vm1, %v175_v48 }

// kernel: forward.11
= control target key start
LH: loop header
LB: loop body
LE: loop exit
PB: predicated region body
PF: predicated region fallthrough
CT: control target
= control target key end

     0   :  { %vm37_vm0 = vcmask 392192   ;;  %vm93_vm1 = vcmask 130048   ;;  %s185_s1 = inlined_call_operand.vmem [shape: f32[48,16], index: 1, kind: input, shape index: {}]   ;;  %s186_s0 = inlined_call_operand.vmem [shape: f32[32,48], index: 0, kind: input, shape index: {}]   ;;  %s187_s2 = inlined_call_operand.vmem [shape: f32[1,16], index: 2, kind: input, shape index: {}]   ;;  %s188_s3 = inlined_call_operand.vmem [shape: f32[32,16], index: 3, kind: output, shape index: {}]  }
   0x1   :  { %v25_v0 = vld [vmem:[%s185_s1 + $0x20] sm:$0xff]  ;;  %v26_v1 = vld [vmem:[%s185_s1 + $0x28] sm:$0xff]  ;;  %v23_v2 = vld [vmem:[%s185_s1 + $0x10] sm:$0xff] }
   0x2   :  { %v29_v3 = vpack.c.bf16 %v26_v1, %v25_v0  ;;  %v24_v4 = vld [vmem:[%s185_s1 + $0x18] sm:$0xff]  ;;  %v21_v5 = vld [vmem:[%s185_s1] sm:$0xff]  ;;  %v22_v7 = vld [vmem:[%s185_s1 + $0x8] sm:$0xff] }
   0x3   :  { %v28_v6 = vpack.c.bf16 %v24_v4, %v23_v2  ;;  %v15_v8 = vld [vmem:[%s186_s0] sm:$0xff]  ;;  %v16_v9 = vld [vmem:[%s186_s0 + $0x8] sm:$0xff]  ;;  %v27_v11 = vpack.c.bf16 %v22_v7, %v21_v5  ;;  %v17_v12 = vld [vmem:[%s186_s0 + $0x10] sm:$0xff] }
   0x4   :  { %110 = vmatprep.subr.bf16.mxu0 %v29_v3  ;;  %v19_v10 = vpack.c.bf16 %v16_v9, %v15_v8  ;;  %v18_v13 = vld [vmem:[%s186_s0 + $0x18] sm:$0xff]  ;;  %v102_v15 = vld [vmem:[%s187_s2] ss:$0 sm:$0xff] }
   0x5   :  { %111 = vmatpush3.bf16.msra.mxu0 %v29_v3  ;;  %v20_v14 = vpack.c.bf16 %v18_v13, %v17_v12 }
   0x6   :  { %112 = vmatprep.subr.bf16.mxu0 %v28_v6  ;;  %116 = vmatprep.mubr.msk.bf16.mxu0 %vm37_vm0, %v19_v10 }
   0x9   :  { %113 = vmatpush3.bf16.msra.mxu0 %v28_v6 }
   0xa   :  { %114 = vmatprep.subr.bf16.mxu0 %v27_v11 }
   0xd   :  { %115 = vmatpush3.bf16.msra.mxu0 %v27_v11 }
  0x10   :  { %117 = vmatmul.mubr.msk.bf16.vlgmr.msra.gmra.mxu0 %vm37_vm0, %v20_v14 }
  0xd0   :  { %v118_v16 = vpop.f32.mrf.mxu0 }
  0xd1   :  { %v87_v17 = vadd.f32 %v118_v16, %v102_v15 }
  0xd2   :  { %v78_v18 = vpop.f32.mrf.mxu0 }
  0xd3   :  { %96 = vst.msk [vmem:[%s188_s3 + $0x10] sm:$0xff] %vm93_vm1, %v87_v17  ;;  %v79_v19 = vadd.f32 %v102_v15, %v78_v18 }
  0xd4   :  { %v119_v20 = vpop.f32.mrf.mxu0 }
  0xd5   :  { %94 = vst.msk [vmem:[%s188_s3] sm:$0xff] %vm93_vm1, %v79_v19  ;;  %v90_v21 = vadd.f32 %v119_v20, %v102_v15 }
  0xd6   :  { %v81_v22 = vpop.f32.mrf.mxu0 }
  0xd7   :  { %97 = vst.msk [vmem:[%s188_s3 + $0x18] sm:$0xff] %vm93_vm1, %v90_v21  ;;  %v82_v23 = vadd.f32 %v102_v15, %v81_v22 }
  0xd9   :  { %95 = vst.msk [vmem:[%s188_s3 + $0x8] sm:$0xff] %vm93_vm1, %v82_v23 }

// kernel: forward.13
= control target key start
LH: loop header
LB: loop body
LE: loop exit
PB: predicated region body
PF: predicated region fallthrough
CT: control target
= control target key end

     0   :  { %s916_s18 = smov 0   ;;  %s918_s19 = smov 0   ;;  %s1014_s0 = inlined_call_operand.vmem [shape: f32[2,4,4,16], index: 0, kind: input, shape index: {}]   ;;  %s1015_s1 = inlined_call_operand.vmem [shape: f32[1,1,16], index: 1, kind: input, shape index: {}]   ;;  %s1016_s2 = inlined_call_operand.vmem [shape: f32[1,1,16], index: 2, kind: input, shape index: {}]   ;;  %s1017_s3 = inlined_call_operand.vmem [shape: f32[16,32], index: 3, kind: input, shape index: {}]   ;;  %s1018_s4 = inlined_call_operand.vmem [shape: f32[1,32], index: 4, kind: input, shape index: {}]   ;;  %s1019_s5 = inlined_call_operand.vmem [shape: f32[2,4,128], index: 5, kind: output, shape index: {}]  }
   0x1   :  { %s920_s20 = smov 0  }
   0x2 LB: > { %s27_s21 = sadd.s32 1, %s873_s19  ;;  %p750_p0 = scmp.ge.s32.totalorder %s877_s20, 1  ;;  %s877_s20 = sphi %s920_s20, %s15_s20   ;;  %s873_s19 = sphi %s918_s19, %s1021_s19   ;;  %s869_s18 = sphi %s916_s18, %s1020_s18  }
   0x3   : > { %p29_p1 = scmp.ge.s32.totalorder %s27_s21, 2  ;;  %p208_p2 = scmp.lt.s32.totalorder %s877_s20, 3 }
   0x5   : > { %s1023_s21 = smov (%p29_p1, %s27_s21), 0  ;;  %p209_p3 = pnand %p750_p0, %p208_p2 }
   0x6   : > { %p243_p4 = scmp.lt.s32.totalorder (!%p209_p3), %s869_s18, 1  ;;  %s881_s11 = smov (!%p209_p3), 112  }
   0x7   : > { %212 = sbr.rel (%p209_p3) target bundleno = 908 (0x38c), region = 40  ;;  %s882_s12 = smov (!%p209_p3), 16  }
   0x8   : > { %s883_s13 = smov (!%p209_p3), 64   ;;  %s884_s14 = smov (!%p209_p3), 32  }
   0x9   : > { %s885_s15 = smov (!%p209_p3), 96  }
   0xc   : > { %s1025_s18 = smov (!%p243_p4, %s869_s18), 1  ;;  %vm266_vm0 = vcmask 125952   ;;  %v340_v28 = vld [vmem:[%s1017_s3] sm:$0xff]  ;;  %v341_v29 = vld [vmem:[%s1017_s3 + $0x8] sm:$0xff]  ;;  %v879_v30 = vmov 0.0   ;;  %vm880_vm1 = vmmov 0  }
   0xd   : > { %s767_s22 = sshll.u32 %s1025_s18, 4  ;;  %782 = vmatprep.subr.bf16.mxu1 %v879_v30  ;;  %776 = vmatprep.subr.bf16.mxu0 %v879_v30  ;;  %v956_v31 = vpack.c.bf16 %v341_v29, %v340_v28  ;;  %v754_v45 = vld [vmem:[%s1015_s1] ss:$0 sm:$0xff]  ;;  %vm363_vm2 = vcmask 1041409   ;;  %vm366_vm3 = vcmask 1042434   ;;  %vm369_vm4 = vcmask 1043459  }
   0xe   : > { %s250_s25 = scalar_lea.vmem %s1014_s0, %s767_s22  ;;  %778 = vmatprep.mubr.msk.bf16.mxu0 %vm880_vm1, %v879_v30  ;;  %784 = vmatprep.mubr.msk.bf16.mxu1 %vm880_vm1, %v879_v30  ;;  %v755_v47 = vld [vmem:[%s1016_s2] ss:$0 sm:$0xff]  ;;  %vm372_vm5 = vcmask 130048   ;;  %vm662_vm6 = vcmask 261120   ;;  %s753_s16 = sshll.u32 %s1025_s18, 2  ;;  %vm664_vm7 = vcmask 523264  }
   0xf   : > { %v260_v0 = vld [vmem:[%s250_s25] sm:$0xf]  ;;  %v261_v1 = vld [vmem:[%s250_s25 + $0x4] sm:$0xf]  ;;  %v262_v2 = vld [vmem:[%s250_s25 + $0x8] sm:$0xf]  ;;  %783 = vmatpush3.bf16.msra.mxu1 %v956_v31  ;;  %777 = vmatpush3.bf16.msra.mxu0 %v956_v31  ;;  %s258_s23 = scalar_lea.vmem %s1019_s5, %s753_s16 }
  0x10   : > { %v267_v3 = vsel %vm266_vm0, %v260_v0, 0.0  ;;  %v270_v4 = vsel %vm266_vm0, %v261_v1, 0.0  ;;  %v263_v5 = vld [vmem:[%s250_s25 + $0xc] sm:$0xf]  ;;  %v273_v6 = vsel %vm266_vm0, %v262_v2, 0.0  ;;  %794 = vmatprep.subr.bf16.mxu1 %v879_v30  ;;  %788 = vmatprep.subr.bf16.mxu0 %v879_v30  ;;  %vm666_vm8 = vcmask 785408  }
  0x11   : > { %268 = vadd.xlane.f32.xlu0 %v267_v3  ;;  %271 = vadd.xlane.f32.xlu1 %v270_v4  ;;  %v276_v7 = vsel %vm266_vm0, %v263_v5, 0.0 }
  0x15   : > { %274 = vadd.xlane.f32.xlu0 %v273_v6  ;;  %277 = vadd.xlane.f32.xlu1 %v276_v7 }
  0x9a   : > { %v269_v8 = vpop.xlane.xlu0 %268  ;;  %v272_v9 = vpop.xlane.xlu1 %271 }
  0x9b   : > { %v280_v10 = vmul.f32 0.0625, %v269_v8  ;;  %v281_v11 = vmul.f32 0.0625, %v272_v9 }
  0x9d   : > { %v284_v12 = vsub.f32 %v260_v0, %v280_v10  ;;  %v285_v13 = vsub.f32 %v261_v1, %v281_v11 }
  0x9e   : > { %v275_v14 = vpop.xlane.xlu0 %274  ;;  %v278_v15 = vpop.xlane.xlu1 %277 }
  0x9f   : > { %v282_v16 = vmul.f32 0.0625, %v275_v14  ;;  %v283_v17 = vmul.f32 0.0625, %v278_v15  ;;  %v288_v18 = vmul.f32 %v284_v12, %v284_v12  ;;  %v289_v19 = vmul.f32 %v285_v13, %v285_v13 }
  0xa1   : > { %v286_v20 = vsub.f32 %v262_v2, %v282_v16  ;;  %v287_v21 = vsub.f32 %v263_v5, %v283_v17  ;;  %v292_v22 = vsel %vm266_vm0, %v288_v18, 0.0  ;;  %v295_v23 = vsel %vm266_vm0, %v289_v19, 0.0 }
  0xa2   : > { %293 = vadd.xlane.f32.xlu0 %v292_v22 }
  0xa3   : > { %v290_v24 = vmul.f32 %v286_v20, %v286_v20  ;;  %v291_v25 = vmul.f32 %v287_v21, %v287_v21 }
  0xa5   : > { %v298_v26 = vsel %vm266_vm0, %v290_v24, 0.0  ;;  %v301_v27 = vsel %vm266_vm0, %v291_v25, 0.0 }
  0xa6   : > { %296 = vadd.xlane.f32.xlu0 %v295_v23  ;;  %299 = vadd.xlane.f32.xlu1 %v298_v26 }
  0xaa   : > { %302 = vadd.xlane.f32.xlu1 %v301_v27 }
 0x12b   : > { %v294_v32 = vpop.xlane.xlu0 %293 }
 0x12c   : > { %v304_v33 = vmul.f32 0.0625, %v294_v32 }
 0x12e   : > { %v308_v34 = vadd.f32 1e-06, %v304_v33 }
 0x12f   : > { %v300_v35 = vpop.xlane.xlu1 %299  ;;  %v297_v36 = vpop.xlane.xlu0 %296 }
 0x130   : > { %831 = vrsqrt.f32 %v308_v34  ;;  %v306_v37 = vmul.f32 0.0625, %v300_v35  ;;  %v305_v38 = vmul.f32 0.0625, %v297_v36 }
 0x132   : > { %v310_v39 = vadd.f32 1e-06, %v306_v37  ;;  %v309_v40 = vadd.f32 1e-06, %v305_v38 }
 0x133   : > { %v303_v41 = vpop.xlane.xlu1 %302 }
 0x134   : > { %833 = vrsqrt.f32 %v310_v39  ;;  %v307_v42 = vmul.f32 0.0625, %v303_v41 }
 0x135   : > { %835 = vrsqrt.f32 %v309_v40 }
 0x136   : > { %v311_v43 = vadd.f32 1e-06, %v307_v42  ;;  %v756_v42 = vld [vmem:[%s1018_s4] ss:$0 sm:$0xff] }
 0x138   : > { %837 = vrsqrt.f32 %v311_v43 }
 0x13d   : > { %v832_v44 = vpop.eup %831 }
 0x13e   : > { %v316_v46 = vmul.f32 %v832_v44, %v284_v12 }
 0x140   : > { %v326_v48 = vmul.f32 %v754_v45, %v316_v46 }
 0x141   : > { %v834_v49 = vpop.eup %833 }
 0x142   : > { %v836_v50 = vpop.eup %835  ;;  %v336_v51 = vadd.f32 %v755_v47, %v326_v48  ;;  %v318_v52 = vmul.f32 %v834_v49, %v286_v20 }
 0x143   : > { %v317_v53 = vmul.f32 %v836_v50, %v285_v13 }
 0x144   : > { %v344_v54 = vpack.c.bf16 %v336_v51, %v336_v51  ;;  %v328_v55 = vmul.f32 %v754_v45, %v318_v52 }
 0x145   : > { %v838_v56 = vpop.eup %837  ;;  %v327_v57 = vmul.f32 %v754_v45, %v317_v53 }
 0x146   : > { %v338_v58 = vadd.f32 %v755_v47, %v328_v55  ;;  %v319_v59 = vmul.f32 %v838_v56, %v287_v21  ;;  %v358_v63 = vunpack.c.l.b16 %v344_v54 }
 0x147   : > { %v337_v60 = vadd.f32 %v755_v47, %v327_v57 }
 0x148   : > { %v346_v61 = vpack.c.bf16 %v338_v58, %v338_v58  ;;  %v329_v62 = vmul.f32 %v754_v45, %v319_v59  ;;  %v422_v5 = vrot.slane %v358_v63, 1  ;;  %v534_v16 = vrot.slane %v358_v63, 3 }
 0x149   : > { %v345_v0 = vpack.c.bf16 %v337_v60, %v337_v60  ;;  %v478_v22 = vrot.slane %v358_v63, 2 }
 0x14a   : > { %v360_v1 = vunpack.c.l.b16 %v346_v61  ;;  %v339_v2 = vadd.f32 %v755_v47, %v329_v62 }
 0x14b   : > { %v359_v3 = vunpack.c.l.b16 %v345_v0 }
 0x14c   : > { %v347_v4 = vpack.c.bf16 %v339_v2, %v339_v2  ;;  %v365_v7 = vrot.slane %v360_v1, 6  ;;  %v424_v8 = vrot.slane %v360_v1, 7  ;;  %v537_v19 = vrot.slane %v360_v1, 1 }
 0x14d   : > { %v362_v6 = vrot.slane %v359_v3, 7  ;;  %v423_v10 = vsel %vm363_vm2, %v359_v3, %v422_v5  ;;  %v535_v11 = vrot.slane %v359_v3, 2  ;;  %v479_v15 = vrot.slane %v359_v3, 1 }
 0x14e   : > { %v361_v9 = vunpack.c.l.b16 %v347_v4  ;;  %v425_v18 = vsel %vm366_vm3, %v424_v8, %v423_v10 }
 0x14f   : > { %v364_v12 = vsel %vm363_vm2, %v362_v6, %v358_v63  ;;  %v536_v23 = vsel %vm363_vm2, %v535_v11, %v534_v16  ;;  %v480_v26 = vsel %vm363_vm2, %v479_v15, %v478_v22 }
 0x150   : > { %v368_v13 = vrot.slane %v361_v9, 5  ;;  %v426_v14 = vrot.slane %v361_v9, 6  ;;  %v367_v17 = vsel %vm366_vm3, %v365_v7, %v364_v12  ;;  %v482_v27 = vrot.slane %v361_v9, 7 }
 0x151   : > { %v538_v28 = vsel %vm366_vm3, %v537_v19, %v536_v23  ;;  %v481_v29 = vsel %vm366_vm3, %v360_v1, %v480_v26 }
 0x152   : > { %v370_v20 = vsel %vm369_vm4, %v368_v13, %v367_v17  ;;  %v427_v21 = vsel %vm369_vm4, %v426_v14, %v425_v18  ;;  %v483_v32 = vsel %vm369_vm4, %v482_v27, %v481_v29  ;;  %v539_v33 = vsel %vm369_vm4, %v361_v9, %v538_v28 }
 0x153   : > { %v371_v24 = vpack.c.b16 %v370_v20, %v370_v20  ;;  %v428_v25 = vpack.c.b16 %v427_v21, %v427_v21  ;;  %v484_v34 = vpack.c.b16 %v483_v32, %v483_v32  ;;  %v540_v35 = vpack.c.b16 %v539_v33, %v539_v33 }
 0x155   : > { %779 = vmatmul.mubr.msk.bf16.vlgmr.msra.gmra.mxu0 %vm372_vm5, %v371_v24  ;;  %785 = vmatmul.mubr.msk.bf16.vlgmr.msra.gmra.mxu1 %vm372_vm5, %v428_v25 }
 0x156   : > { %795 = vmatpush3.bf16.msra.mxu1 %v956_v31  ;;  %789 = vmatpush3.bf16.msra.mxu0 %v956_v31 }
 0x157   : > { %790 = vmatprep.mubr.msk.bf16.mxu0 %vm880_vm1, %v879_v30  ;;  %796 = vmatprep.mubr.msk.bf16.mxu1 %vm880_vm1, %v879_v30 }
 0x15d   : > { %791 = vmatmul.mubr.msk.bf16.vlgmr.msra.gmra.mxu0 %vm372_vm5, %v484_v34  ;;  %797 = vmatmul.mubr.msk.bf16.vlgmr.msra.gmra.mxu1 %vm372_vm5, %v540_v35 }
 0x215   : > { %v410_v36 = vpop.f32.mrf.mxu0  ;;  %v466_v31 = vpop.f32.mrf.mxu1 }
 0x216   : > { %v467_v51 = vadd.f32 %v756_v42, %v466_v31  ;;  %v411_v54 = vadd.f32 %v756_v42, %v410_v36 }
 0x217   : > { %v780_v37 = vpop.f32.mrf.mxu0  ;;  %v786_v38 = vpop.f32.mrf.mxu1 }
 0x218   : > { %v758_v57 = vmul.f32 -1.442695, %v411_v54  ;;  %v760_v58 = vmul.f32 -1.442695, %v467_v51 }
 0x219   : > { %v413_v39 = vpop.f32.mrf.mxu0  ;;  %v469_v40 = vpop.f32.mrf.mxu1 }
 0x21b   : > { %v781_v41 = vpop.f32.mrf.mxu0  ;;  %v787_v30 = vpop.f32.mrf.mxu1 }
 0x21d   : > { %v522_v43 = vpop.f32.mrf.mxu0  ;;  %v578_v44 = vpop.f32.mrf.mxu1 }
 0x21e   : > { %v523_v45 = vadd.f32 %v756_v42, %v522_v43  ;;  %v579_v46 = vadd.f32 %v756_v42, %v578_v44 }
 0x21f   : > { %v792_v47 = vpop.f32.mrf.mxu0  ;;  %v798_v48 = vpop.f32.mrf.mxu1 }
 0x220   : > { %601 = vrot.lane.b32.xlu0 %v579_v46, %s881_s11  ;;  %617 = vrot.lane.b32.xlu1 %v523_v45, %s881_s11  ;;  %v764_v55 = vmul.f32 -1.442695, %v579_v46  ;;  %v762_v56 = vmul.f32 -1.442695, %v523_v45 }
 0x221   : > { %v525_v49 = vpop.f32.mrf.mxu0  ;;  %v581_v50 = vpop.f32.mrf.mxu1 }
 0x222   : > { %839 = vpow2.f32 %v764_v55 }
 0x223   : > { %v793_v52 = vpop.f32.mrf.mxu0  ;;  %v799_v53 = vpop.f32.mrf.mxu1  ;;  %841 = vpow2.f32 %v762_v56 }
 0x224   : > { %609 = vrot.lane.b32.xlu1 %v467_v51, %s881_s11  ;;  %843 = vpow2.f32 %v758_v57 }
 0x225   : > { %845 = vpow2.f32 %v760_v58 }
 0x228   : > { %593 = vrot.lane.b32.xlu1 %v411_v54, %s881_s11 }
 0x22f   : > { %v840_v59 = vpop.eup %839 }
 0x230   : > { %v587_v60 = vadd.f32 1.0, %v840_v59  ;;  %v842_v61 = vpop.eup %841 }
 0x231   : > { %v844_v62 = vpop.eup %843  ;;  %v531_v63 = vadd.f32 1.0, %v842_v61 }
 0x232   : > { %847 = vrcp.f32 %v587_v60  ;;  %v846_v0 = vpop.eup %845  ;;  %v419_v1 = vadd.f32 1.0, %v844_v62 }
 0x233   : > { %v475_v2 = vadd.f32 1.0, %v846_v0  ;;  %849 = vrcp.f32 %v531_v63 }
 0x234   : > { %851 = vrcp.f32 %v419_v1 }
 0x235   : > { %853 = vrcp.f32 %v475_v2 }
 0x23f   : > { %v848_v3 = vpop.eup %847 }
 0x240   : > { %v599_v4 = vsub.f32 1.0, %v848_v3  ;;  %v850_v5 = vpop.eup %849  ;;  %v598_v8 = vmul.f32 0.0, %v848_v3 }
 0x241   : > { %v852_v10 = vpop.eup %851  ;;  %v615_v12 = vsub.f32 1.0, %v850_v5 }
 0x242   : > { %v854_v13 = vpop.eup %853  ;;  %v591_v19 = vsub.f32 1.0, %v852_v10  ;;  %v590_v23 = vmul.f32 0.0, %v852_v10 }
 0x243   : > { %v607_v18 = vsub.f32 1.0, %v854_v13 }
 0x292   : > { %v602_v6 = vpop.permute.xlu0 %601  ;;  %v618_v7 = vpop.permute.xlu1 %617 }
 0x293   : > { %v604_v9 = vmul.f32 %v602_v6, %v599_v4  ;;  %v620_v16 = vmul.f32 %v618_v7, %v615_v12 }
 0x295   : > { %v605_v11 = vadd.f32 %v604_v9, %v598_v8 }
 0x296   : > { %v610_v14 = vpop.permute.xlu1 %609 }
 0x297   : > { %v614_v15 = vmul.f32 %v850_v5, %v605_v11  ;;  %v612_v21 = vmul.f32 %v610_v14, %v607_v18 }
 0x299   : > { %v621_v17 = vadd.f32 %v620_v16, %v614_v15 }
 0x29a   : > { %v594_v20 = vpop.permute.xlu1 %593 }
 0x29b   : > { %v624_v22 = vmul.f32 %v854_v13, %v621_v17  ;;  %v596_v24 = vmul.f32 %v594_v20, %v591_v19  ;;  %641 = vrot.lane.b32.xlu1 %v621_v17, %s882_s12 }
 0x29d   : > { %v625_v25 = vadd.f32 %v624_v22, %v612_v21  ;;  %v597_v26 = vadd.f32 %v596_v24, %v590_v23 }
 0x29f   : > { %v606_v27 = vmul.f32 %v854_v13, %v597_v26  ;;  %v628_v28 = vmul.f32 %v852_v10, %v625_v25  ;;  %636 = vrot.lane.b32.xlu0 %v625_v25, %s882_s12 }
 0x2a1   : > { %v613_v29 = vadd.f32 %v612_v21, %v606_v27  ;;  %v629_v32 = vadd.f32 %v628_v28, %v596_v24 }
 0x2a3   : > { %646 = vrot.lane.b32.xlu0 %v605_v11, %s882_s12  ;;  %631 = vrot.lane.b32.xlu1 %v629_v32, %s882_s12  ;;  %v622_v33 = vmul.f32 %v850_v5, %v613_v29 }
 0x2a5   : > { %v623_v34 = vadd.f32 %v622_v33, %v620_v16 }
 0x2a7   : > { %v626_v35 = vmul.f32 %v848_v3, %v623_v34 }
 0x2a9   : > { %v627_v36 = vadd.f32 %v626_v35, %v604_v9 }
 0x30d   : > { %v642_v31 = vpop.permute.xlu1 %641 }
 0x30e   : > { %v644_v37 = vsel %vm372_vm5, %v623_v34, %v642_v31 }
 0x30f   : > { %655 = vrot.lane.b32.xlu1 %v644_v37, %s883_s13 }
 0x311   : > { %v637_v38 = vpop.permute.xlu0 %636 }
 0x312   : > { %v639_v39 = vsel %vm372_vm5, %v613_v29, %v637_v38 }
 0x313   : > { %651 = vrot.lane.b32.xlu0 %v639_v39, %s884_s14 }
 0x315   : > { %v647_v40 = vpop.permute.xlu0 %646  ;;  %v632_v30 = vpop.permute.xlu1 %631 }
 0x316   : > { %v649_v41 = vsel %vm372_vm5, %v627_v36, %v647_v40  ;;  %v634_v42 = vsel %vm372_vm5, %v597_v26, %v632_v30 }
 0x317   : > { %659 = vrot.lane.b32.xlu0 %v649_v41, %s885_s15 }
 0x381   : > { %v656_v45 = vpop.permute.xlu1 %655 }
 0x385   : > { %v652_v43 = vpop.permute.xlu0 %651 }
 0x386   : > { %v663_v44 = vsel %vm662_vm6, %v634_v42, %v652_v43 }
 0x387   : > { %v665_v47 = vsel %vm664_vm7, %v663_v44, %v656_v45 }
 0x389   : > { %v660_v46 = vpop.permute.xlu0 %659 }
 0x38a   : > { %v667_v48 = vsel %vm666_vm8, %v665_v47, %v660_v46 }
 0x38b   : > { %668 = vst [vmem:[%s258_s23] sm:$0xf] %v667_v48 }
 0x38c PF: > { %s15_s20 = sadd.s32 1, %s877_s20   ;;  %s1020_s18 = smov %s873_s19 }
 0x38d   : > { %p12_p5 = scmp.ge.s32.totalorder %s15_s20, 4   ;;  %s1021_s19 = smov %s1023_s21 }
 0x38f   :  { %14 = sbr.rel (!%p12_p5) target bundleno = 2 (0x2), region = 70 }

// kernel: forward.12
= control target key start
LH: loop header
LB: loop body
LE: loop exit
PB: predicated region body
PF: predicated region fallthrough
CT: control target
= control target key end

     0   :  { %s862_s18 = smov 0   ;;  %s864_s19 = smov 0   ;;  %s937_s0 = inlined_call_operand.vmem [shape: f32[2,4,4,16], index: 0, kind: input, shape index: {}]   ;;  %s938_s1 = inlined_call_operand.vmem [shape: f32[1,1,16], index: 1, kind: input, shape index: {}]   ;;  %s939_s2 = inlined_call_operand.vmem [shape: f32[1,1,16], index: 2, kind: input, shape index: {}]   ;;  %s940_s3 = inlined_call_operand.vmem [shape: f32[16,32], index: 3, kind: input, shape index: {}]   ;;  %s941_s4 = inlined_call_operand.vmem [shape: f32[1,32], index: 4, kind: input, shape index: {}]   ;;  %s942_s5 = inlined_call_operand.vmem [shape: f32[2,4,4,32], index: 5, kind: output, shape index: {}]  }
   0x1   :  { %s866_s20 = smov 0  }
   0x2 LB: > { %s27_s21 = sadd.s32 1, %s822_s19  ;;  %p700_p0 = scmp.ge.s32.totalorder %s826_s20, 1  ;;  %s826_s20 = sphi %s866_s20, %s15_s20   ;;  %s822_s19 = sphi %s864_s19, %s944_s19   ;;  %s818_s18 = sphi %s862_s18, %s943_s18  }
   0x3   : > { %p29_p1 = scmp.ge.s32.totalorder %s27_s21, 2  ;;  %p206_p2 = scmp.lt.s32.totalorder %s826_s20, 3 }
   0x5   : > { %s946_s21 = smov (%p29_p1, %s27_s21), 0  ;;  %p207_p3 = pnand %p700_p0, %p206_p2 }
   0x6   : > { %p240_p4 = scmp.lt.s32.totalorder (!%p207_p3), %s818_s18, 1  ;;  %s830_s11 = smov (!%p207_p3), 112  }
   0x7   : > { %210 = sbr.rel (%p207_p3) target bundleno = 781 (0x30d), region = 40  ;;  %s831_s12 = smov (!%p207_p3), 16  }
   0xc   : > { %s948_s18 = smov (!%p240_p4, %s818_s18), 1  ;;  %vm263_vm0 = vcmask 125952   ;;  %v337_v28 = vld [vmem:[%s940_s3] sm:$0xff]  ;;  %v338_v29 = vld [vmem:[%s940_s3 + $0x8] sm:$0xff]  ;;  %v828_v31 = vmov 0.0   ;;  %vm829_vm1 = vmmov 0  }
   0xd   : > { %s718_s22 = sshll.u32 %s948_s18, 4  ;;  %v339_v30 = vpack.c.bf16 %v338_v29, %v337_v28  ;;  %734 = vmatprep.subr.bf16.mxu1 %v828_v31  ;;  %728 = vmatprep.subr.bf16.mxu0 %v828_v31  ;;  %v705_v45 = vld [vmem:[%s938_s1] ss:$0 sm:$0xff]  ;;  %vm348_vm2 = vcmask 130048   ;;  %vm608_vm3 = vcmask 257024  }
   0xe   : > { %s247_s25 = scalar_lea.vmem %s937_s0, %s718_s22  ;;  %736 = vmatprep.mubr.msk.bf16.mxu1 %vm829_vm1, %v828_v31  ;;  %730 = vmatprep.mubr.msk.bf16.mxu0 %vm829_vm1, %v828_v31  ;;  %v706_v47 = vld [vmem:[%s939_s2] ss:$0 sm:$0xff]  ;;  %s255_s15 = scalar_lea.vmem %s942_s5, %s718_s22 }
   0xf   : > { %v258_v0 = vld [vmem:[%s247_s25 + $0x4] sm:$0xf]  ;;  %v260_v1 = vld [vmem:[%s247_s25 + $0xc] sm:$0xf]  ;;  %v257_v2 = vld [vmem:[%s247_s25] sm:$0xf]  ;;  %735 = vmatpush3.bf16.msra.mxu1 %v339_v30  ;;  %729 = vmatpush3.bf16.msra.mxu0 %v339_v30 }
  0x10   : > { %v267_v3 = vsel %vm263_vm0, %v258_v0, 0.0  ;;  %v273_v4 = vsel %vm263_vm0, %v260_v1, 0.0  ;;  %v259_v5 = vld [vmem:[%s247_s25 + $0x8] sm:$0xf]  ;;  %v264_v6 = vsel %vm263_vm0, %v257_v2, 0.0  ;;  %746 = vmatprep.subr.bf16.mxu1 %v828_v31  ;;  %740 = vmatprep.subr.bf16.mxu0 %v828_v31 }
  0x11   : > { %268 = vadd.xlane.f32.xlu0 %v267_v3  ;;  %274 = vadd.xlane.f32.xlu1 %v273_v4  ;;  %v270_v7 = vsel %vm263_vm0, %v259_v5, 0.0 }
  0x15   : > { %265 = vadd.xlane.f32.xlu0 %v264_v6  ;;  %271 = vadd.xlane.f32.xlu1 %v270_v7 }
  0x9a   : > { %v269_v8 = vpop.xlane.xlu0 %268  ;;  %v275_v9 = vpop.xlane.xlu1 %274 }
  0x9b   : > { %v278_v10 = vmul.f32 0.0625, %v269_v8  ;;  %v280_v11 = vmul.f32 0.0625, %v275_v9  ;;  %v707_v8 = vld [vmem:[%s941_s4] ss:$0 sm:$0xff] }
  0x9d   : > { %v282_v12 = vsub.f32 %v258_v0, %v278_v10  ;;  %v284_v13 = vsub.f32 %v260_v1, %v280_v11 }
  0x9e   : > { %v266_v14 = vpop.xlane.xlu0 %265  ;;  %v272_v15 = vpop.xlane.xlu1 %271 }
  0x9f   : > { %v277_v16 = vmul.f32 0.0625, %v266_v14  ;;  %v279_v17 = vmul.f32 0.0625, %v272_v15  ;;  %v286_v18 = vmul.f32 %v282_v12, %v282_v12  ;;  %v288_v19 = vmul.f32 %v284_v13, %v284_v13 }
  0xa1   : > { %v281_v20 = vsub.f32 %v257_v2, %v277_v16  ;;  %v283_v21 = vsub.f32 %v259_v5, %v279_v17  ;;  %v292_v22 = vsel %vm263_vm0, %v286_v18, 0.0  ;;  %v298_v23 = vsel %vm263_vm0, %v288_v19, 0.0 }
  0xa2   : > { %293 = vadd.xlane.f32.xlu0 %v292_v22 }
  0xa3   : > { %v285_v24 = vmul.f32 %v281_v20, %v281_v20  ;;  %v287_v25 = vmul.f32 %v283_v21, %v283_v21 }
  0xa5   : > { %v289_v26 = vsel %vm263_vm0, %v285_v24, 0.0  ;;  %v295_v27 = vsel %vm263_vm0, %v287_v25, 0.0 }
  0xa6   : > { %299 = vadd.xlane.f32.xlu0 %v298_v23  ;;  %290 = vadd.xlane.f32.xlu1 %v289_v26 }
  0xaa   : > { %296 = vadd.xlane.f32.xlu1 %v295_v27 }
 0x12b   : > { %v294_v32 = vpop.xlane.xlu0 %293 }
 0x12c   : > { %v302_v33 = vmul.f32 0.0625, %v294_v32 }
 0x12e   : > { %v306_v34 = vadd.f32 1e-06, %v302_v33 }
 0x12f   : > { %v291_v35 = vpop.xlane.xlu1 %290  ;;  %v300_v36 = vpop.xlane.xlu0 %299 }
 0x130   : > { %780 = vrsqrt.f32 %v306_v34  ;;  %v301_v37 = vmul.f32 0.0625, %v291_v35  ;;  %v304_v38 = vmul.f32 0.0625, %v300_v36 }
 0x132   : > { %v305_v39 = vadd.f32 1e-06, %v301_v37  ;;  %v308_v40 = vadd.f32 1e-06, %v304_v38 }
 0x133   : > { %v297_v41 = vpop.xlane.xlu1 %296 }
 0x134   : > { %782 = vrsqrt.f32 %v305_v39  ;;  %v303_v42 = vmul.f32 0.0625, %v297_v41 }
 0x135   : > { %784 = vrsqrt.f32 %v308_v40 }
 0x136   : > { %v307_v43 = vadd.f32 1e-06, %v303_v42 }
 0x138   : > { %786 = vrsqrt.f32 %v307_v43 }
 0x13d   : > { %v781_v44 = vpop.eup %780 }
 0x13e   : > { %v314_v46 = vmul.f32 %v781_v44, %v282_v12 }
 0x140   : > { %v324_v48 = vmul.f32 %v705_v45, %v314_v46 }
 0x141   : > { %v783_v49 = vpop.eup %782 }
 0x142   : > { %v785_v50 = vpop.eup %784  ;;  %v334_v51 = vadd.f32 %v706_v47, %v324_v48  ;;  %v313_v52 = vmul.f32 %v783_v49, %v281_v20 }
 0x143   : > { %v316_v53 = vmul.f32 %v785_v50, %v284_v13 }
 0x144   : > { %v398_v54 = vpack.c.bf16 %v334_v51, %v334_v51  ;;  %v323_v55 = vmul.f32 %v705_v45, %v313_v52 }
 0x145   : > { %v787_v56 = vpop.eup %786  ;;  %v326_v57 = vmul.f32 %v705_v45, %v316_v53 }
 0x146   : > { %v315_v58 = vmul.f32 %v787_v56, %v283_v21  ;;  %737 = vmatmul.mubr.msk.bf16.vlgmr.msra.gmra.mxu1 %vm348_vm2, %v398_v54  ;;  %v333_v59 = vadd.f32 %v706_v47, %v323_v55 }
 0x147   : > { %747 = vmatpush3.bf16.msra.mxu1 %v339_v30  ;;  %748 = vmatprep.mubr.msk.bf16.mxu1 %vm829_vm1, %v828_v31  ;;  %v336_v61 = vadd.f32 %v706_v47, %v326_v57 }
 0x148   : > { %v341_v60 = vpack.c.bf16 %v333_v59, %v333_v59  ;;  %v325_v62 = vmul.f32 %v705_v45, %v315_v58 }
 0x149   : > { %v498_v63 = vpack.c.bf16 %v336_v61, %v336_v61 }
 0x14a   : > { %731 = vmatmul.mubr.msk.bf16.vlgmr.msra.gmra.mxu0 %vm348_vm2, %v341_v60  ;;  %v335_v0 = vadd.f32 %v706_v47, %v325_v62 }
 0x14b   : > { %741 = vmatpush3.bf16.msra.mxu0 %v339_v30  ;;  %742 = vmatprep.mubr.msk.bf16.mxu0 %vm829_vm1, %v828_v31 }
 0x14c   : > { %v448_v1 = vpack.c.bf16 %v335_v0, %v335_v0 }
 0x14e   : > { %749 = vmatmul.mubr.msk.bf16.vlgmr.msra.gmra.mxu1 %vm348_vm2, %v498_v63 }
 0x152   : > { %743 = vmatmul.mubr.msk.bf16.vlgmr.msra.gmra.mxu0 %vm348_vm2, %v448_v1 }
 0x206   : > { %v436_v2 = vpop.f32.mrf.mxu1 }
 0x207   : > { %v437_v20 = vadd.f32 %v707_v8, %v436_v2 }
 0x208   : > { %v738_v3 = vpop.f32.mrf.mxu1 }
 0x209   : > { %v711_v25 = vmul.f32 -1.442695, %v437_v20 }
 0x20a   : > { %v386_v4 = vpop.f32.mrf.mxu0  ;;  %v439_v5 = vpop.f32.mrf.mxu1 }
 0x20b   : > { %v387_v22 = vadd.f32 %v707_v8, %v386_v4 }
 0x20c   : > { %v732_v6 = vpop.f32.mrf.mxu0  ;;  %v739_v7 = vpop.f32.mrf.mxu1 }
 0x20d   : > { %v709_v26 = vmul.f32 -1.442695, %v387_v22 }
 0x20e   : > { %v389_v9 = vpop.f32.mrf.mxu0  ;;  %v536_v10 = vpop.f32.mrf.mxu1 }
 0x20f   : > { %v537_v11 = vadd.f32 %v707_v8, %v536_v10 }
 0x210   : > { %v733_v12 = vpop.f32.mrf.mxu0  ;;  %v750_v13 = vpop.f32.mrf.mxu1 }
 0x211   : > { %559 = vrot.lane.b32.xlu0 %v537_v11, %s830_s11  ;;  %v715_v23 = vmul.f32 -1.442695, %v537_v11 }
 0x212   : > { %v486_v14 = vpop.f32.mrf.mxu0  ;;  %v539_v15 = vpop.f32.mrf.mxu1 }
 0x213   : > { %v487_v16 = vadd.f32 %v707_v8, %v486_v14  ;;  %788 = vpow2.f32 %v715_v23 }
 0x214   : > { %v744_v17 = vpop.f32.mrf.mxu0  ;;  %v751_v18 = vpop.f32.mrf.mxu1 }
 0x215   : > { %575 = vrot.lane.b32.xlu1 %v487_v16, %s830_s11  ;;  %v713_v24 = vmul.f32 -1.442695, %v487_v16 }
 0x216   : > { %v489_v19 = vpop.f32.mrf.mxu0 }
 0x217   : > { %790 = vpow2.f32 %v713_v24 }
 0x218   : > { %v745_v21 = vpop.f32.mrf.mxu0  ;;  %792 = vpow2.f32 %v711_v25 }
 0x219   : > { %567 = vrot.lane.b32.xlu1 %v437_v20, %s830_s11  ;;  %794 = vpow2.f32 %v709_v26 }
 0x21d   : > { %551 = vrot.lane.b32.xlu1 %v387_v22, %s830_s11 }
 0x220   : > { %v789_v27 = vpop.eup %788 }
 0x221   : > { %v545_v28 = vadd.f32 1.0, %v789_v27 }
 0x223   : > { %796 = vrcp.f32 %v545_v28 }
 0x224   : > { %v791_v29 = vpop.eup %790 }
 0x225   : > { %v495_v30 = vadd.f32 1.0, %v791_v29  ;;  %v793_v31 = vpop.eup %792 }
 0x226   : > { %v445_v32 = vadd.f32 1.0, %v793_v31  ;;  %v795_v33 = vpop.eup %794 }
 0x227   : > { %798 = vrcp.f32 %v495_v30  ;;  %v395_v34 = vadd.f32 1.0, %v795_v33 }
 0x228   : > { %800 = vrcp.f32 %v445_v32 }
 0x229   : > { %802 = vrcp.f32 %v395_v34 }
 0x230   : > { %v797_v35 = vpop.eup %796 }
 0x231   : > { %v557_v36 = vsub.f32 1.0, %v797_v35  ;;  %v556_v39 = vmul.f32 0.0, %v797_v35 }
 0x234   : > { %v799_v37 = vpop.eup %798 }
 0x235   : > { %v573_v42 = vsub.f32 1.0, %v799_v37  ;;  %v801_v43 = vpop.eup %800 }
 0x236   : > { %v565_v48 = vsub.f32 1.0, %v801_v43  ;;  %v803_v49 = vpop.eup %802 }
 0x237   : > { %v549_v54 = vsub.f32 1.0, %v803_v49  ;;  %v548_v56 = vmul.f32 0.0, %v803_v49 }
 0x283   : > { %v560_v38 = vpop.permute.xlu0 %559 }
 0x284   : > { %v562_v40 = vmul.f32 %v560_v38, %v557_v36 }
 0x286   : > { %v563_v41 = vadd.f32 %v562_v40, %v556_v39 }
 0x287   : > { %v576_v44 = vpop.permute.xlu1 %575 }
 0x288   : > { %v572_v45 = vmul.f32 %v799_v37, %v563_v41  ;;  %v578_v46 = vmul.f32 %v576_v44, %v573_v42 }
 0x28a   : > { %v579_v47 = vadd.f32 %v578_v46, %v572_v45 }
 0x28b   : > { %v568_v50 = vpop.permute.xlu1 %567 }
 0x28c   : > { %v570_v51 = vmul.f32 %v568_v50, %v565_v48  ;;  %v582_v52 = vmul.f32 %v801_v43, %v579_v47 }
 0x28e   : > { %v583_v53 = vadd.f32 %v582_v52, %v570_v51 }
 0x28f   : > { %v552_v55 = vpop.permute.xlu1 %551 }
 0x290   : > { %v554_v57 = vmul.f32 %v552_v55, %v549_v54  ;;  %v586_v58 = vmul.f32 %v803_v49, %v583_v53  ;;  %594 = vrot.lane.b32.xlu1 %v583_v53, %s831_s12 }
 0x292   : > { %v555_v59 = vadd.f32 %v554_v57, %v548_v56  ;;  %v587_v60 = vadd.f32 %v586_v58, %v554_v57 }
 0x294   : > { %v564_v61 = vmul.f32 %v801_v43, %v555_v59  ;;  %604 = vrot.lane.b32.xlu1 %v563_v41, %s831_s12  ;;  %589 = vrot.lane.b32.xlu0 %v587_v60, %s831_s12 }
 0x296   : > { %v571_v62 = vadd.f32 %v570_v51, %v564_v61 }
 0x298   : > { %599 = vrot.lane.b32.xlu0 %v579_v47, %s831_s12  ;;  %v580_v63 = vmul.f32 %v799_v37, %v571_v62 }
 0x29a   : > { %v581_v0 = vadd.f32 %v580_v63, %v578_v46 }
 0x29c   : > { %v584_v1 = vmul.f32 %v797_v35, %v581_v0 }
 0x29e   : > { %v585_v2 = vadd.f32 %v584_v1, %v562_v40 }
 0x302   : > { %v595_v3 = vpop.permute.xlu1 %594 }
 0x303   : > { %v597_v4 = vsel %vm348_vm2, %v571_v62, %v595_v3 }
 0x304   : > { %610 = vst.msk [vmem:[%s255_s15 + $0x4] sm:$0xf] %vm608_vm3, %v597_v4 }
 0x306   : > { %v605_v5 = vpop.permute.xlu1 %604  ;;  %v590_v6 = vpop.permute.xlu0 %589 }
 0x307   : > { %v607_v7 = vsel %vm348_vm2, %v585_v2, %v605_v5  ;;  %v592_v8 = vsel %vm348_vm2, %v555_v59, %v590_v6 }
 0x308   : > { %612 = vst.msk [vmem:[%s255_s15 + $0xc] sm:$0xf] %vm608_vm3, %v607_v7  ;;  %609 = vst.msk [vmem:[%s255_s15] sm:$0xf] %vm608_vm3, %v592_v8 }
 0x30a   : > { %v600_v9 = vpop.permute.xlu0 %599 }
 0x30b   : > { %v602_v10 = vsel %vm348_vm2, %v581_v0, %v600_v9 }
 0x30c   : > { %611 = vst.msk [vmem:[%s255_s15 + $0x8] sm:$0xf] %vm608_vm3, %v602_v10 }
 0x30d PF: > { %s15_s20 = sadd.s32 1, %s826_s20   ;;  %s943_s18 = smov %s822_s19 }
 0x30e   : > { %p12_p5 = scmp.ge.s32.totalorder %s15_s20, 4   ;;  %s944_s19 = smov %s946_s21 }
 0x310   :  { %14 = sbr.rel (!%p12_p5) target bundleno = 2 (0x2), region = 70 }

// kernel: forward.15
= control target key start
LH: loop header
LB: loop body
LE: loop exit
PB: predicated region body
PF: predicated region fallthrough
CT: control target
= control target key end

     0   :  { %vm33_vm0 = vcmask 130048   ;;  %vm297_vm5 = vcmask 261120   ;;  %s580_s0 = inlined_call_operand.vmem [shape: f32[32,16], index: 0, kind: input, shape index: {}]   ;;  %s581_s3 = inlined_call_operand.vmem [shape: f32[16,32], index: 3, kind: input, shape index: {}]   ;;  %s582_s1 = inlined_call_operand.vmem [shape: f32[1,16], index: 1, kind: input, shape index: {}]   ;;  %s583_s2 = inlined_call_operand.vmem [shape: f32[1,16], index: 2, kind: input, shape index: {}]   ;;  %s584_s5 = inlined_call_operand.vmem [shape: f32[32,16], index: 5, kind: input, shape index: {}]   ;;  %s585_s4 = inlined_call_operand.vmem [shape: f32[1,32], index: 4, kind: input, shape index: {}]   ;;  %s586_s6 = inlined_call_operand.vmem [shape: f32[1,16], index: 6, kind: input, shape index: {}]   ;;  %s587_s7 = inlined_call_operand.vmem [shape: f32[32,16], index: 7, kind: output, shape index: {}]  }
   0x1   :  { %v463_v0 = vld [vmem:[%s580_s0] sm:$0xff]  ;;  %v468_v1 = vld [vmem:[%s580_s0 + $0x10] sm:$0xff]  ;;  %v473_v2 = vld [vmem:[%s580_s0 + $0x8] sm:$0xff] }
   0x2   :  { %v34_v3 = vsel %vm33_vm0, %v463_v0, 0.0  ;;  %v40_v4 = vsel %vm33_vm0, %v468_v1, 0.0  ;;  %v482_v5 = vld [vmem:[%s580_s0 + $0x18] sm:$0xff]  ;;  %v37_v6 = vsel %vm33_vm0, %v473_v2, 0.0  ;;  %v109_v28 = vld [vmem:[%s581_s3] sm:$0xff]  ;;  %v110_v29 = vld [vmem:[%s581_s3 + $0x8] sm:$0xff] }
   0x3   :  { %35 = vadd.xlane.f32.xlu0 %v34_v3  ;;  %41 = vadd.xlane.f32.xlu1 %v40_v4  ;;  %v43_v7 = vsel %vm33_vm0, %v482_v5, 0.0  ;;  %v111_v30 = vpack.c.bf16 %v110_v29, %v109_v28  ;;  %v365_v45 = vld [vmem:[%s582_s1] ss:$0 sm:$0xff]  ;;  %v286_v63 = vld [vmem:[%s584_s5 + $0x10] sm:$0xff]  ;;  %v287_v3 = vld [vmem:[%s584_s5 + $0x18] sm:$0xff] }
   0x4   :  { %v366_v50 = vld [vmem:[%s583_s2] ss:$0 sm:$0xff]  ;;  %v289_v4 = vpack.c.bf16 %v287_v3, %v286_v63 }
   0x5   :  { %380 = vmatprep.subr.bf16.mxu0 %v111_v30 }
   0x6   :  { %381 = vmatpush3.bf16.msra.mxu0 %v111_v30  ;;  %386 = vmatprep.subr.bf16.mxu1 %v289_v4 }
   0x7   :  { %38 = vadd.xlane.f32.xlu0 %v37_v6  ;;  %44 = vadd.xlane.f32.xlu1 %v43_v7  ;;  %v284_v6 = vld [vmem:[%s584_s5] sm:$0xff]  ;;  %v285_v7 = vld [vmem:[%s584_s5 + $0x8] sm:$0xff] }
   0x8   :  { %387 = vmatpush3.bf16.msra.mxu1 %v289_v4 }
  0x8c   :  { %v36_v8 = vpop.xlane.xlu0 %35  ;;  %v42_v9 = vpop.xlane.xlu1 %41 }
  0x8d   :  { %v47_v10 = vmul.f32 0.0625, %v36_v8  ;;  %v49_v11 = vmul.f32 0.0625, %v42_v9  ;;  %v288_v8 = vpack.c.bf16 %v285_v7, %v284_v6  ;;  %v367_v9 = vld [vmem:[%s585_s4] ss:$0 sm:$0xff] }
  0x8f   :  { %v51_v12 = vsub.f32 %v463_v0, %v47_v10  ;;  %v53_v13 = vsub.f32 %v468_v1, %v49_v11  ;;  %388 = vmatprep.subr.bf16.mxu1 %v288_v8 }
  0x90   :  { %v39_v14 = vpop.xlane.xlu0 %38  ;;  %v45_v15 = vpop.xlane.xlu1 %44  ;;  %389 = vmatpush3.bf16.msra.mxu1 %v288_v8 }
  0x91   :  { %v48_v16 = vmul.f32 0.0625, %v39_v14  ;;  %v50_v17 = vmul.f32 0.0625, %v45_v15  ;;  %v55_v18 = vmul.f32 %v51_v12, %v51_v12  ;;  %v57_v19 = vmul.f32 %v53_v13, %v53_v13 }
  0x93   :  { %v52_v20 = vsub.f32 %v473_v2, %v48_v16  ;;  %v54_v21 = vsub.f32 %v482_v5, %v50_v17  ;;  %v59_v22 = vsel %vm33_vm0, %v55_v18, 0.0  ;;  %v65_v23 = vsel %vm33_vm0, %v57_v19, 0.0 }
  0x94   :  { %60 = vadd.xlane.f32.xlu0 %v59_v22  ;;  %v419_v18 = vmov 1.0  }
  0x95   :  { %v56_v24 = vmul.f32 %v52_v20, %v52_v20  ;;  %v58_v25 = vmul.f32 %v54_v21, %v54_v21 }
  0x97   :  { %v62_v26 = vsel %vm33_vm0, %v56_v24, 0.0  ;;  %v68_v27 = vsel %vm33_vm0, %v58_v25, 0.0 }
  0x98   :  { %66 = vadd.xlane.f32.xlu0 %v65_v23  ;;  %63 = vadd.xlane.f32.xlu1 %v62_v26 }
  0x9c   :  { %69 = vadd.xlane.f32.xlu1 %v68_v27 }
 0x11d   :  { %v61_v31 = vpop.xlane.xlu0 %60 }
 0x11e   :  { %v71_v32 = vmul.f32 0.0625, %v61_v31 }
 0x120   :  { %v75_v33 = vadd.f32 1e-06, %v71_v32 }
 0x121   :  { %v64_v34 = vpop.xlane.xlu1 %63  ;;  %v67_v35 = vpop.xlane.xlu0 %66 }
 0x122   :  { %395 = vrsqrt.f32 %v75_v33  ;;  %v72_v36 = vmul.f32 0.0625, %v64_v34  ;;  %v73_v37 = vmul.f32 0.0625, %v67_v35 }
 0x124   :  { %v76_v38 = vadd.f32 1e-06, %v72_v36  ;;  %v77_v39 = vadd.f32 1e-06, %v73_v37 }
 0x125   :  { %v70_v40 = vpop.xlane.xlu1 %69 }
 0x126   :  { %397 = vrsqrt.f32 %v76_v38  ;;  %v74_v41 = vmul.f32 0.0625, %v70_v40 }
 0x127   :  { %399 = vrsqrt.f32 %v77_v39 }
 0x128   :  { %v78_v42 = vadd.f32 1e-06, %v74_v41 }
 0x12a   :  { %401 = vrsqrt.f32 %v78_v42 }
 0x12f   :  { %v396_v43 = vpop.eup %395 }
 0x130   :  { %v83_v44 = vmul.f32 %v396_v43, %v51_v12 }
 0x132   :  { %v93_v49 = vmul.f32 %v365_v45, %v83_v44 }
 0x133   :  { %v398_v46 = vpop.eup %397 }
 0x134   :  { %v400_v47 = vpop.eup %399  ;;  %v84_v48 = vmul.f32 %v398_v46, %v52_v20  ;;  %v103_v54 = vadd.f32 %v366_v50, %v93_v49 }
 0x135   :  { %v85_v51 = vmul.f32 %v400_v47, %v53_v13 }
 0x136   :  { %v94_v52 = vmul.f32 %v365_v45, %v84_v48 }
 0x137   :  { %v402_v53 = vpop.eup %401  ;;  %v95_v57 = vmul.f32 %v365_v45, %v85_v51 }
 0x138   :  { %v104_v55 = vadd.f32 %v366_v50, %v94_v52  ;;  %v86_v56 = vmul.f32 %v402_v53, %v54_v21 }
 0x139   :  { %v105_v60 = vadd.f32 %v366_v50, %v95_v57 }
 0x13a   :  { %v107_v58 = vpack.c.bf16 %v104_v55, %v103_v54  ;;  %v96_v59 = vmul.f32 %v365_v45, %v86_v56 }
 0x13c   :  { %382 = vmatprep.mubr.msk.bf16.mxu0 %vm33_vm0, %v107_v58  ;;  %v106_v61 = vadd.f32 %v366_v50, %v96_v59 }
 0x13e   :  { %v108_v62 = vpack.c.bf16 %v106_v61, %v105_v60 }
 0x140   :  { %383 = vmatmul.mubr.msk.bf16.vlgmr.msra.gmra.mxu0 %vm33_vm0, %v108_v62 }
 0x200   :  { %v384_v10 = vpop.f32.mrf.mxu0 }
 0x201   :  { %v525_v11 = vadd.f32 %v384_v10, %v367_v9 }
 0x202   :  { %v159_v12 = vpop.f32.mrf.mxu0 }
 0x203   :  { %v176_v13 = vmul.f32 0.70710677, %v525_v11  ;;  %v528_v14 = vadd.f32 %v367_v9, %v159_v12 }
 0x204   :  { %v385_v15 = vpop.f32.mrf.mxu0 }
 0x205   :  { %vm180_vm1 = vcmp.lt.f32.partialorder %v176_v13, 0.0  ;;  %v174_v16 = vmul.f32 0.70710677, %v528_v14  ;;  %v531_v17 = vadd.f32 %v385_v15, %v367_v9 }
 0x206   :  { %v533_v19 = vsel %vm180_vm1, -1.0, %v419_v18  ;;  %v162_v20 = vpop.f32.mrf.mxu0 }
 0x207   :  { %v188_v21 = vmul.f32 %v533_v19, %v176_v13  ;;  %vm178_vm2 = vcmp.lt.f32.partialorder %v174_v16, 0.0  ;;  %v177_v22 = vmul.f32 0.70710677, %v531_v17  ;;  %v539_v24 = vadd.f32 %v367_v9, %v162_v20 }
 0x208   :  { %v537_v23 = vsel %vm178_vm2, -1.0, %v419_v18 }
 0x209   :  { %v192_v25 = vmul.f32 0.3275911, %v188_v21  ;;  %v186_v26 = vmul.f32 %v537_v23, %v174_v16  ;;  %vm181_vm3 = vcmp.lt.f32.partialorder %v177_v22, 0.0  ;;  %v175_v28 = vmul.f32 0.70710677, %v539_v24 }
 0x20a   :  { %v542_v27 = vsel %vm181_vm3, -1.0, %v419_v18  ;;  %v244_v39 = vsub.f32 0.0, %v188_v21 }
 0x20b   :  { %v196_v29 = vadd.f32 1.0, %v192_v25  ;;  %v190_v30 = vmul.f32 0.3275911, %v186_v26  ;;  %v189_v31 = vmul.f32 %v542_v27, %v177_v22  ;;  %vm179_vm4 = vcmp.lt.f32.partialorder %v175_v28, 0.0 }
 0x20c   :  { %v546_v34 = vsel %vm179_vm4, -1.0, %v419_v18  ;;  %v242_v40 = vsub.f32 0.0, %v186_v26  ;;  %v248_v41 = vmul.f32 %v244_v39, %v188_v21 }
 0x20d   :  { %403 = vrcp.f32 %v196_v29  ;;  %v194_v32 = vadd.f32 1.0, %v190_v30  ;;  %v193_v33 = vmul.f32 0.3275911, %v189_v31  ;;  %v187_v35 = vmul.f32 %v546_v34, %v175_v28 }
 0x20e   :  { %v245_v42 = vsub.f32 0.0, %v189_v31  ;;  %v246_v44 = vmul.f32 %v242_v40, %v186_v26  ;;  %v254_v47 = vmul.f32 1.442695, %v248_v41 }
 0x20f   :  { %405 = vrcp.f32 %v194_v32  ;;  %v197_v36 = vadd.f32 1.0, %v193_v33  ;;  %v191_v37 = vmul.f32 0.3275911, %v187_v35  ;;  %v243_v46 = vsub.f32 0.0, %v187_v35 }
 0x210   :  { %v249_v48 = vmul.f32 %v245_v42, %v189_v31  ;;  %v250_v51 = vmul.f32 1.442695, %v246_v44 }
 0x211   :  { %407 = vrcp.f32 %v197_v36  ;;  %v195_v38 = vadd.f32 1.0, %v191_v37  ;;  %v247_v55 = vmul.f32 %v243_v46, %v187_v35 }
 0x212   :  { %v256_v57 = vmul.f32 1.442695, %v249_v48 }
 0x213   :  { %409 = vrcp.f32 %v195_v38  ;;  %v252_v3 = vmul.f32 1.442695, %v247_v55 }
 0x214   :  { %411 = vpow2.f32 %v254_v47 }
 0x215   :  { %413 = vpow2.f32 %v250_v51 }
 0x216   :  { %415 = vpow2.f32 %v256_v57 }
 0x217   :  { %417 = vpow2.f32 %v252_v3 }
 0x21a   :  { %v404_v43 = vpop.eup %403 }
 0x21b   :  { %v208_v45 = vmul.f32 1.0614054, %v404_v43 }
 0x21c   :  { %v406_v49 = vpop.eup %405 }
 0x21d   :  { %v212_v50 = vadd.f32 -1.4531521, %v208_v45  ;;  %v206_v52 = vmul.f32 1.0614054, %v406_v49 }
 0x21e   :  { %v408_v53 = vpop.eup %407 }
 0x21f   :  { %v216_v54 = vmul.f32 %v404_v43, %v212_v50  ;;  %v209_v56 = vmul.f32 1.0614054, %v408_v53  ;;  %v210_v58 = vadd.f32 -1.4531521, %v206_v52 }
 0x220   :  { %v410_v60 = vpop.eup %409 }
 0x221   :  { %v220_v59 = vadd.f32 1.4214138, %v216_v54  ;;  %v213_v61 = vadd.f32 -1.4531521, %v209_v56  ;;  %v214_v62 = vmul.f32 %v406_v49, %v210_v58  ;;  %v207_v4 = vmul.f32 1.0614054, %v410_v60  ;;  %v412_v31 = vpop.eup %411 }
 0x222   :  { %v414_v37 = vpop.eup %413  ;;  %v273_v58 = vmul.f32 0.5, %v531_v17  ;;  %v370_v17 = vld [vmem:[%s586_s6] ss:$0 sm:$0xff] }
 0x223   :  { %v224_v63 = vmul.f32 %v404_v43, %v220_v59  ;;  %v217_v6 = vmul.f32 %v408_v53, %v213_v61  ;;  %v218_v7 = vadd.f32 1.4214138, %v214_v62  ;;  %v211_v9 = vadd.f32 -1.4531521, %v207_v4  ;;  %v416_v41 = vpop.eup %415 }
 0x224   :  { %v418_v48 = vpop.eup %417  ;;  %v270_v59 = vmul.f32 0.5, %v528_v14  ;;  %v272_v62 = vmul.f32 0.5, %v525_v11 }
 0x225   :  { %v228_v8 = vadd.f32 -0.28449672, %v224_v63  ;;  %v221_v10 = vadd.f32 1.4214138, %v217_v6  ;;  %v222_v12 = vmul.f32 %v406_v49, %v218_v7  ;;  %v215_v15 = vmul.f32 %v410_v60, %v211_v9 }
 0x227   :  { %v232_v13 = vmul.f32 %v404_v43, %v228_v8  ;;  %v225_v16 = vmul.f32 %v408_v53, %v221_v10  ;;  %v226_v18 = vadd.f32 -0.28449672, %v222_v12  ;;  %v219_v21 = vadd.f32 1.4214138, %v215_v15 }
 0x229   :  { %v236_v20 = vadd.f32 0.2548296, %v232_v13  ;;  %v229_v22 = vadd.f32 -0.28449672, %v225_v16  ;;  %v230_v25 = vmul.f32 %v406_v49, %v226_v18  ;;  %v223_v28 = vmul.f32 %v410_v60, %v219_v21 }
 0x22b   :  { %v240_v26 = vmul.f32 %v404_v43, %v236_v20  ;;  %v233_v29 = vmul.f32 %v408_v53, %v229_v22  ;;  %v234_v30 = vadd.f32 0.2548296, %v230_v25  ;;  %v227_v32 = vadd.f32 -0.28449672, %v223_v28 }
 0x22d   :  { %v260_v33 = vmul.f32 %v412_v31, %v240_v26  ;;  %v237_v35 = vadd.f32 0.2548296, %v233_v29  ;;  %v238_v36 = vmul.f32 %v406_v49, %v234_v30  ;;  %v231_v38 = vmul.f32 %v410_v60, %v227_v32 }
 0x22f   :  { %v241_v39 = vmul.f32 %v408_v53, %v237_v35  ;;  %v258_v40 = vmul.f32 %v414_v37, %v238_v36  ;;  %v235_v42 = vadd.f32 0.2548296, %v231_v38  ;;  %v264_v44 = vsub.f32 1.0, %v260_v33 }
 0x231   :  { %v261_v45 = vmul.f32 %v416_v41, %v241_v39  ;;  %v262_v46 = vsub.f32 1.0, %v258_v40  ;;  %v239_v47 = vmul.f32 %v410_v60, %v235_v42  ;;  %v268_v52 = vmul.f32 %v264_v44, %v533_v19 }
 0x232   :  { %v271_v60 = vmul.f32 0.5, %v539_v24 }
 0x233   :  { %v265_v43 = vsub.f32 1.0, %v261_v45  ;;  %v259_v50 = vmul.f32 %v418_v48, %v239_v47  ;;  %v266_v51 = vmul.f32 %v262_v46, %v537_v23  ;;  %v276_v57 = vadd.f32 1.0, %v268_v52 }
 0x235   :  { %v269_v54 = vmul.f32 %v265_v43, %v542_v27  ;;  %v263_v49 = vsub.f32 1.0, %v259_v50  ;;  %v274_v56 = vadd.f32 1.0, %v266_v51  ;;  %v280_v3 = vmul.f32 %v276_v57, %v272_v62 }
 0x237   :  { %v277_v55 = vadd.f32 1.0, %v269_v54  ;;  %v267_v53 = vmul.f32 %v263_v49, %v546_v34  ;;  %v278_v63 = vmul.f32 %v274_v56, %v270_v59 }
 0x239   :  { %v275_v61 = vadd.f32 1.0, %v267_v53  ;;  %v281_v23 = vmul.f32 %v277_v55, %v273_v58 }
 0x23b   :  { %v279_v19 = vmul.f32 %v275_v61, %v271_v60  ;;  %v283_v4 = vpack.c.bf16 %v281_v23, %v280_v3 }
 0x23d   :  { %v282_v27 = vpack.c.bf16 %v279_v19, %v278_v63 }
 0x23f   :  { %390 = vmatprep.mubr.msk.bf16.mxu1 %vm297_vm5, %v282_v27 }
 0x240   :  { %391 = vmatmul.mubr.msk.bf16.vlgmr.msra.gmra.mxu1 %vm297_vm5, %v283_v4 }
 0x300   :  { %v392_v34 = vpop.f32.mrf.mxu1 }
 0x301   :  { %v347_v14 = vadd.f32 %v392_v34, %v370_v17 }
 0x302   :  { %v338_v6 = vpop.f32.mrf.mxu1 }
 0x303   :  { %v355_v24 = vadd.f32 %v347_v14, %v468_v1  ;;  %v339_v7 = vadd.f32 %v370_v17, %v338_v6 }
 0x304   :  { %v393_v11 = vpop.f32.mrf.mxu1 }
 0x305   :  { %359 = vst.msk [vmem:[%s587_s7 + $0x10] sm:$0xff] %vm33_vm0, %v355_v24  ;;  %v353_v8 = vadd.f32 %v339_v7, %v463_v0  ;;  %v350_v9 = vadd.f32 %v393_v11, %v370_v17 }
 0x306   :  { %v341_v10 = vpop.f32.mrf.mxu1 }
 0x307   :  { %357 = vst.msk [vmem:[%s587_s7] sm:$0xff] %vm33_vm0, %v353_v8  ;;  %v356_v12 = vadd.f32 %v350_v9, %v482_v5  ;;  %v342_v13 = vadd.f32 %v370_v17, %v341_v10 }
 0x309   :  { %360 = vst.msk [vmem:[%s587_s7 + $0x18] sm:$0xff] %vm33_vm0, %v356_v12  ;;  %v354_v1 = vadd.f32 %v342_v13, %v473_v2 }
 0x30b   :  { %358 = vst.msk [vmem:[%s587_s7 + $0x8] sm:$0xff] %vm33_vm0, %v354_v1 }

// kernel: forward.16
= control target key start
LH: loop header
LB: loop body
LE: loop exit
PB: predicated region body
PF: predicated region fallthrough
CT: control target
= control target key end

     0   :  { %v107_v0 = vmov 0.0   ;;  %vm108_vm0 = vmmov 0   ;;  %vm36_vm1 = vcmask 523264   ;;  %vm80_vm2 = vcmask 261120   ;;  %s162_s1 = inlined_call_operand.vmem [shape: f32[64,32], index: 1, kind: input, shape index: {}]   ;;  %s163_s0 = inlined_call_operand.vmem [shape: f32[8,64], index: 0, kind: input, shape index: {}]   ;;  %s164_s2 = inlined_call_operand.vmem [shape: f32[1,32], index: 2, kind: input, shape index: {}]   ;;  %s165_s3 = inlined_call_operand.vmem [shape: f32[8,32], index: 3, kind: output, shape index: {}]  }
   0x1   :  { %93 = vmatprep.subr.bf16.mxu0 %v107_v0  ;;  %v23_v1 = vld [vmem:[%s162_s1 + $0x30] sm:$0xff]  ;;  %v24_v2 = vld [vmem:[%s162_s1 + $0x38] sm:$0xff]  ;;  %v21_v3 = vld [vmem:[%s162_s1 + $0x20] sm:$0xff]  ;;  %101 = vmatprep.mubr.msk.bf16.mxu0 %vm108_vm0, %v107_v0 }
   0x2   :  { %v28_v4 = vpack.c.bf16 %v24_v2, %v23_v1  ;;  %v22_v5 = vld [vmem:[%s162_s1 + $0x28] sm:$0xff]  ;;  %v19_v7 = vld [vmem:[%s162_s1 + $0x10] sm:$0xff]  ;;  %v20_v8 = vld [vmem:[%s162_s1 + $0x18] sm:$0xff] }
   0x3   :  { %v27_v6 = vpack.c.bf16 %v22_v5, %v21_v3  ;;  %v26_v9 = vpack.c.bf16 %v20_v8, %v19_v7  ;;  %v17_v10 = vld [vmem:[%s162_s1] sm:$0xff]  ;;  %v18_v11 = vld [vmem:[%s162_s1 + $0x8] sm:$0xff] }
   0x4   :  { %94 = vmatpush3.bf16.msra.mxu0 %v28_v4  ;;  %v25_v12 = vpack.c.bf16 %v18_v11, %v17_v10  ;;  %v15_v13 = vld [vmem:[%s163_s0] sm:$0xff] }
   0x5   :  { %95 = vmatprep.subr.bf16.mxu0 %v107_v0  ;;  %v16_v14 = vpack.c.bf16 %v15_v13, %v15_v13  ;;  %v86_v15 = vld [vmem:[%s164_s2] ss:$0 sm:$0xff] }
   0x8   :  { %96 = vmatpush3.bf16.msra.mxu0 %v27_v6 }
   0x9   :  { %97 = vmatprep.subr.bf16.mxu0 %v107_v0 }
   0xc   :  { %98 = vmatpush3.bf16.msra.mxu0 %v26_v9 }
   0xd   :  { %99 = vmatprep.subr.bf16.mxu0 %v107_v0 }
  0x10   :  { %100 = vmatpush3.bf16.msra.mxu0 %v25_v12 }
  0x13   :  { %102 = vmatmul.mubr.msk.bf16.vlgmr.msra.gmra.mxu0 %vm36_vm1, %v16_v14 }
  0xd3   :  { %v74_v16 = vpop.f32.mrf.mxu0 }
  0xd4   :  { %v75_v17 = vadd.f32 %v86_v15, %v74_v16 }
  0xd5   :  { %v103_v18 = vpop.f32.mrf.mxu0 }
  0xd6   :  { %81 = vst.msk [vmem:[%s165_s3] sm:$0xff] %vm80_vm2, %v75_v17 }
  0xd7   :  { %v77_v19 = vpop.f32.mrf.mxu0 }
  0xd9   :  { %v104_v20 = vpop.f32.mrf.mxu0 }

// kernel: forward.18
= control target key start
LH: loop header
LB: loop body
LE: loop exit
PB: predicated region body
PF: predicated region fallthrough
CT: control target
= control target key end

     0   :  { %s687_s18 = smov 0   ;;  %s689_s19 = smov 0   ;;  %s753_s0 = inlined_call_operand.vmem [shape: f32[2,2,2,32], index: 0, kind: input, shape index: {}]   ;;  %s754_s1 = inlined_call_operand.vmem [shape: f32[1,1,32], index: 1, kind: input, shape index: {}]   ;;  %s755_s2 = inlined_call_operand.vmem [shape: f32[1,1,32], index: 2, kind: input, shape index: {}]   ;;  %s756_s3 = inlined_call_operand.vmem [shape: f32[32,64], index: 3, kind: input, shape index: {}]   ;;  %s757_s4 = inlined_call_operand.vmem [shape: f32[1,64], index: 4, kind: input, shape index: {}]   ;;  %s758_s5 = inlined_call_operand.vmem [shape: f32[2,2,128], index: 5, kind: output, shape index: {}]  }
   0x1   :  { %s691_s20 = smov 0  }
   0x2 LB: > { %s27_s21 = sadd.s32 1, %s646_s19  ;;  %p551_p0 = scmp.ge.s32.totalorder %s650_s20, 1  ;;  %s650_s20 = sphi %s691_s20, %s15_s20   ;;  %s646_s19 = sphi %s689_s19, %s760_s19   ;;  %s642_s18 = sphi %s687_s18, %s759_s18  }
   0x3   : > { %p29_p1 = scmp.ge.s32.totalorder %s27_s21, 2  ;;  %p208_p2 = scmp.lt.s32.totalorder %s650_s20, 3 }
   0x5   : > { %s762_s21 = smov (%p29_p1, %s27_s21), 0  ;;  %p209_p3 = pnand %p551_p0, %p208_p2 }
   0x6   : > { %p243_p4 = scmp.lt.s32.totalorder (!%p209_p3), %s642_s18, 1  ;;  %s654_s15 = smov (!%p209_p3), 96  }
   0x7   : > { %212 = sbr.rel (%p209_p3) target bundleno = 882 (0x372), region = 40  ;;  %s655_s16 = smov (!%p209_p3), 32  }
   0x8   : > { %s656_s17 = smov (!%p209_p3), 64  }
   0xc   : > { %s764_s18 = smov (!%p243_p4, %s642_s18), 1  ;;  %vm264_vm0 = vcmask 254976   ;;  %v310_v14 = vld [vmem:[%s756_s3 + $0x10] sm:$0xff]  ;;  %v311_v15 = vld [vmem:[%s756_s3 + $0x18] sm:$0xff]  ;;  %v308_v16 = vld [vmem:[%s756_s3] sm:$0xff]  ;;  %v652_v17 = vmov 0.0  }
   0xd   : > { %s564_s22 = sshll.u32 %s764_s18, 2  ;;  %579 = vmatprep.subr.bf16.mxu1 %v652_v17  ;;  %v313_v18 = vpack.c.bf16 %v311_v15, %v310_v14  ;;  %571 = vmatprep.subr.bf16.mxu0 %v652_v17  ;;  %v309_v19 = vld [vmem:[%s756_s3 + $0x8] sm:$0xff]  ;;  %vm653_vm1 = vmmov 0   ;;  %v555_v28 = vld [vmem:[%s754_s1] ss:$0 sm:$0xff]  ;;  %vm328_vm2 = vcmask 1041409  }
   0xe   : > { %s250_s25 = scalar_lea.vmem %s753_s0, %s564_s22  ;;  %583 = vmatprep.mubr.msk.bf16.mxu1 %vm653_vm1, %v652_v17  ;;  %575 = vmatprep.mubr.msk.bf16.mxu0 %vm653_vm1, %v652_v17  ;;  %v312_v20 = vpack.c.bf16 %v309_v19, %v308_v16  ;;  %v556_v30 = vld [vmem:[%s755_s2] ss:$0 sm:$0xff]  ;;  %vm331_vm3 = vcmask 261120   ;;  %s554_s22 = sshll.u32 %s764_s18, 1  ;;  %vm467_vm4 = vcmask 523264  }
   0xf   : > { %v260_v0 = vld [vmem:[%s250_s25] sm:$0x3]  ;;  %v261_v1 = vld [vmem:[%s250_s25 + $0x2] sm:$0x3]  ;;  %580 = vmatpush3.bf16.msra.mxu1 %v313_v18  ;;  %572 = vmatpush3.bf16.msra.mxu0 %v313_v18  ;;  %s258_s25 = scalar_lea.vmem %s758_s5, %s554_s22 }
  0x10   : > { %v265_v2 = vsel %vm264_vm0, %v260_v0, 0.0  ;;  %v268_v3 = vsel %vm264_vm0, %v261_v1, 0.0  ;;  %581 = vmatprep.subr.bf16.mxu1 %v652_v17  ;;  %573 = vmatprep.subr.bf16.mxu0 %v652_v17  ;;  %v557_v47 = vld [vmem:[%s757_s4] ss:$0 sm:$0xff] }
  0x11   : > { %266 = vadd.xlane.f32.xlu0 %v265_v2 }
  0x13   : > { %582 = vmatpush3.bf16.msra.mxu1 %v312_v20  ;;  %574 = vmatpush3.bf16.msra.mxu0 %v312_v20 }
  0x15   : > { %269 = vadd.xlane.f32.xlu0 %v268_v3 }
  0x9a   : > { %v267_v4 = vpop.xlane.xlu0 %266 }
  0x9b   : > { %v272_v5 = vmul.f32 0.03125, %v267_v4 }
  0x9d   : > { %v274_v6 = vsub.f32 %v260_v0, %v272_v5 }
  0x9e   : > { %v270_v7 = vpop.xlane.xlu0 %269 }
  0x9f   : > { %v273_v8 = vmul.f32 0.03125, %v270_v7  ;;  %v276_v9 = vmul.f32 %v274_v6, %v274_v6 }
  0xa1   : > { %v275_v10 = vsub.f32 %v261_v1, %v273_v8  ;;  %v278_v11 = vsel %vm264_vm0, %v276_v9, 0.0 }
  0xa2   : > { %279 = vadd.xlane.f32.xlu1 %v278_v11 }
  0xa3   : > { %v277_v12 = vmul.f32 %v275_v10, %v275_v10 }
  0xa5   : > { %v281_v13 = vsel %vm264_vm0, %v277_v12, 0.0 }
  0xa6   : > { %282 = vadd.xlane.f32.xlu1 %v281_v13 }
 0x12b   : > { %v280_v21 = vpop.xlane.xlu1 %279 }
 0x12c   : > { %v284_v22 = vmul.f32 0.03125, %v280_v21 }
 0x12e   : > { %v286_v23 = vadd.f32 1e-06, %v284_v22 }
 0x12f   : > { %v283_v24 = vpop.xlane.xlu1 %282 }
 0x130   : > { %616 = vrsqrt.f32 %v286_v23  ;;  %v285_v25 = vmul.f32 0.03125, %v283_v24 }
 0x132   : > { %v287_v26 = vadd.f32 1e-06, %v285_v25 }
 0x134   : > { %618 = vrsqrt.f32 %v287_v26 }
 0x13d   : > { %v617_v27 = vpop.eup %616 }
 0x13e   : > { %v290_v29 = vmul.f32 %v617_v27, %v274_v6 }
 0x140   : > { %v298_v31 = vmul.f32 %v555_v28, %v290_v29 }
 0x141   : > { %v619_v32 = vpop.eup %618 }
 0x142   : > { %v291_v33 = vmul.f32 %v619_v32, %v275_v10  ;;  %v306_v34 = vadd.f32 %v556_v30, %v298_v31 }
 0x144   : > { %v299_v35 = vmul.f32 %v555_v28, %v291_v33  ;;  %v315_v36 = vpack.c.bf16 %v306_v34, %v306_v34 }
 0x146   : > { %v307_v37 = vadd.f32 %v556_v30, %v299_v35  ;;  %v325_v38 = vunpack.c.l.b16 %v315_v36 }
 0x148   : > { %v316_v39 = vpack.c.bf16 %v307_v37, %v307_v37  ;;  %v381_v41 = vrot.slane %v325_v38, 1 }
 0x14a   : > { %v326_v40 = vunpack.c.l.b16 %v316_v39 }
 0x14c   : > { %v382_v42 = vsel %vm328_vm2, %v326_v40, %v381_v41  ;;  %v327_v43 = vrot.slane %v326_v40, 7 }
 0x14d   : > { %v383_v44 = vpack.c.b16 %v382_v42, %v382_v42 }
 0x14e   : > { %v329_v45 = vsel %vm328_vm2, %v327_v43, %v325_v38 }
 0x14f   : > { %584 = vmatmul.mubr.msk.bf16.vlgmr.msra.gmra.mxu1 %vm331_vm3, %v383_v44  ;;  %v330_v46 = vpack.c.b16 %v329_v45, %v329_v45 }
 0x151   : > { %576 = vmatmul.mubr.msk.bf16.vlgmr.msra.gmra.mxu0 %vm331_vm3, %v330_v46 }
 0x20f   : > { %v421_v48 = vpop.f32.mrf.mxu1 }
 0x210   : > { %v422_v49 = vadd.f32 %v557_v47, %v421_v48 }
 0x211   : > { %v369_v50 = vpop.f32.mrf.mxu0  ;;  %v585_v51 = vpop.f32.mrf.mxu1 }
 0x212   : > { %v370_v52 = vadd.f32 %v557_v47, %v369_v50  ;;  %444 = vrot.lane.b32.xlu0 %v422_v49, %s654_s15  ;;  %v561_v58 = vmul.f32 -1.442695, %v422_v49 }
 0x213   : > { %v577_v53 = vpop.f32.mrf.mxu0  ;;  %v424_v54 = vpop.f32.mrf.mxu1 }
 0x214   : > { %436 = vrot.lane.b32.xlu1 %v370_v52, %s654_s15  ;;  %620 = vpow2.f32 %v561_v58  ;;  %v559_v59 = vmul.f32 -1.442695, %v370_v52 }
 0x215   : > { %v372_v55 = vpop.f32.mrf.mxu0  ;;  %v586_v56 = vpop.f32.mrf.mxu1 }
 0x216   : > { %622 = vpow2.f32 %v559_v59 }
 0x217   : > { %v578_v57 = vpop.f32.mrf.mxu0 }
 0x221   : > { %v621_v60 = vpop.eup %620 }
 0x222   : > { %v430_v61 = vadd.f32 1.0, %v621_v60 }
 0x223   : > { %v623_v62 = vpop.eup %622 }
 0x224   : > { %624 = vrcp.f32 %v430_v61  ;;  %v378_v63 = vadd.f32 1.0, %v623_v62 }
 0x226   : > { %626 = vrcp.f32 %v378_v63 }
 0x231   : > { %v625_v0 = vpop.eup %624 }
 0x232   : > { %v442_v1 = vsub.f32 1.0, %v625_v0  ;;  %v441_v4 = vmul.f32 0.0, %v625_v0 }
 0x233   : > { %v627_v2 = vpop.eup %626 }
 0x234   : > { %v434_v8 = vsub.f32 1.0, %v627_v2  ;;  %v433_v12 = vmul.f32 0.0, %v627_v2 }
 0x284   : > { %v445_v3 = vpop.permute.xlu0 %444 }
 0x285   : > { %v447_v5 = vmul.f32 %v445_v3, %v442_v1 }
 0x286   : > { %v437_v6 = vpop.permute.xlu1 %436 }
 0x287   : > { %v448_v7 = vadd.f32 %v447_v5, %v441_v4  ;;  %v439_v9 = vmul.f32 %v437_v6, %v434_v8 }
 0x289   : > { %v451_v10 = vmul.f32 %v627_v2, %v448_v7  ;;  %459 = vrot.lane.b32.xlu1 %v448_v7, %s655_s16  ;;  %v440_v13 = vadd.f32 %v439_v9, %v433_v12 }
 0x28b   : > { %v452_v11 = vadd.f32 %v451_v10, %v439_v9  ;;  %v449_v14 = vmul.f32 %v625_v0, %v440_v13 }
 0x28d   : > { %454 = vrot.lane.b32.xlu1 %v452_v11, %s655_s16  ;;  %v450_v15 = vadd.f32 %v449_v14, %v447_v5 }
 0x2fb   : > { %v460_v16 = vpop.permute.xlu1 %459 }
 0x2fc   : > { %v462_v17 = vsel %vm331_vm3, %v450_v15, %v460_v16 }
 0x2fd   : > { %464 = vrot.lane.b32.xlu0 %v462_v17, %s656_s17 }
 0x2ff   : > { %v455_v18 = vpop.permute.xlu1 %454 }
 0x300   : > { %v457_v19 = vsel %vm331_vm3, %v440_v13, %v455_v18 }
 0x36f   : > { %v465_v20 = vpop.permute.xlu0 %464 }
 0x370   : > { %v468_v21 = vsel %vm467_vm4, %v457_v19, %v465_v20 }
 0x371   : > { %469 = vst [vmem:[%s258_s25] sm:$0x3] %v468_v21 }
 0x372 PF: > { %s15_s20 = sadd.s32 1, %s650_s20   ;;  %s759_s18 = smov %s646_s19 }
 0x373   : > { %p12_p5 = scmp.ge.s32.totalorder %s15_s20, 4   ;;  %s760_s19 = smov %s762_s21 }
 0x375   :  { %14 = sbr.rel (!%p12_p5) target bundleno = 2 (0x2), region = 70 }

// kernel: forward.19
= control target key start
LH: loop header
LB: loop body
LE: loop exit
PB: predicated region body
PF: predicated region fallthrough
CT: control target
= control target key end

     0   :  { %v194_v0 = vmov 0.0   ;;  %vm195_vm0 = vmmov 0   ;;  %vm52_vm1 = vcmask 523264   ;;  %vm149_vm2 = vcmask 261120   ;;  %s294_s4 = inlined_call_operand.vmem [shape: f32[64,32], index: 4, kind: input, shape index: {}]   ;;  %s295_s3 = inlined_call_operand.vmem [shape: f32[64,32], index: 3, kind: input, shape index: {}]   ;;  %s296_s1 = inlined_call_operand.vmem [shape: f32[8,64], index: 1, kind: input, shape index: {}]   ;;  %s297_s0 = inlined_call_operand.vmem [shape: f32[8,64], index: 0, kind: input, shape index: {}]   ;;  %s298_s5 = inlined_call_operand.vmem [shape: f32[1,32], index: 5, kind: input, shape index: {}]   ;;  %s299_s2 = inlined_call_operand.vmem [shape: f32[8,32], index: 2, kind: input, shape index: {}]   ;;  %s300_s6 = inlined_call_operand.vmem [shape: f32[8,32], index: 6, kind: output, shape index: {}]  }
   0x1   :  { %168 = vmatprep.subr.bf16.mxu0 %v194_v0  ;;  %180 = vmatprep.subr.bf16.mxu1 %v194_v0  ;;  %v46_v1 = vld [vmem:[%s294_s4 + $0x30] sm:$0xff]  ;;  %v47_v2 = vld [vmem:[%s294_s4 + $0x38] sm:$0xff]  ;;  %v44_v6 = vld [vmem:[%s294_s4 + $0x20] sm:$0xff] }
   0x2   :  { %v32_v3 = vld [vmem:[%s295_s3 + $0x30] sm:$0xff]  ;;  %v51_v4 = vpack.c.bf16 %v47_v2, %v46_v1  ;;  %v33_v5 = vld [vmem:[%s295_s3 + $0x38] sm:$0xff]  ;;  %v45_v7 = vld [vmem:[%s294_s4 + $0x28] sm:$0xff]  ;;  %176 = vmatprep.mubr.msk.bf16.mxu0 %vm195_vm0, %v194_v0  ;;  %188 = vmatprep.mubr.msk.bf16.mxu1 %vm195_vm0, %v194_v0 }
   0x3   :  { %v37_v8 = vpack.c.bf16 %v33_v5, %v32_v3  ;;  %v30_v9 = vld [vmem:[%s295_s3 + $0x20] sm:$0xff]  ;;  %v31_v10 = vld [vmem:[%s295_s3 + $0x28] sm:$0xff]  ;;  %v50_v11 = vpack.c.bf16 %v45_v7, %v44_v6  ;;  %v42_v13 = vld [vmem:[%s294_s4 + $0x10] sm:$0xff] }
   0x4   :  { %169 = vmatpush3.bf16.msra.mxu0 %v51_v4  ;;  %v36_v12 = vpack.c.bf16 %v31_v10, %v30_v9  ;;  %v43_v14 = vld [vmem:[%s294_s4 + $0x18] sm:$0xff]  ;;  %v28_v15 = vld [vmem:[%s295_s3 + $0x10] sm:$0xff]  ;;  %v40_v19 = vld [vmem:[%s294_s4] sm:$0xff] }
   0x5   :  { %181 = vmatpush3.bf16.msra.mxu1 %v37_v8  ;;  %170 = vmatprep.subr.bf16.mxu0 %v194_v0  ;;  %v29_v16 = vld [vmem:[%s295_s3 + $0x18] sm:$0xff]  ;;  %v49_v17 = vpack.c.bf16 %v43_v14, %v42_v13  ;;  %v41_v20 = vld [vmem:[%s294_s4 + $0x8] sm:$0xff]  ;;  %v26_v21 = vld [vmem:[%s295_s3] sm:$0xff] }
   0x6   :  { %182 = vmatprep.subr.bf16.mxu1 %v194_v0  ;;  %v35_v18 = vpack.c.bf16 %v29_v16, %v28_v15  ;;  %v27_v22 = vld [vmem:[%s295_s3 + $0x8] sm:$0xff]  ;;  %v48_v23 = vpack.c.bf16 %v41_v20, %v40_v19  ;;  %v38_v24 = vld [vmem:[%s296_s1] sm:$0xff] }
   0x7   :  { %v34_v25 = vpack.c.bf16 %v27_v22, %v26_v21  ;;  %v24_v26 = vld [vmem:[%s297_s0] sm:$0xff]  ;;  %v39_v27 = vpack.c.bf16 %v38_v24, %v38_v24 }
   0x8   :  { %171 = vmatpush3.bf16.msra.mxu0 %v50_v11  ;;  %v25_v28 = vpack.c.bf16 %v24_v26, %v24_v26  ;;  %v157_v31 = vld [vmem:[%s298_s5] ss:$0 sm:$0xff] }
   0x9   :  { %183 = vmatpush3.bf16.msra.mxu1 %v36_v12  ;;  %172 = vmatprep.subr.bf16.mxu0 %v194_v0  ;;  %v147_v34 = vld [vmem:[%s299_s2] sm:$0xff] }
   0xa   :  { %184 = vmatprep.subr.bf16.mxu1 %v194_v0 }
   0xc   :  { %173 = vmatpush3.bf16.msra.mxu0 %v49_v17 }
   0xd   :  { %185 = vmatpush3.bf16.msra.mxu1 %v35_v18  ;;  %174 = vmatprep.subr.bf16.mxu0 %v194_v0 }
   0xe   :  { %186 = vmatprep.subr.bf16.mxu1 %v194_v0 }
  0x10   :  { %175 = vmatpush3.bf16.msra.mxu0 %v48_v23 }
  0x11   :  { %187 = vmatpush3.bf16.msra.mxu1 %v34_v25 }
  0x13   :  { %177 = vmatmul.mubr.msk.bf16.vlgmr.msra.gmra.mxu0 %vm52_vm1, %v39_v27 }
  0x14   :  { %189 = vmatmul.mubr.msk.bf16.vlgmr.msra.gmra.mxu1 %vm52_vm1, %v25_v28 }
  0xd3   :  { %v90_v29 = vpop.f32.mrf.mxu0 }
  0xd4   :  { %v133_v30 = vpop.f32.mrf.mxu1 }
  0xd5   :  { %v134_v32 = vadd.f32 %v133_v30, %v90_v29  ;;  %v178_v33 = vpop.f32.mrf.mxu0 }
  0xd6   :  { %v190_v35 = vpop.f32.mrf.mxu1 }
  0xd7   :  { %v146_v36 = vadd.f32 %v157_v31, %v134_v32  ;;  %v93_v37 = vpop.f32.mrf.mxu0 }
  0xd8   :  { %v136_v38 = vpop.f32.mrf.mxu1 }
  0xd9   :  { %v148_v39 = vadd.f32 %v147_v34, %v146_v36  ;;  %v179_v40 = vpop.f32.mrf.mxu0 }
  0xda   :  { %v191_v41 = vpop.f32.mrf.mxu1 }
  0xdb   :  { %150 = vst.msk [vmem:[%s300_s6] sm:$0xff] %vm149_vm2, %v148_v39 }

// kernel: forward.17
= control target key start
LH: loop header
LB: loop body
LE: loop exit
PB: predicated region body
PF: predicated region fallthrough
CT: control target
= control target key end

     0   :  { %s675_s18 = smov 0   ;;  %s677_s19 = smov 0   ;;  %s744_s0 = inlined_call_operand.vmem [shape: f32[2,2,2,32], index: 0, kind: input, shape index: {}]   ;;  %s745_s1 = inlined_call_operand.vmem [shape: f32[1,1,32], index: 1, kind: input, shape index: {}]   ;;  %s746_s2 = inlined_call_operand.vmem [shape: f32[1,1,32], index: 2, kind: input, shape index: {}]   ;;  %s747_s3 = inlined_call_operand.vmem [shape: f32[32,64], index: 3, kind: input, shape index: {}]   ;;  %s748_s4 = inlined_call_operand.vmem [shape: f32[1,64], index: 4, kind: input, shape index: {}]   ;;  %s749_s5 = inlined_call_operand.vmem [shape: f32[2,2,2,64], index: 5, kind: output, shape index: {}]  }
   0x1   :  { %s679_s20 = smov 0  }
   0x2 LB: > { %s27_s21 = sadd.s32 1, %s635_s19  ;;  %p539_p0 = scmp.ge.s32.totalorder %s639_s20, 1  ;;  %s639_s20 = sphi %s679_s20, %s15_s20   ;;  %s635_s19 = sphi %s677_s19, %s751_s19   ;;  %s631_s18 = sphi %s675_s18, %s750_s18  }
   0x3   : > { %p29_p1 = scmp.ge.s32.totalorder %s27_s21, 2  ;;  %p206_p2 = scmp.lt.s32.totalorder %s639_s20, 3 }
   0x5   : > { %s753_s21 = smov (%p29_p1, %s27_s21), 0  ;;  %p207_p3 = pnand %p539_p0, %p206_p2 }
   0x6   : > { %p240_p4 = scmp.lt.s32.totalorder (!%p207_p3), %s631_s18, 1  ;;  %s643_s15 = smov (!%p207_p3), 96  }
   0x7   : > { %210 = sbr.rel (%p207_p3) target bundleno = 765 (0x2fd), region = 40  ;;  %s644_s16 = smov (!%p207_p3), 32  }
   0xc   : > { %s755_s18 = smov (!%p240_p4, %s631_s18), 1  ;;  %vm261_vm0 = vcmask 254976   ;;  %v307_v14 = vld [vmem:[%s747_s3 + $0x10] sm:$0xff]  ;;  %v308_v15 = vld [vmem:[%s747_s3 + $0x18] sm:$0xff]  ;;  %v305_v16 = vld [vmem:[%s747_s3] sm:$0xff]  ;;  %v641_v17 = vmov 0.0  }
   0xd   : > { %s553_s22 = sshll.u32 %s755_s18, 2  ;;  %569 = vmatprep.subr.bf16.mxu1 %v641_v17  ;;  %v310_v18 = vpack.c.bf16 %v308_v15, %v307_v14  ;;  %561 = vmatprep.subr.bf16.mxu0 %v641_v17  ;;  %v306_v19 = vld [vmem:[%s747_s3 + $0x8] sm:$0xff]  ;;  %vm642_vm1 = vmmov 0   ;;  %v544_v28 = vld [vmem:[%s745_s1] ss:$0 sm:$0xff]  ;;  %vm319_vm2 = vcmask 261120  }
   0xe   : > { %s247_s25 = scalar_lea.vmem %s744_s0, %s553_s22  ;;  %573 = vmatprep.mubr.msk.bf16.mxu1 %vm642_vm1, %v641_v17  ;;  %565 = vmatprep.mubr.msk.bf16.mxu0 %vm642_vm1, %v641_v17  ;;  %v309_v20 = vpack.c.bf16 %v306_v19, %v305_v16  ;;  %v545_v30 = vld [vmem:[%s746_s2] ss:$0 sm:$0xff]  ;;  %s255_s24 = scalar_lea.vmem %s749_s5, %s553_s22  ;;  %vm449_vm3 = vcmask 517120  }
   0xf   : > { %v258_v0 = vld [vmem:[%s247_s25 + $0x2] sm:$0x3]  ;;  %v257_v1 = vld [vmem:[%s247_s25] sm:$0x3]  ;;  %570 = vmatpush3.bf16.msra.mxu1 %v310_v18  ;;  %562 = vmatpush3.bf16.msra.mxu0 %v310_v18 }
  0x10   : > { %v265_v2 = vsel %vm261_vm0, %v258_v0, 0.0  ;;  %v262_v3 = vsel %vm261_vm0, %v257_v1, 0.0  ;;  %571 = vmatprep.subr.bf16.mxu1 %v641_v17  ;;  %563 = vmatprep.subr.bf16.mxu0 %v641_v17  ;;  %v546_v39 = vld [vmem:[%s748_s4] ss:$0 sm:$0xff] }
  0x11   : > { %266 = vadd.xlane.f32.xlu0 %v265_v2 }
  0x13   : > { %572 = vmatpush3.bf16.msra.mxu1 %v309_v20  ;;  %564 = vmatpush3.bf16.msra.mxu0 %v309_v20 }
  0x15   : > { %263 = vadd.xlane.f32.xlu0 %v262_v3 }
  0x9a   : > { %v267_v4 = vpop.xlane.xlu0 %266 }
  0x9b   : > { %v270_v5 = vmul.f32 0.03125, %v267_v4 }
  0x9d   : > { %v272_v6 = vsub.f32 %v258_v0, %v270_v5 }
  0x9e   : > { %v264_v7 = vpop.xlane.xlu0 %263 }
  0x9f   : > { %v269_v8 = vmul.f32 0.03125, %v264_v7  ;;  %v274_v9 = vmul.f32 %v272_v6, %v272_v6 }
  0xa1   : > { %v271_v10 = vsub.f32 %v257_v1, %v269_v8  ;;  %v278_v11 = vsel %vm261_vm0, %v274_v9, 0.0 }
  0xa2   : > { %279 = vadd.xlane.f32.xlu1 %v278_v11 }
  0xa3   : > { %v273_v12 = vmul.f32 %v271_v10, %v271_v10 }
  0xa5   : > { %v275_v13 = vsel %vm261_vm0, %v273_v12, 0.0 }
  0xa6   : > { %276 = vadd.xlane.f32.xlu1 %v275_v13 }
 0x12b   : > { %v280_v21 = vpop.xlane.xlu1 %279 }
 0x12c   : > { %v282_v22 = vmul.f32 0.03125, %v280_v21 }
 0x12e   : > { %v284_v23 = vadd.f32 1e-06, %v282_v22 }
 0x12f   : > { %v277_v24 = vpop.xlane.xlu1 %276 }
 0x130   : > { %605 = vrsqrt.f32 %v284_v23  ;;  %v281_v25 = vmul.f32 0.03125, %v277_v24 }
 0x132   : > { %v283_v26 = vadd.f32 1e-06, %v281_v25 }
 0x134   : > { %607 = vrsqrt.f32 %v283_v26 }
 0x13d   : > { %v606_v27 = vpop.eup %605 }
 0x13e   : > { %v288_v29 = vmul.f32 %v606_v27, %v272_v6 }
 0x140   : > { %v296_v31 = vmul.f32 %v544_v28, %v288_v29 }
 0x141   : > { %v608_v32 = vpop.eup %607 }
 0x142   : > { %v304_v33 = vadd.f32 %v545_v30, %v296_v31  ;;  %v287_v34 = vmul.f32 %v608_v32, %v271_v10 }
 0x144   : > { %v369_v35 = vpack.c.bf16 %v304_v33, %v304_v33  ;;  %v295_v36 = vmul.f32 %v544_v28, %v287_v34 }
 0x146   : > { %574 = vmatmul.mubr.msk.bf16.vlgmr.msra.gmra.mxu1 %vm319_vm2, %v369_v35  ;;  %v303_v37 = vadd.f32 %v545_v30, %v295_v36 }
 0x148   : > { %v312_v38 = vpack.c.bf16 %v303_v37, %v303_v37 }
 0x14a   : > { %566 = vmatmul.mubr.msk.bf16.vlgmr.msra.gmra.mxu0 %vm319_vm2, %v312_v38 }
 0x206   : > { %v407_v40 = vpop.f32.mrf.mxu1 }
 0x207   : > { %v408_v41 = vadd.f32 %v546_v39, %v407_v40 }
 0x208   : > { %v575_v42 = vpop.f32.mrf.mxu1 }
 0x209   : > { %430 = vrot.lane.b32.xlu0 %v408_v41, %s643_s15  ;;  %v550_v50 = vmul.f32 -1.442695, %v408_v41 }
 0x20a   : > { %v357_v43 = vpop.f32.mrf.mxu0  ;;  %v410_v44 = vpop.f32.mrf.mxu1 }
 0x20b   : > { %v358_v45 = vadd.f32 %v546_v39, %v357_v43  ;;  %609 = vpow2.f32 %v550_v50 }
 0x20c   : > { %v567_v46 = vpop.f32.mrf.mxu0  ;;  %v576_v47 = vpop.f32.mrf.mxu1 }
 0x20d   : > { %422 = vrot.lane.b32.xlu1 %v358_v45, %s643_s15  ;;  %v548_v51 = vmul.f32 -1.442695, %v358_v45 }
 0x20e   : > { %v360_v48 = vpop.f32.mrf.mxu0 }
 0x20f   : > { %611 = vpow2.f32 %v548_v51 }
 0x210   : > { %v568_v49 = vpop.f32.mrf.mxu0 }
 0x218   : > { %v610_v52 = vpop.eup %609 }
 0x219   : > { %v416_v53 = vadd.f32 1.0, %v610_v52 }
 0x21b   : > { %613 = vrcp.f32 %v416_v53 }
 0x21c   : > { %v612_v54 = vpop.eup %611 }
 0x21d   : > { %v366_v55 = vadd.f32 1.0, %v612_v54 }
 0x21f   : > { %615 = vrcp.f32 %v366_v55 }
 0x228   : > { %v614_v56 = vpop.eup %613 }
 0x229   : > { %v428_v57 = vsub.f32 1.0, %v614_v56  ;;  %v427_v60 = vmul.f32 0.0, %v614_v56 }
 0x22c   : > { %v616_v58 = vpop.eup %615 }
 0x22d   : > { %v420_v63 = vsub.f32 1.0, %v616_v58  ;;  %v419_v1 = vmul.f32 0.0, %v616_v58 }
 0x27b   : > { %v431_v59 = vpop.permute.xlu0 %430 }
 0x27c   : > { %v433_v61 = vmul.f32 %v431_v59, %v428_v57 }
 0x27e   : > { %v434_v62 = vadd.f32 %v433_v61, %v427_v60 }
 0x27f   : > { %v423_v0 = vpop.permute.xlu1 %422 }
 0x280   : > { %v425_v2 = vmul.f32 %v423_v0, %v420_v63  ;;  %v437_v3 = vmul.f32 %v616_v58, %v434_v62 }
 0x282   : > { %v426_v4 = vadd.f32 %v425_v2, %v419_v1  ;;  %v438_v5 = vadd.f32 %v437_v3, %v425_v2 }
 0x284   : > { %v435_v6 = vmul.f32 %v614_v56, %v426_v4  ;;  %440 = vrot.lane.b32.xlu1 %v438_v5, %s644_s16 }
 0x286   : > { %v436_v7 = vadd.f32 %v435_v6, %v433_v61 }
 0x288   : > { %445 = vrot.lane.b32.xlu1 %v434_v62, %s644_s16 }
 0x2f6   : > { %v441_v8 = vpop.permute.xlu1 %440 }
 0x2f7   : > { %v443_v9 = vsel %vm319_vm2, %v426_v4, %v441_v8 }
 0x2f8   : > { %450 = vst.msk [vmem:[%s255_s24] sm:$0x3] %vm449_vm3, %v443_v9 }
 0x2fa   : > { %v446_v10 = vpop.permute.xlu1 %445 }
 0x2fb   : > { %v448_v11 = vsel %vm319_vm2, %v436_v7, %v446_v10 }
 0x2fc   : > { %451 = vst.msk [vmem:[%s255_s24 + $0x2] sm:$0x3] %vm449_vm3, %v448_v11 }
 0x2fd PF: > { %s15_s20 = sadd.s32 1, %s639_s20   ;;  %s750_s18 = smov %s635_s19 }
 0x2fe   : > { %p12_p5 = scmp.ge.s32.totalorder %s15_s20, 4   ;;  %s751_s19 = smov %s753_s21 }
 0x300   :  { %14 = sbr.rel (!%p12_p5) target bundleno = 2 (0x2), region = 70 }

// kernel: forward.20
= control target key start
LH: loop header
LB: loop body
LE: loop exit
PB: predicated region body
PF: predicated region fallthrough
CT: control target
= control target key end

     0   :  { %vm30_vm0 = vcmask 261120   ;;  %v256_v7 = vmov 0.0   ;;  %vm257_vm1 = vmmov 0   ;;  %v258_v42 = vmov 1.0   ;;  %s362_s0 = inlined_call_operand.vmem [shape: f32[8,32], index: 0, kind: input, shape index: {}]   ;;  %s363_s3 = inlined_call_operand.vmem [shape: f32[32,64], index: 3, kind: input, shape index: {}]   ;;  %s364_s1 = inlined_call_operand.vmem [shape: f32[1,32], index: 1, kind: input, shape index: {}]   ;;  %s365_s2 = inlined_call_operand.vmem [shape: f32[1,32], index: 2, kind: input, shape index: {}]   ;;  %s366_s5 = inlined_call_operand.vmem [shape: f32[64,32], index: 5, kind: input, shape index: {}]   ;;  %s367_s4 = inlined_call_operand.vmem [shape: f32[1,64], index: 4, kind: input, shape index: {}]   ;;  %s368_s6 = inlined_call_operand.vmem [shape: f32[1,32], index: 6, kind: input, shape index: {}]   ;;  %s369_s7 = inlined_call_operand.vmem [shape: f32[8,32], index: 7, kind: output, shape index: {}]  }
   0x1   :  { %v302_v0 = vld [vmem:[%s362_s0] sm:$0xff]  ;;  %227 = vmatprep.subr.bf16.mxu0 %v256_v7  ;;  %v62_v8 = vld [vmem:[%s363_s3 + $0x10] sm:$0xff]  ;;  %v63_v9 = vld [vmem:[%s363_s3 + $0x18] sm:$0xff]  ;;  %231 = vmatprep.mubr.msk.bf16.mxu0 %vm257_vm1, %v256_v7  ;;  %vm163_vm3 = vcmask 523264  }
   0x2   :  { %v31_v1 = vsel %vm30_vm0, %v302_v0, 0.0  ;;  %v60_v10 = vld [vmem:[%s363_s3] sm:$0xff]  ;;  %v65_v11 = vpack.c.bf16 %v63_v9, %v62_v8  ;;  %v61_v12 = vld [vmem:[%s363_s3 + $0x8] sm:$0xff]  ;;  %235 = vmatprep.subr.bf16.mxu1 %v256_v7  ;;  %243 = vmatprep.mubr.msk.bf16.mxu1 %vm257_vm1, %v256_v7  ;;  %v150_v24 = vld [vmem:[%s366_s5 + $0x30] sm:$0xff] }
   0x3   :  { %32 = vadd.xlane.f32.xlu0 %v31_v1  ;;  %v64_v13 = vpack.c.bf16 %v61_v12, %v60_v10  ;;  %v213_v18 = vld [vmem:[%s364_s1] ss:$0 sm:$0xff]  ;;  %v151_v25 = vld [vmem:[%s366_s5 + $0x38] sm:$0xff]  ;;  %v149_v28 = vld [vmem:[%s366_s5 + $0x28] sm:$0xff] }
   0x4   :  { %228 = vmatpush3.bf16.msra.mxu0 %v65_v11  ;;  %v214_v20 = vld [vmem:[%s365_s2] ss:$0 sm:$0xff]  ;;  %v155_v26 = vpack.c.bf16 %v151_v25, %v150_v24  ;;  %v146_v30 = vld [vmem:[%s366_s5 + $0x10] sm:$0xff]  ;;  %v147_v31 = vld [vmem:[%s366_s5 + $0x18] sm:$0xff] }
   0x5   :  { %229 = vmatprep.subr.bf16.mxu0 %v256_v7  ;;  %v148_v27 = vld [vmem:[%s366_s5 + $0x20] sm:$0xff]  ;;  %v153_v32 = vpack.c.bf16 %v147_v31, %v146_v30  ;;  %v145_v34 = vld [vmem:[%s366_s5 + $0x8] sm:$0xff] }
   0x6   :  { %236 = vmatpush3.bf16.msra.mxu1 %v155_v26  ;;  %v154_v29 = vpack.c.bf16 %v149_v28, %v148_v27  ;;  %v144_v33 = vld [vmem:[%s366_s5] sm:$0xff] }
   0x7   :  { %237 = vmatprep.subr.bf16.mxu1 %v256_v7  ;;  %v152_v35 = vpack.c.bf16 %v145_v34, %v144_v33  ;;  %v215_v36 = vld [vmem:[%s367_s4] ss:$0 sm:$0xff] }
   0x8   :  { %230 = vmatpush3.bf16.msra.mxu0 %v64_v13 }
   0xa   :  { %238 = vmatpush3.bf16.msra.mxu1 %v154_v29 }
   0xb   :  { %239 = vmatprep.subr.bf16.mxu1 %v256_v7 }
   0xe   :  { %240 = vmatpush3.bf16.msra.mxu1 %v153_v32 }
   0xf   :  { %241 = vmatprep.subr.bf16.mxu1 %v256_v7 }
  0x12   :  { %242 = vmatpush3.bf16.msra.mxu1 %v152_v35 }
  0x8c   :  { %v33_v2 = vpop.xlane.xlu0 %32 }
  0x8d   :  { %v35_v3 = vmul.f32 0.03125, %v33_v2 }
  0x8f   :  { %v36_v4 = vsub.f32 %v302_v0, %v35_v3 }
  0x91   :  { %v37_v5 = vmul.f32 %v36_v4, %v36_v4 }
  0x93   :  { %v38_v6 = vsel %vm30_vm0, %v37_v5, 0.0 }
  0x94   :  { %39 = vadd.xlane.f32.xlu0 %v38_v6  ;;  %v217_v6 = vld [vmem:[%s368_s6] ss:$0 sm:$0xff] }
 0x11d   :  { %v40_v14 = vpop.xlane.xlu0 %39 }
 0x11e   :  { %v41_v15 = vmul.f32 0.03125, %v40_v14 }
 0x120   :  { %v42_v16 = vadd.f32 1e-06, %v41_v15 }
 0x122   :  { %250 = vrsqrt.f32 %v42_v16 }
 0x12f   :  { %v251_v17 = vpop.eup %250 }
 0x130   :  { %v44_v19 = vmul.f32 %v251_v17, %v36_v4 }
 0x132   :  { %v51_v21 = vmul.f32 %v213_v18, %v44_v19 }
 0x134   :  { %v58_v22 = vadd.f32 %v214_v20, %v51_v21 }
 0x136   :  { %v59_v23 = vpack.c.bf16 %v58_v22, %v58_v22 }
 0x138   :  { %232 = vmatmul.mubr.msk.bf16.vlgmr.msra.gmra.mxu0 %vm30_vm0, %v59_v23 }
 0x1f8   :  { %v110_v37 = vpop.f32.mrf.mxu0 }
 0x1f9   :  { %v111_v38 = vadd.f32 %v215_v36, %v110_v37 }
 0x1fa   :  { %v233_v39 = vpop.f32.mrf.mxu0 }
 0x1fb   :  { %v116_v40 = vmul.f32 0.70710677, %v111_v38  ;;  %v140_v2 = vmul.f32 0.5, %v111_v38 }
 0x1fc   :  { %v113_v41 = vpop.f32.mrf.mxu0 }
 0x1fd   :  { %vm117_vm2 = vcmp.lt.f32.partialorder %v116_v40, 0.0 }
 0x1fe   :  { %v118_v43 = vsel %vm117_vm2, -1.0, %v258_v42  ;;  %v234_v44 = vpop.f32.mrf.mxu0 }
 0x1ff   :  { %v119_v45 = vmul.f32 %v118_v43, %v116_v40 }
 0x201   :  { %v120_v46 = vmul.f32 0.3275911, %v119_v45  ;;  %v133_v48 = vsub.f32 0.0, %v119_v45 }
 0x203   :  { %v121_v47 = vadd.f32 1.0, %v120_v46  ;;  %v134_v49 = vmul.f32 %v133_v48, %v119_v45 }
 0x205   :  { %252 = vrcp.f32 %v121_v47  ;;  %v135_v52 = vmul.f32 1.442695, %v134_v49 }
 0x207   :  { %254 = vpow2.f32 %v135_v52 }
 0x212   :  { %v253_v50 = vpop.eup %252 }
 0x213   :  { %v124_v51 = vmul.f32 1.0614054, %v253_v50 }
 0x214   :  { %v255_v61 = vpop.eup %254 }
 0x215   :  { %v125_v53 = vadd.f32 -1.4531521, %v124_v51 }
 0x217   :  { %v126_v54 = vmul.f32 %v253_v50, %v125_v53 }
 0x219   :  { %v127_v55 = vadd.f32 1.4214138, %v126_v54 }
 0x21b   :  { %v128_v56 = vmul.f32 %v253_v50, %v127_v55 }
 0x21d   :  { %v129_v57 = vadd.f32 -0.28449672, %v128_v56 }
 0x21f   :  { %v130_v58 = vmul.f32 %v253_v50, %v129_v57 }
 0x221   :  { %v131_v59 = vadd.f32 0.2548296, %v130_v58 }
 0x223   :  { %v132_v60 = vmul.f32 %v253_v50, %v131_v59 }
 0x225   :  { %v137_v62 = vmul.f32 %v255_v61, %v132_v60 }
 0x227   :  { %v138_v63 = vsub.f32 1.0, %v137_v62 }
 0x229   :  { %v139_v1 = vmul.f32 %v138_v63, %v118_v43 }
 0x22b   :  { %v141_v3 = vadd.f32 1.0, %v139_v1 }
 0x22d   :  { %v142_v4 = vmul.f32 %v141_v3, %v140_v2 }
 0x22f   :  { %v143_v5 = vpack.c.bf16 %v142_v4, %v142_v4 }
 0x231   :  { %244 = vmatmul.mubr.msk.bf16.vlgmr.msra.gmra.mxu1 %vm163_vm3, %v143_v5 }
 0x2f1   :  { %v201_v7 = vpop.f32.mrf.mxu1 }
 0x2f2   :  { %v202_v8 = vadd.f32 %v217_v6, %v201_v7 }
 0x2f3   :  { %v245_v9 = vpop.f32.mrf.mxu1 }
 0x2f4   :  { %v207_v10 = vadd.f32 %v202_v8, %v302_v0 }
 0x2f5   :  { %v204_v11 = vpop.f32.mrf.mxu1 }
 0x2f6   :  { %208 = vst.msk [vmem:[%s369_s7] sm:$0xff] %vm30_vm0, %v207_v10 }
 0x2f7   :  { %v246_v12 = vpop.f32.mrf.mxu1 }

// kernel: forward.21
= control target key start
LH: loop header
LB: loop body
LE: loop exit
PB: predicated region body
PF: predicated region fallthrough
CT: control target
= control target key end

     0   :  { %vm32_vm0 = vcmask 257024   ;;  %s301_s0 = inlined_call_operand.vmem [shape: f32[2,4,32], index: 0, kind: input, shape index: {}]   ;;  %s302_s1 = inlined_call_operand.vmem [shape: f32[1,1,32], index: 1, kind: input, shape index: {}]   ;;  %s303_s2 = inlined_call_operand.vmem [shape: f32[1,1,32], index: 2, kind: input, shape index: {}]   ;;  %s304_s3 = inlined_call_operand.vmem [shape: f32[32,10], index: 3, kind: input, shape index: {}]   ;;  %s305_s4 = inlined_call_operand.vmem [shape: f32[1,10], index: 4, kind: input, shape index: {}]   ;;  %s306_s5 = inlined_call_operand.hbm [shape: f32[2,10], index: 5, kind: output, shape index: {}]  }
   0x1   :  { %v28_v0 = vld [vmem:[%s301_s0] sm:$0xf]  ;;  %v29_v1 = vld [vmem:[%s301_s0 + $0x4] sm:$0xf] }
   0x2   :  { %v33_v2 = vsel %vm32_vm0, %v28_v0, 0.0 }
   0x3   :  { %10 = vsyncpa [#allocation4], 0  ;;  %34 = vadd.xlane.f32.xlu0 %v33_v2  ;;  %v36_v3 = vsel %vm32_vm0, %v29_v1, 0.0  ;;  %vm26_vm1 = vcmask 254976   ;;  %v230_v14 = vmov 0.0   ;;  %v115_v15 = vld [vmem:[%s304_s3 + $0x10] sm:$0xff]  ;;  %v76_v27 = vlaneseq }
   0x4   :  { %27 = vst.msk [vmem:[#allocation2] sm:$0x3] %vm26_vm1, %v230_v14  ;;  %193 = vmatprep.subr.bf16.mxu0 %v230_v14  ;;  %v116_v16 = vld [vmem:[%s304_s3 + $0x18] sm:$0xff]  ;;  %v113_v17 = vld [vmem:[%s304_s3] sm:$0xff]  ;;  %v114_v19 = vld [vmem:[%s304_s3 + $0x8] sm:$0xff]  ;;  %vm231_vm2 = vmmov 0  }
   0x5   :  { %v118_v18 = vpack.c.bf16 %v116_v16, %v115_v15  ;;  %197 = vmatprep.mubr.msk.bf16.mxu0 %vm231_vm2, %v230_v14  ;;  %v117_v20 = vpack.c.bf16 %v114_v19, %v113_v17  ;;  %v186_v29 = vld [vmem:[%s302_s1] ss:$0 sm:$0xff]  ;;  %v77_v30 = vshrl.u32 %v76_v27, 7  ;;  %vm101_vm4 = vcmask 1041409   ;;  %s232_s7 = smov [#allocation3]  }
   0x6   :  { %v187_v32 = vld [vmem:[%s303_s2] ss:$0 sm:$0xff]  ;;  %vm126_vm5 = vcmask 261120   ;;  %s178_s8 = sshll.u32 %s232_s7, 4  ;;  %vm170_vm6 = vcmask 74752   ;;  %s179_s8 = int_to_ptr.vmem [resolvable:$true] %s178_s8 }
   0x7   :  { %37 = vadd.xlane.f32.xlu0 %v36_v3  ;;  %194 = vmatpush3.bf16.msra.mxu0 %v118_v18  ;;  %vm81_vm3 = vcmp.lt.s32.totalorder %v77_v30, 4  ;;  %v188_v61 = vld [vmem:[%s305_s4] ss:$0 sm:$0xff]  ;;  %s208_s9 = scalar_lea.vmem %s179_s8, 32  ;;  %p213_p1 = scmp.lt.s32.totalorder %s179_s8, %s179_s8 }
   0x8   :  { %195 = vmatprep.subr.bf16.mxu0 %v230_v14  ;;  %p209_p0 = scmp.ne.s32.totalorder %s179_s8, %s208_s9  ;;  %p214_p2 = scmp.lt.s32.totalorder %s208_s9, %s208_s9 }
   0xa   :  { %p215_p3 = por %p214_p2, %p213_p1 }
   0xb   :  { %196 = vmatpush3.bf16.msra.mxu0 %v117_v20  ;;  %v84_v53 = vld [vmem:[#allocation2] sm:$0x3] }
   0xc   :  { %p216_p4 = pnand %p215_p3, %p209_p0 }
  0x8c   :  { %v35_v4 = vpop.xlane.xlu0 %34 }
  0x8d   :  { %v40_v5 = vmul.f32 0.03125, %v35_v4 }
  0x8f   :  { %v42_v6 = vsub.f32 %v28_v0, %v40_v5 }
  0x90   :  { %v38_v7 = vpop.xlane.xlu0 %37 }
  0x91   :  { %v41_v8 = vmul.f32 0.03125, %v38_v7  ;;  %v44_v9 = vmul.f32 %v42_v6, %v42_v6 }
  0x93   :  { %v43_v10 = vsub.f32 %v29_v1, %v41_v8  ;;  %v46_v11 = vsel %vm32_vm0, %v44_v9, 0.0 }
  0x94   :  { %47 = vadd.xlane.f32.xlu1 %v46_v11 }
  0x95   :  { %v45_v12 = vmul.f32 %v43_v10, %v43_v10 }
  0x97   :  { %v49_v13 = vsel %vm32_vm0, %v45_v12, 0.0 }
  0x98   :  { %50 = vadd.xlane.f32.xlu1 %v49_v13 }
 0x11d   :  { %v48_v21 = vpop.xlane.xlu1 %47 }
 0x11e   :  { %v52_v22 = vmul.f32 0.03125, %v48_v21 }
 0x120   :  { %v54_v23 = vadd.f32 1e-06, %v52_v22 }
 0x121   :  { %v51_v24 = vpop.xlane.xlu1 %50 }
 0x122   :  { %204 = vrsqrt.f32 %v54_v23  ;;  %v53_v25 = vmul.f32 0.03125, %v51_v24 }
 0x124   :  { %v55_v26 = vadd.f32 1e-06, %v53_v25 }
 0x126   :  { %206 = vrsqrt.f32 %v55_v26 }
 0x12f   :  { %v205_v28 = vpop.eup %204 }
 0x130   :  { %v58_v31 = vmul.f32 %v205_v28, %v42_v6 }
 0x132   :  { %v66_v33 = vmul.f32 %v186_v29, %v58_v31 }
 0x133   :  { %v207_v34 = vpop.eup %206 }
 0x134   :  { %v74_v35 = vadd.f32 %v187_v32, %v66_v33  ;;  %v59_v36 = vmul.f32 %v207_v34, %v43_v10 }
 0x136   :  { %v82_v37 = vsel %vm81_vm3, %v74_v35, 0.0  ;;  %v67_v38 = vmul.f32 %v186_v29, %v59_v36 }
 0x137   :  { %v85_v39 = vsel %vm32_vm0, %v82_v37, 0.0 }
 0x138   :  { %v86_v40 = vrot.slane %v85_v39, 4  ;;  %v75_v41 = vadd.f32 %v187_v32, %v67_v38 }
 0x13a   :  { %v87_v42 = vadd.f32 %v86_v40, %v85_v39  ;;  %v83_v43 = vsel %vm81_vm3, %v75_v41, 0.0 }
 0x13b   :  { %v92_v44 = vsel %vm32_vm0, %v83_v43, 0.0 }
 0x13c   :  { %v88_v45 = vrot.slane %v87_v42, 2  ;;  %v93_v46 = vrot.slane %v92_v44, 4 }
 0x13e   :  { %v94_v47 = vadd.f32 %v93_v46, %v92_v44  ;;  %v89_v48 = vadd.f32 %v88_v45, %v87_v42 }
 0x140   :  { %v95_v49 = vrot.slane %v94_v47, 2  ;;  %v90_v50 = vrot.slane %v89_v48, 1 }
 0x142   :  { %v96_v51 = vadd.f32 %v95_v49, %v94_v47  ;;  %v91_v54 = vadd.f32 %v90_v50, %v89_v48 }
 0x144   :  { %v97_v52 = vrot.slane %v96_v51, 1 }
 0x146   :  { %v98_v55 = vadd.f32 %v97_v52, %v96_v51 }
 0x148   :  { %v102_v56 = vsel %vm101_vm4, %v98_v55, %v91_v54 }
 0x149   :  { %v104_v57 = vadd.f32 %v102_v56, %v84_v53 }
 0x14b   :  { %106 = vst.msk [vmem:[#allocation2] sm:$0x3] %vm26_vm1, %v104_v57 }
 0x152   :  { %v110_v58 = vld [vmem:[#allocation2] sm:$0x3] }
 0x153   :  { %v111_v59 = vmul.f32 0.25, %v110_v58 }
 0x155   :  { %v112_v60 = vpack.c.bf16 %v111_v59, %v111_v59 }
 0x157   :  { %198 = vmatmul.mubr.msk.bf16.vlgmr.msra.gmra.mxu0 %vm126_vm5, %v112_v60 }
 0x217   :  { %v164_v62 = vpop.f32.mrf.mxu0 }
 0x218   :  { %v165_v63 = vadd.f32 %v188_v61, %v164_v62 }
 0x219   :  { %v199_v0 = vpop.f32.mrf.mxu0 }
 0x21a   :  { %171 = vst.msk [vmem:[#allocation3] sm:$0x3] %vm170_vm6, %v165_v63 }
 0x21b   :  { %v167_v1 = vpop.f32.mrf.mxu0 }
 0x21c   :  { %219 = shalt.err (!%p216_p4)
}
 0x21d   :  { %181 = dma.vmem_to_hbm [thread:$0]  %s179_s8, 32, %s306_s5, [#allocation4]   ;;  %v200_v2 = vpop.f32.mrf.mxu0 }
 0x21e   :  { %228 = dma.done.wait [#allocation4], 32  }
 0x21f   :  { %229 = vsyncadd [#allocation4], 4294967264 }
 0x220   :  { %185 = vsyncpa [#allocation4], 1 }

</bundles_post_ra>
